<compile_context>
chip_gen: v5e
topology: v5e:2x2
jax: 0.10.0
libtpu: 0.0.40
codegen_flags: <defaults>
</compile_context>

<pallas_src>
import functools

import jax
import jax.numpy as jnp
from jax.experimental import pallas as pl
from jax.experimental.pallas import tpu as pltpu


_VMEM = pl.BlockSpec(memory_space=pltpu.MemorySpace.VMEM)


# ---------------------------------------------------------------------------
# Pallas kernels (grid-less, fully VMEM-resident blocks)
# ---------------------------------------------------------------------------
def _mm_bias_kernel(x_ref, w_ref, b_ref, o_ref, *, apply_relu):
    """o = [relu](x @ w + b); bf16 MXU operands, f32 accumulate + epilogue."""
    acc = jnp.dot(x_ref[...], w_ref[...], preferred_element_type=jnp.float32)
    acc = acc + b_ref[...]                      # b_ref is (1, N) f32, broadcasts over rows
    if apply_relu:
        acc = jnp.maximum(acc, 0.0)
    o_ref[...] = acc.astype(o_ref.dtype)


def matmul_bias(x, w, b, *, apply_relu, out_dtype):
    M, K = x.shape
    K2, N = w.shape
    assert K == K2, (K, K2)
    kernel = functools.partial(_mm_bias_kernel, apply_relu=apply_relu)
    return pl.pallas_call(
        kernel,
        out_shape=jax.ShapeDtypeStruct((M, N), out_dtype),
        in_specs=[_VMEM, _VMEM, _VMEM],
        out_specs=_VMEM,
    )(x, w, b)


def _fc_head_kernel(x_ref, w1_ref, b1_ref, w2_ref, b2_ref, o_ref):
    """Fused head: o = relu(x @ w1 + b1) @ w2 + b2 (f32 accumulation throughout)."""
    z = jnp.dot(x_ref[...], w1_ref[...], preferred_element_type=jnp.float32) + b1_ref[...]
    z = jnp.maximum(z, 0.0).astype(jnp.bfloat16)
    o_ref[...] = jnp.dot(z, w2_ref[...], preferred_element_type=jnp.float32) + b2_ref[...]


def fc_head(feat, w1, b1, w2, b2):
    B = feat.shape[0]
    N = w2.shape[1]
    return pl.pallas_call(
        _fc_head_kernel,
        out_shape=jax.ShapeDtypeStruct((B, N), jnp.float32),
        in_specs=[_VMEM] * 5,
        out_specs=_VMEM,
    )(feat, w1, b1, w2, b2)


# ---------------------------------------------------------------------------
# im2col glue (plain JAX, fused under jit): patch columns ordered (kh, kw, C).
# ---------------------------------------------------------------------------
def im2col(x_nhwc, kh, kw, stride):
    B, H, W, C = x_nhwc.shape
    oh = (H - kh) // stride + 1
    ow = (W - kw) // stride + 1
    patches = []
    for i in range(kh):
        for j in range(kw):
            patches.append(x_nhwc[:, i:i + stride * oh:stride, j:j + stride * ow:stride, :])
    p = jnp.stack(patches, axis=3)                       # (B, oh, ow, kh*kw, C)
    return p.reshape(B * oh * ow, kh * kw * C), oh, ow


# ---------------------------------------------------------------------------
# Parameters: raw torch-layout params + one-time kernel-layout preprocessing.
# ---------------------------------------------------------------------------
def init_params(key, hidden_size=256):
    ks = jax.random.split(key, 8)
    scale = 0.05
    return {
        "conv1_w": scale * jax.random.normal(ks[0], (16, 3, 8, 8), jnp.float32),
        "conv1_b": scale * jax.random.normal(ks[1], (16,), jnp.float32),
        "conv2_w": scale * jax.random.normal(ks[2], (32, 16, 4, 4), jnp.float32),
        "conv2_b": scale * jax.random.normal(ks[3], (32,), jnp.float32),
        "fc1_w": scale * jax.random.normal(ks[4], (hidden_size, 1152 * 2), jnp.float32),
        "fc1_b": scale * jax.random.normal(ks[5], (hidden_size,), jnp.float32),
        "fc2_w": scale * jax.random.normal(ks[6], (2, hidden_size), jnp.float32),
        "fc2_b": scale * jax.random.normal(ks[7], (2,), jnp.float32),
    }


def prepare_params(params):
    """One-time (init-time) weight preprocessing into kernel-friendly layouts/dtypes."""
    f32, bf16 = jnp.float32, jnp.bfloat16

    def conv_w(w):  # (oc, ic, kh, kw) -> (kh*kw*ic, oc), matching im2col column order
        oc, ic, kh, kw = w.shape
        return jnp.transpose(w, (2, 3, 1, 0)).reshape(kh * kw * ic, oc).astype(bf16)

    oc2 = params["conv2_w"].shape[0]            # 32
    hidden, feat2 = params["fc1_w"].shape       # (256, 2304)
    half = feat2 // 2                           # 1152
    spatial = half // oc2                       # 36 = 6*6

    # Fold torch's NCHW flatten order (col = oc*36 + s) into the NHWC flatten order
    # (col = s*32 + oc) that our conv2 matmul output produces naturally.
    def perm_half(wh):                          # wh: (hidden, 1152), cols = oc*36 + s
        return wh.reshape(hidden, oc2, spatial).transpose(0, 2, 1).reshape(hidden, half)

    w1 = jnp.concatenate([perm_half(params["fc1_w"][:, :half]),
                          perm_half(params["fc1_w"][:, half:])], axis=1)

    return {
        "cw1": conv_w(params["conv1_w"]),
        "cb1": params["conv1_b"].reshape(1, -1).astype(f32),
        "cw2": conv_w(params["conv2_w"]),
        "cb2": params["conv2_b"].reshape(1, -1).astype(f32),
        "fc1_w": w1.T.astype(bf16),                       # (2304, hidden), NHWC-flatten rows
        "fc1_b": params["fc1_b"].reshape(1, -1).astype(f32),
        "fc2_w": params["fc2_w"].T.astype(bf16),          # (hidden, 2)
        "fc2_b": params["fc2_b"].reshape(1, -1).astype(f32),
    }


# ---------------------------------------------------------------------------
# Forward (jit-compiled): 3 pallas_calls total (conv1, conv2, fused fc head).
# ---------------------------------------------------------------------------
@jax.jit
def siamese_forward(prep, x, y):
    B = x.shape[0]
    # Stack the two siamese branches along batch -> run the conv path once.
    xy = jnp.transpose(jnp.concatenate([x, y], axis=0), (0, 2, 3, 1))   # (2B,64,64,3) NHWC

    p1, oh1, ow1 = im2col(xy.astype(jnp.bfloat16), 8, 8, 4)             # (2B*225, 192)
    a1 = matmul_bias(p1, prep["cw1"], prep["cb1"],
                     apply_relu=True, out_dtype=jnp.bfloat16)           # (2B*225, 16)
    a1 = a1.reshape(2 * B, oh1, ow1, -1)                                # NHWC (2B,15,15,16)

    p2, oh2, ow2 = im2col(a1, 4, 4, 2)                                  # (2B*36, 256)
    a2 = matmul_bias(p2, prep["cw2"], prep["cb2"],
                     apply_relu=True, out_dtype=jnp.bfloat16)           # (2B*36, 32)

    feat = a2.reshape(2 * B, oh2 * ow2 * a2.shape[-1])                  # (2B, 1152) NHWC-flatten
    feat = jnp.concatenate([feat[:B], feat[B:]], axis=1)                # (B, 2304)

    return fc_head(feat, prep["fc1_w"], prep["fc1_b"],
                   prep["fc2_w"], prep["fc2_b"])                        # (B, 2) f32


# ---------------------------------------------------------------------------
# Pure-jnp reference of the torch forward (raw params, NCHW flatten, separate
# branches), mirroring the kernels' bf16-operand / f32-accumulate dtype policy so
# the structural check can stay tight.
# ---------------------------------------------------------------------------
def _siamese_ref(params, x, y):
    bf16, f32 = jnp.bfloat16, jnp.float32

    def mm(a, w, b, relu):
        o = jnp.dot(a.astype(bf16), w.astype(bf16), preferred_element_type=f32)
        o = o + b.astype(f32)[None, :]
        return jnp.maximum(o, 0.0) if relu else o

    def block(xc):
        h = jnp.transpose(xc, (0, 2, 3, 1))
        for w, b, s in ((params["conv1_w"], params["conv1_b"], 4),
                        (params["conv2_w"], params["conv2_b"], 2)):
            oc, ic, kh, kw = w.shape
            p, oh, ow = im2col(h, kh, kw, s)
            wm = jnp.transpose(w, (2, 3, 1, 0)).reshape(kh * kw * ic, oc)
            h = mm(p, wm, b, True).astype(bf16).reshape(xc.shape[0], oh, ow, oc)
        h = jnp.transpose(h, (0, 3, 1, 2))                 # NCHW -> torch's view(-1,1152) order
        return h.reshape(h.shape[0], -1)

    feat = jnp.concatenate([block(x), block(y)], axis=1)
    z = mm(feat, params["fc1_w"].T, params["fc1_b"], True)
    return mm(z, params["fc2_w"].T, params["fc2_b"], False)


if __name__ == "__main__":
    key = jax.random.PRNGKey(0)
    kp, kx, ky = jax.random.split(key, 3)
    params = init_params(kp, hidden_size=256)
    prep = prepare_params(params)

    # NCHW inputs, 64x64 spatial -> 1152 flattened conv features (matches the module).
    x = jax.random.normal(kx, (2, 3, 64, 64), jnp.float32)
    y = jax.random.normal(ky, (2, 3, 64, 64), jnp.float32)

    out = jax.block_until_ready(siamese_forward(prep, x, y))
    assert out.shape == (2, 2), out.shape

    ref = jax.block_until_ready(_siamese_ref(params, x, y))
    assert jnp.allclose(out, ref, atol=2e-3, rtol=2e-3), (out, ref)

    print("KERNEL_OK")
</pallas_src>

<mosaic_0001>
module attributes {stable_mosaic.version = 11 : i64} {
  func.func @_mm_bias_kernel(%arg0: memref<900x192xbf16, #tpu.memory_space<vmem>>, %arg1: memref<192x16xbf16, #tpu.memory_space<vmem>>, %arg2: memref<1x16xf32, #tpu.memory_space<vmem>>, %arg3: memref<900x16xbf16, #tpu.memory_space<vmem>>) attributes {dimension_semantics = [], scalar_prefetch = 0 : i64, scratch_operands = 0 : i64, tpu.core_type = #tpu.core_type<tc>} {
    %c0 = arith.constant 0 : index
    %c0_0 = arith.constant 0 : index
    %0 = vector.load %arg0[%c0, %c0_0] : memref<900x192xbf16, #tpu.memory_space<vmem>>, vector<900x192xbf16>
    %c0_1 = arith.constant 0 : index
    %c0_2 = arith.constant 0 : index
    %1 = vector.load %arg1[%c0_1, %c0_2] : memref<192x16xbf16, #tpu.memory_space<vmem>>, vector<192x16xbf16>
    %cst = arith.constant dense<0.000000e+00> : vector<900x16xf32>
    %2 = tpu.matmul %0, %1, %cst {dimension_numbers = #tpu.dot_dimension_numbers<[1], [0], [0], [1], [0, 0, 1, 1], [], []>} : vector<900x192xbf16>, vector<192x16xbf16>, vector<900x16xf32> -> vector<900x16xf32>
    %c0_3 = arith.constant 0 : index
    %c0_4 = arith.constant 0 : index
    %3 = vector.load %arg2[%c0_3, %c0_4] : memref<1x16xf32, #tpu.memory_space<vmem>>, vector<1x16xf32>
    %4 = vector.broadcast %3 : vector<1x16xf32> to vector<900x16xf32>
    %5 = arith.addf %2, %4 : vector<900x16xf32>
    %cst_5 = arith.constant 0.000000e+00 : f32
    %6 = vector.broadcast %cst_5 : f32 to vector<900x16xf32>
    %7 = arith.maximumf %5, %6 : vector<900x16xf32>
    %8 = arith.truncf %7 : vector<900x16xf32> to vector<900x16xbf16>
    %c0_6 = arith.constant 0 : index
    %c0_7 = arith.constant 0 : index
    %9 = vector.load %arg3[%c0_6, %c0_7] : memref<900x16xbf16, #tpu.memory_space<vmem>>, vector<900x16xbf16>
    tpu.vector_store %arg3[%c0_6, %c0_7], %8 {strides = array<i32>} : memref<900x16xbf16, #tpu.memory_space<vmem>>, vector<900x16xbf16>,
    return
  }
}

module attributes {stable_mosaic.version = 11 : i64} {
  func.func @_mm_bias_kernel(%arg0: memref<144x256xbf16, #tpu.memory_space<vmem>>, %arg1: memref<256x32xbf16, #tpu.memory_space<vmem>>, %arg2: memref<1x32xf32, #tpu.memory_space<vmem>>, %arg3: memref<144x32xbf16, #tpu.memory_space<vmem>>) attributes {dimension_semantics = [], scalar_prefetch = 0 : i64, scratch_operands = 0 : i64, tpu.core_type = #tpu.core_type<tc>} {
    %c0 = arith.constant 0 : index
    %c0_0 = arith.constant 0 : index
    %0 = vector.load %arg0[%c0, %c0_0] : memref<144x256xbf16, #tpu.memory_space<vmem>>, vector<144x256xbf16>
    %c0_1 = arith.constant 0 : index
    %c0_2 = arith.constant 0 : index
    %1 = vector.load %arg1[%c0_1, %c0_2] : memref<256x32xbf16, #tpu.memory_space<vmem>>, vector<256x32xbf16>
    %cst = arith.constant dense<0.000000e+00> : vector<144x32xf32>
    %2 = tpu.matmul %0, %1, %cst {dimension_numbers = #tpu.dot_dimension_numbers<[1], [0], [0], [1], [0, 0, 1, 1], [], []>} : vector<144x256xbf16>, vector<256x32xbf16>, vector<144x32xf32> -> vector<144x32xf32>
    %c0_3 = arith.constant 0 : index
    %c0_4 = arith.constant 0 : index
    %3 = vector.load %arg2[%c0_3, %c0_4] : memref<1x32xf32, #tpu.memory_space<vmem>>, vector<1x32xf32>
    %4 = vector.broadcast %3 : vector<1x32xf32> to vector<144x32xf32>
    %5 = arith.addf %2, %4 : vector<144x32xf32>
    %cst_5 = arith.constant 0.000000e+00 : f32
    %6 = vector.broadcast %cst_5 : f32 to vector<144x32xf32>
    %7 = arith.maximumf %5, %6 : vector<144x32xf32>
    %8 = arith.truncf %7 : vector<144x32xf32> to vector<144x32xbf16>
    %c0_6 = arith.constant 0 : index
    %c0_7 = arith.constant 0 : index
    %9 = vector.load %arg3[%c0_6, %c0_7] : memref<144x32xbf16, #tpu.memory_space<vmem>>, vector<144x32xbf16>
    tpu.vector_store %arg3[%c0_6, %c0_7], %8 {strides = array<i32>} : memref<144x32xbf16, #tpu.memory_space<vmem>>, vector<144x32xbf16>,
    return
  }
}

module attributes {stable_mosaic.version = 11 : i64} {
  func.func @_fc_head_kernel(%arg0: memref<2x2304xbf16, #tpu.memory_space<vmem>>, %arg1: memref<2304x256xbf16, #tpu.memory_space<vmem>>, %arg2: memref<1x256xf32, #tpu.memory_space<vmem>>, %arg3: memref<256x2xbf16, #tpu.memory_space<vmem>>, %arg4: memref<1x2xf32, #tpu.memory_space<vmem>>, %arg5: memref<2x2xf32, #tpu.memory_space<vmem>>) attributes {dimension_semantics = [], scalar_prefetch = 0 : i64, scratch_operands = 0 : i64, tpu.core_type = #tpu.core_type<tc>} {
    %c0 = arith.constant 0 : index
    %c0_0 = arith.constant 0 : index
    %0 = vector.load %arg0[%c0, %c0_0] : memref<2x2304xbf16, #tpu.memory_space<vmem>>, vector<2x2304xbf16>
    %c0_1 = arith.constant 0 : index
    %c0_2 = arith.constant 0 : index
    %1 = vector.load %arg1[%c0_1, %c0_2] : memref<2304x256xbf16, #tpu.memory_space<vmem>>, vector<2304x256xbf16>
    %cst = arith.constant dense<0.000000e+00> : vector<2x256xf32>
    %2 = tpu.matmul %0, %1, %cst {dimension_numbers = #tpu.dot_dimension_numbers<[1], [0], [0], [1], [0, 0, 1, 1], [], []>} : vector<2x2304xbf16>, vector<2304x256xbf16>, vector<2x256xf32> -> vector<2x256xf32>
    %c0_3 = arith.constant 0 : index
    %c0_4 = arith.constant 0 : index
    %3 = vector.load %arg2[%c0_3, %c0_4] : memref<1x256xf32, #tpu.memory_space<vmem>>, vector<1x256xf32>
    %4 = vector.broadcast %3 : vector<1x256xf32> to vector<2x256xf32>
    %5 = arith.addf %2, %4 : vector<2x256xf32>
    %cst_5 = arith.constant 0.000000e+00 : f32
    %6 = vector.broadcast %cst_5 : f32 to vector<2x256xf32>
    %7 = arith.maximumf %5, %6 : vector<2x256xf32>
    %8 = arith.truncf %7 : vector<2x256xf32> to vector<2x256xbf16>
    %c0_6 = arith.constant 0 : index
    %c0_7 = arith.constant 0 : index
    %9 = vector.load %arg3[%c0_6, %c0_7] : memref<256x2xbf16, #tpu.memory_space<vmem>>, vector<256x2xbf16>
    %cst_8 = arith.constant dense<0.000000e+00> : vector<2x2xf32>
    %10 = tpu.matmul %8, %9, %cst_8 {dimension_numbers = #tpu.dot_dimension_numbers<[1], [0], [0], [1], [0, 0, 1, 1], [], []>} : vector<2x256xbf16>, vector<256x2xbf16>, vector<2x2xf32> -> vector<2x2xf32>
    %c0_9 = arith.constant 0 : index
    %c0_10 = arith.constant 0 : index
    %11 = vector.load %arg4[%c0_9, %c0_10] : memref<1x2xf32, #tpu.memory_space<vmem>>, vector<1x2xf32>
    %12 = vector.broadcast %11 : vector<1x2xf32> to vector<2x2xf32>
    %13 = arith.addf %10, %12 : vector<2x2xf32>
    %c0_11 = arith.constant 0 : index
    %c0_12 = arith.constant 0 : index
    %14 = vector.load %arg5[%c0_11, %c0_12] : memref<2x2xf32, #tpu.memory_space<vmem>>, vector<2x2xf32>
    tpu.vector_store %arg5[%c0_11, %c0_12], %13 {strides = array<i32>} : memref<2x2xf32, #tpu.memory_space<vmem>>, vector<2x2xf32>,
    return
  }
}

</mosaic_0001>

<bundles_post_ra>
// kernel: siamese_forward.3
= control target key start
LH: loop header
LB: loop body
LE: loop exit
PB: predicated region body
PF: predicated region fallthrough
CT: control target
= control target key end

     0   :  { %vm738_vm0 = vcmask 523264   ;;  %vm1722_vm1 = vcmask 125952   ;;  %vm1835_vm2 = vcmask 123904   ;;  %s4039_s1 = inlined_call_operand.vmem [shape: bf16[192,16], index: 1, kind: input, shape index: {}]   ;;  %s4040_s0 = inlined_call_operand.vmem [shape: bf16[900,192], index: 0, kind: input, shape index: {}]   ;;  %s4041_s2 = inlined_call_operand.vmem [shape: f32[1,16], index: 2, kind: input, shape index: {}]   ;;  %s4042_s3 = inlined_call_operand.vmem [shape: bf16[900,16], index: 3, kind: output, shape index: {}]  }
   0x1   :  { %v2513_v0 = vld [vmem:[%s4039_s1 + $0x38] sm:$0xff]  ;;  %v2512_v2 = vld [vmem:[%s4039_s1 + $0x30] sm:$0xff]  ;;  %v2511_v4 = vld [vmem:[%s4039_s1 + $0x28] sm:$0xff] }
   0x2   :  { %v2517_v1 = vld [vmem:[%s4039_s1 + $0x58] sm:$0xff]  ;;  %910 = vmatpush.bf16.msra.mxu0 %v2513_v0  ;;  %2518 = vmatpush.bf16.msra.mxu2 %v2513_v0  ;;  %v2516_v3 = vld [vmem:[%s4039_s1 + $0x50] sm:$0xff]  ;;  %v2515_v5 = vld [vmem:[%s4039_s1 + $0x48] sm:$0xff] }
   0x3   :  { %1207 = vmatpush.bf16.msra.mxu1 %v2517_v1  ;;  %2526 = vmatpush.bf16.msra.mxu3 %v2517_v1  ;;  %v2510_v6 = vld [vmem:[%s4039_s1 + $0x20] sm:$0xff]  ;;  %v1845_v9 = vld [vmem:[%s4040_s0 + $0x8] sm:$0xf0]  ;;  %v2452_v10 = vld [vmem:[%s4040_s0 + $0x1d4] sm:$0xf] }
   0x4   :  { %v2514_v7 = vld [vmem:[%s4039_s1 + $0x40] sm:$0xff]  ;;  %v2077_v11 = vld [vmem:[%s4040_s0 + $0x1d8] sm:$0xf0]  ;;  %v2508_v15 = vld [vmem:[%s4039_s1 + $0x10] sm:$0xff] }
   0x5   :  { %v2394_v8 = vld [vmem:[%s4040_s0 + $0x4] sm:$0xf]  ;;  %v2509_v13 = vld [vmem:[%s4039_s1 + $0x18] sm:$0xff]  ;;  %v2080_v14 = vor.u32 %v2452_v10, %v2077_v11  ;;  %v2507_v16 = vld [vmem:[%s4039_s1 + $0x8] sm:$0xff] }
   0x6   :  { %911 = vmatpush.bf16.msra.mxu0 %v2512_v2  ;;  %2519 = vmatpush.bf16.msra.mxu2 %v2512_v2  ;;  %v1848_v12 = vor.u32 %v2394_v8, %v1845_v9  ;;  %v2506_v17 = vld [vmem:[%s4039_s1] sm:$0xff]  ;;  %v2395_v19 = vld [vmem:[%s4040_s0 + $0x4] sm:$0xf0]  ;;  %v2396_v22 = vld [vmem:[%s4040_s0 + $0x14] sm:$0xf] }
   0x7   :  { %1208 = vmatpush.bf16.msra.mxu1 %v2516_v3  ;;  %2527 = vmatpush.bf16.msra.mxu3 %v2516_v3  ;;  %v1843_v18 = vld [vmem:[%s4040_s0] sm:$0xf]  ;;  %v2451_v21 = vld [vmem:[%s4040_s0 + $0x1c4] sm:$0xf0]  ;;  %v1853_v23 = vld [vmem:[%s4040_s0 + $0x18] sm:$0xf0] }
   0x8   :  { %v2067_v20 = vld [vmem:[%s4040_s0 + $0x1c0] sm:$0xf]  ;;  %v2454_v24 = vld [vmem:[%s4040_s0 + $0x1e4] sm:$0xf]  ;;  %v2085_v25 = vld [vmem:[%s4040_s0 + $0x1e8] sm:$0xf0]  ;;  %v1844_v26 = vor.u32 %v2395_v19, %v1843_v18  ;;  %v1856_v28 = vor.u32 %v2396_v22, %v1853_v23 }
   0x9   :  { %v2068_v27 = vor.u32 %v2451_v21, %v2067_v20  ;;  %v2088_v29 = vor.u32 %v2454_v24, %v2085_v25  ;;  %v1851_v30 = vld [vmem:[%s4040_s0 + $0x10] sm:$0xf]  ;;  %v2397_v31 = vld [vmem:[%s4040_s0 + $0x14] sm:$0xf0]  ;;  %v2398_v34 = vld [vmem:[%s4040_s0 + $0x24] sm:$0xf] }
   0xa   :  { %912 = vmatpush.bf16.msra.mxu0 %v2511_v4  ;;  %2520 = vmatpush.bf16.msra.mxu2 %v2511_v4  ;;  %v2075_v32 = vld [vmem:[%s4040_s0 + $0x1d0] sm:$0xf]  ;;  %v2453_v33 = vld [vmem:[%s4040_s0 + $0x1d4] sm:$0xf0]  ;;  %v1861_v35 = vld [vmem:[%s4040_s0 + $0x28] sm:$0xf0]  ;;  %v1852_v38 = vor.u32 %v2397_v31, %v1851_v30 }
   0xb   :  { %1209 = vmatpush.bf16.msra.mxu1 %v2515_v5  ;;  %2528 = vmatpush.bf16.msra.mxu3 %v2515_v5  ;;  %v2456_v36 = vld [vmem:[%s4040_s0 + $0x1f4] sm:$0xf]  ;;  %v2093_v37 = vld [vmem:[%s4040_s0 + $0x1f8] sm:$0xf0]  ;;  %v2076_v39 = vor.u32 %v2453_v33, %v2075_v32  ;;  %v1864_v40 = vor.u32 %v2398_v34, %v1861_v35  ;;  %v1859_v42 = vld [vmem:[%s4040_s0 + $0x20] sm:$0xf] }
   0xc   :  { %v2096_v41 = vor.u32 %v2456_v36, %v2093_v37  ;;  %v2399_v43 = vld [vmem:[%s4040_s0 + $0x24] sm:$0xf0]  ;;  %v2083_v44 = vld [vmem:[%s4040_s0 + $0x1e0] sm:$0xf]  ;;  %v2400_v46 = vld [vmem:[%s4040_s0 + $0x34] sm:$0xf] }
   0xd   :  { %v2455_v45 = vld [vmem:[%s4040_s0 + $0x1e4] sm:$0xf0]  ;;  %v1869_v47 = vld [vmem:[%s4040_s0 + $0x38] sm:$0xf0]  ;;  %v2458_v48 = vld [vmem:[%s4040_s0 + $0x204] sm:$0xf]  ;;  %v1860_v50 = vor.u32 %v2399_v43, %v1859_v42 }
   0xe   :  { %913 = vmatpush.bf16.msra.mxu0 %v2510_v6  ;;  %2521 = vmatpush.bf16.msra.mxu2 %v2510_v6  ;;  %v2101_v49 = vld [vmem:[%s4040_s0 + $0x208] sm:$0xf0]  ;;  %v2084_v51 = vor.u32 %v2455_v45, %v2083_v44  ;;  %v1872_v52 = vor.u32 %v2400_v46, %v1869_v47  ;;  %v1867_v54 = vld [vmem:[%s4040_s0 + $0x30] sm:$0xf]  ;;  %v2401_v55 = vld [vmem:[%s4040_s0 + $0x34] sm:$0xf0] }
   0xf   :  { %1210 = vmatpush.bf16.msra.mxu1 %v2514_v7  ;;  %2529 = vmatpush.bf16.msra.mxu3 %v2514_v7  ;;  %v2104_v53 = vor.u32 %v2458_v48, %v2101_v49  ;;  %v2091_v56 = vld [vmem:[%s4040_s0 + $0x1f0] sm:$0xf]  ;;  %v2457_v57 = vld [vmem:[%s4040_s0 + $0x1f4] sm:$0xf0]  ;;  %v2402_v58 = vld [vmem:[%s4040_s0 + $0x44] sm:$0xf]  ;;  %v1868_v62 = vor.u32 %v2401_v55, %v1867_v54 }
  0x10   :  { %v1877_v59 = vld [vmem:[%s4040_s0 + $0x48] sm:$0xf0]  ;;  %v2460_v60 = vld [vmem:[%s4040_s0 + $0x214] sm:$0xf]  ;;  %v2109_v61 = vld [vmem:[%s4040_s0 + $0x218] sm:$0xf0]  ;;  %v2092_v63 = vor.u32 %v2457_v57, %v2091_v56 }
  0x11   :  { %v1880_v0 = vor.u32 %v2402_v58, %v1877_v59  ;;  %v2112_v1 = vor.u32 %v2460_v60, %v2109_v61  ;;  %v1875_v2 = vld [vmem:[%s4040_s0 + $0x40] sm:$0xf]  ;;  %v2403_v3 = vld [vmem:[%s4040_s0 + $0x44] sm:$0xf0]  ;;  %v2404_v6 = vld [vmem:[%s4040_s0 + $0x54] sm:$0xf] }
  0x12   :  { %2337 = vmatmul.msk.bf16.vlgmr.msra.gmra.mxu1 %vm738_vm0, %v1848_v12  ;;  %914 = vmatpush.bf16.msra.mxu0 %v2509_v13  ;;  %v2099_v4 = vld [vmem:[%s4040_s0 + $0x200] sm:$0xf]  ;;  %v2459_v5 = vld [vmem:[%s4040_s0 + $0x204] sm:$0xf0]  ;;  %v1885_v7 = vld [vmem:[%s4040_s0 + $0x58] sm:$0xf0]  ;;  %v1876_v10 = vor.u32 %v2403_v3, %v1875_v2 }
  0x13   :  { %2522 = vmatpush.bf16.msra.mxu2 %v2509_v13  ;;  %2366 = vmatmul.msk.bf16.vlgmr.msra.gmra.mxu3 %vm738_vm0, %v2080_v14  ;;  %v2462_v8 = vld [vmem:[%s4040_s0 + $0x224] sm:$0xf]  ;;  %v2117_v9 = vld [vmem:[%s4040_s0 + $0x228] sm:$0xf0]  ;;  %v2100_v11 = vor.u32 %v2459_v5, %v2099_v4  ;;  %v1888_v12 = vor.u32 %v2404_v6, %v1885_v7  ;;  %v1883_v14 = vld [vmem:[%s4040_s0 + $0x50] sm:$0xf] }
  0x14   :  { %v2120_v13 = vor.u32 %v2462_v8, %v2117_v9  ;;  %v2406_v18 = vld [vmem:[%s4040_s0 + $0x64] sm:$0xf]  ;;  %v1893_v19 = vld [vmem:[%s4040_s0 + $0x68] sm:$0xf0]  ;;  %v2464_v20 = vld [vmem:[%s4040_s0 + $0x234] sm:$0xf] }
  0x15   :  { %v2125_v21 = vld [vmem:[%s4040_s0 + $0x238] sm:$0xf0]  ;;  %v1896_v24 = vor.u32 %v2406_v18, %v1893_v19  ;;  %v2408_v30 = vld [vmem:[%s4040_s0 + $0x74] sm:$0xf]  ;;  %v2466_v32 = vld [vmem:[%s4040_s0 + $0x244] sm:$0xf] }
  0x16   :  { %915 = vmatpush.bf16.msra.mxu0 %v2508_v15  ;;  %v2128_v25 = vor.u32 %v2464_v20, %v2125_v21  ;;  %v1901_v31 = vld [vmem:[%s4040_s0 + $0x78] sm:$0xf0]  ;;  %v2133_v33 = vld [vmem:[%s4040_s0 + $0x248] sm:$0xf0]  ;;  %v2410_v42 = vld [vmem:[%s4040_s0 + $0x84] sm:$0xf] }
  0x17   :  { %2523 = vmatpush.bf16.msra.mxu2 %v2508_v15  ;;  %v2405_v15 = vld [vmem:[%s4040_s0 + $0x54] sm:$0xf0]  ;;  %v1904_v36 = vor.u32 %v2408_v30, %v1901_v31  ;;  %v2136_v37 = vor.u32 %v2466_v32, %v2133_v33  ;;  %v1909_v43 = vld [vmem:[%s4040_s0 + $0x88] sm:$0xf0]  ;;  %v2468_v44 = vld [vmem:[%s4040_s0 + $0x254] sm:$0xf] }
  0x18   :  { %v1884_v22 = vor.u32 %v2405_v15, %v1883_v14  ;;  %v2141_v45 = vld [vmem:[%s4040_s0 + $0x258] sm:$0xf0]  ;;  %v1912_v48 = vor.u32 %v2410_v42, %v1909_v43  ;;  %v1907_v54 = vld [vmem:[%s4040_s0 + $0x80] sm:$0xf]  ;;  %v2411_v55 = vld [vmem:[%s4040_s0 + $0x84] sm:$0xf0] }
  0x19   :  { %v2131_v56 = vld [vmem:[%s4040_s0 + $0x240] sm:$0xf]  ;;  %v2467_v57 = vld [vmem:[%s4040_s0 + $0x244] sm:$0xf0]  ;;  %v2412_v58 = vld [vmem:[%s4040_s0 + $0x94] sm:$0xf] }
  0x1a   :  { %916 = vmatpush.bf16.msra.mxu0 %v2507_v16  ;;  %v1917_v59 = vld [vmem:[%s4040_s0 + $0x98] sm:$0xf0]  ;;  %v2470_v60 = vld [vmem:[%s4040_s0 + $0x264] sm:$0xf]  ;;  %v2149_v61 = vld [vmem:[%s4040_s0 + $0x268] sm:$0xf0] }
  0x1b   :  { %2524 = vmatpush.bf16.msra.mxu2 %v2507_v16  ;;  %v2107_v16 = vld [vmem:[%s4040_s0 + $0x210] sm:$0xf]  ;;  %v2152_v5 = vor.u32 %v2470_v60, %v2149_v61  ;;  %v2469_v18 = vld [vmem:[%s4040_s0 + $0x254] sm:$0xf0]  ;;  %v2414_v20 = vld [vmem:[%s4040_s0 + $0xa4] sm:$0xf] }
  0x1c   :  { %v1915_v15 = vld [vmem:[%s4040_s0 + $0x90] sm:$0xf]  ;;  %v1925_v21 = vld [vmem:[%s4040_s0 + $0xa8] sm:$0xf0] }
  0x1e   :  { %917 = vmatpush.bf16.msra.mxu0 %v2506_v17 }
  0x1f   :  { %2525 = vmatpush.bf16.msra.mxu2 %v2506_v17  ;;  %v2461_v17 = vld [vmem:[%s4040_s0 + $0x214] sm:$0xf0] }
  0x20   :  { %v2108_v23 = vor.u32 %v2461_v17, %v2107_v16  ;;  %v2413_v16 = vld [vmem:[%s4040_s0 + $0x94] sm:$0xf0]  ;;  %v2139_v17 = vld [vmem:[%s4040_s0 + $0x250] sm:$0xf] }
  0x21   :  { %918 = vmatmul.bf16.vlgmr.msra.gmra.mxu0 %v1844_v26  ;;  %v1891_v26 = vld [vmem:[%s4040_s0 + $0x60] sm:$0xf] }
  0x22   :  { %1058 = vmatmul.bf16.vlgmr.msra.gmra.mxu2 %v2068_v27  ;;  %2338 = vmatmul.msk.bf16.gmra.mxu1 %vm738_vm0, %v1856_v28  ;;  %v2407_v27 = vld [vmem:[%s4040_s0 + $0x64] sm:$0xf0]  ;;  %v2115_v28 = vld [vmem:[%s4040_s0 + $0x220] sm:$0xf] }
  0x23   :  { %2367 = vmatmul.msk.bf16.gmra.mxu3 %vm738_vm0, %v2088_v29  ;;  %v2463_v29 = vld [vmem:[%s4040_s0 + $0x224] sm:$0xf0]  ;;  %v1892_v34 = vor.u32 %v2407_v27, %v1891_v26  ;;  %v1916_v26 = vor.u32 %v2413_v16, %v1915_v15 }
  0x24   :  { %v2116_v35 = vor.u32 %v2463_v29, %v2115_v28  ;;  %v2140_v28 = vor.u32 %v2469_v18, %v2139_v17  ;;  %v1928_v29 = vor.u32 %v2414_v20, %v1925_v21  ;;  %v1931_v20 = vld [vmem:[%s4040_s0 + $0xb0] sm:$0xf]  ;;  %v2417_v21 = vld [vmem:[%s4040_s0 + $0xb4] sm:$0xf0] }
  0x31   :  { %923 = vmatmul.bf16.gmra.mxu0 %v1852_v38  ;;  %v1899_v38 = vld [vmem:[%s4040_s0 + $0x70] sm:$0xf] }
  0x32   :  { %1063 = vmatmul.bf16.gmra.mxu2 %v2076_v39  ;;  %2339 = vmatmul.msk.bf16.gmra.mxu1 %vm738_vm0, %v1864_v40  ;;  %v2409_v39 = vld [vmem:[%s4040_s0 + $0x74] sm:$0xf0]  ;;  %v2123_v40 = vld [vmem:[%s4040_s0 + $0x230] sm:$0xf] }
  0x33   :  { %2368 = vmatmul.msk.bf16.gmra.mxu3 %vm738_vm0, %v2096_v41  ;;  %v2465_v41 = vld [vmem:[%s4040_s0 + $0x234] sm:$0xf0]  ;;  %v1900_v46 = vor.u32 %v2409_v39, %v1899_v38 }
  0x34   :  { %v2124_v47 = vor.u32 %v2465_v41, %v2123_v40 }
  0x41   :  { %928 = vmatmul.bf16.gmra.mxu0 %v1860_v50  ;;  %v2144_v50 = vor.u32 %v2468_v44, %v2141_v45  ;;  %v1923_v45 = vld [vmem:[%s4040_s0 + $0xa0] sm:$0xf] }
  0x42   :  { %1068 = vmatmul.bf16.gmra.mxu2 %v2084_v51  ;;  %2340 = vmatmul.msk.bf16.gmra.mxu1 %vm738_vm0, %v1872_v52 }
  0x43   :  { %2369 = vmatmul.msk.bf16.gmra.mxu3 %vm738_vm0, %v2104_v53  ;;  %v2816_v53 = vld [vmem:[%s4041_s2] ss:$0 sm:$0xff] }
  0x51   :  { %933 = vmatmul.bf16.gmra.mxu0 %v1868_v62  ;;  %v1908_v62 = vor.u32 %v2411_v55, %v1907_v54  ;;  %v2474_v55 = vld [vmem:[%s4040_s0 + $0x284] sm:$0xf] }
  0x52   :  { %1073 = vmatmul.bf16.gmra.mxu2 %v2092_v63  ;;  %2341 = vmatmul.msk.bf16.gmra.mxu1 %vm738_vm0, %v1880_v0  ;;  %v2132_v0 = vor.u32 %v2467_v57, %v2131_v56  ;;  %v2165_v56 = vld [vmem:[%s4040_s0 + $0x288] sm:$0xf0] }
  0x53   :  { %2370 = vmatmul.msk.bf16.gmra.mxu3 %vm738_vm0, %v2112_v1  ;;  %v1920_v1 = vor.u32 %v2412_v58, %v1917_v59 }
  0x61   :  { %938 = vmatmul.bf16.gmra.mxu0 %v1876_v10 }
  0x62   :  { %1078 = vmatmul.bf16.gmra.mxu2 %v2100_v11  ;;  %2342 = vmatmul.msk.bf16.gmra.mxu1 %vm738_vm0, %v1888_v12 }
  0x63   :  { %2371 = vmatmul.msk.bf16.gmra.mxu3 %vm738_vm0, %v2120_v13 }
  0x71   :  { %943 = vmatmul.bf16.gmra.mxu0 %v1884_v22  ;;  %v2472_v22 = vld [vmem:[%s4040_s0 + $0x274] sm:$0xf] }
  0x72   :  { %1083 = vmatmul.bf16.gmra.mxu2 %v2108_v23  ;;  %2343 = vmatmul.msk.bf16.gmra.mxu1 %vm738_vm0, %v1896_v24  ;;  %v2157_v23 = vld [vmem:[%s4040_s0 + $0x278] sm:$0xf0] }
  0x73   :  { %2372 = vmatmul.msk.bf16.gmra.mxu3 %vm738_vm0, %v2128_v25  ;;  %v2160_v33 = vor.u32 %v2472_v22, %v2157_v23  ;;  %v2155_v23 = vld [vmem:[%s4040_s0 + $0x270] sm:$0xf] }
  0x81   :  { %948 = vmatmul.bf16.gmra.mxu0 %v1892_v34 }
  0x82   :  { %1088 = vmatmul.bf16.gmra.mxu2 %v2116_v35  ;;  %2344 = vmatmul.msk.bf16.gmra.mxu1 %vm738_vm0, %v1904_v36 }
  0x83   :  { %2373 = vmatmul.msk.bf16.gmra.mxu3 %vm738_vm0, %v2136_v37 }
  0x8f   :  { %v1212_v49 = vpop.f32.mrf.mxu1 }
  0x91   :  { %953 = vmatmul.bf16.gmra.mxu0 %v1900_v46  ;;  %v2415_v46 = vld [vmem:[%s4040_s0 + $0xa4] sm:$0xf0] }
  0x92   :  { %1093 = vmatmul.bf16.gmra.mxu2 %v2124_v47  ;;  %2345 = vmatmul.msk.bf16.gmra.mxu1 %vm738_vm0, %v1912_v48  ;;  %v2147_v48 = vld [vmem:[%s4040_s0 + $0x260] sm:$0xf]  ;;  %v1924_v59 = vor.u32 %v2415_v46, %v1923_v45 }
  0x93   :  { %2374 = vmatmul.msk.bf16.gmra.mxu3 %vm738_vm0, %v2144_v50 }
  0x96   :  { %v2811_v51 = vpop.f32.mrf.mxu3 }
  0x97   :  { %v1214_v52 = vpop.f32.mrf.mxu1 }
  0x9e   :  { %v919_v63 = vpop.f32.mrf.mxu0  ;;  %v2842_v2 = vpop.f32.mrf.mxu3 }
  0x9f   :  { %v920_v3 = vadd.f32 %v2816_v53, %v919_v63  ;;  %v1217_v4 = vpop.f32.mrf.mxu1 }
  0xa1   :  { %v1213_v6 = vadd.f32 %v1212_v49, %v920_v3  ;;  %958 = vmatmul.bf16.gmra.mxu0 %v1908_v62  ;;  %v2471_v49 = vld [vmem:[%s4040_s0 + $0x264] sm:$0xf0] }
  0xa2   :  { %1098 = vmatmul.bf16.gmra.mxu2 %v2132_v0  ;;  %2346 = vmatmul.msk.bf16.gmra.mxu1 %vm738_vm0, %v1920_v1  ;;  %v2148_v62 = vor.u32 %v2471_v49, %v2147_v48 }
  0xa3   :  { %v1496_v7 = vmax.f32 %v1213_v6, 0.0  ;;  %2375 = vmatmul.msk.bf16.gmra.mxu3 %vm738_vm0, %v2152_v5 }
  0xa5   :  { %v1609_v8 = vpack.c.bf16 %v1496_v7, %v1496_v7  ;;  %v2847_v9 = vpop.f32.mrf.mxu2 }
  0xa6   :  { %v921_v10 = vpop.f32.mrf.mxu0  ;;  %v2849_v11 = vpop.f32.mrf.mxu3 }
  0xa7   :  { %1723 = vst.msk [vmem:[%s4042_s3] sm:$0xf] %vm1722_vm1, %v1609_v8  ;;  %v922_v12 = vadd.f32 %v2816_v53, %v921_v10  ;;  %v1219_v13 = vpop.f32.mrf.mxu1 }
  0xa9   :  { %v1215_v14 = vadd.f32 %v1214_v52, %v922_v12  ;;  %v1933_v52 = vld [vmem:[%s4040_s0 + $0xb8] sm:$0xf0] }
  0xab   :  { %v1497_v19 = vmax.f32 %v1215_v14, 0.0 }
  0xad   :  { %v1610_v24 = vpack.c.bf16 %v1497_v19, %v1497_v19  ;;  %v2880_v25 = vpop.f32.mrf.mxu2 }
  0xae   :  { %v924_v27 = vpop.f32.mrf.mxu0  ;;  %v2882_v30 = vpop.f32.mrf.mxu3 }
  0xaf   :  { %1724 = vst.msk [vmem:[%s4042_s3 + $0x4] sm:$0xf] %vm1722_vm1, %v1610_v24  ;;  %v925_v31 = vadd.f32 %v2816_v53, %v924_v27  ;;  %v1222_v32 = vpop.f32.mrf.mxu1  ;;  %v2473_v24 = vld [vmem:[%s4040_s0 + $0x274] sm:$0xf0]  ;;  %v1941_v27 = vld [vmem:[%s4040_s0 + $0xc8] sm:$0xf0] }
  0xb1   :  { %v1218_v34 = vadd.f32 %v1217_v4, %v925_v31  ;;  %963 = vmatmul.bf16.gmra.mxu0 %v1916_v26  ;;  %v2168_v4 = vor.u32 %v2474_v55, %v2165_v56  ;;  %v2173_v31 = vld [vmem:[%s4040_s0 + $0x298] sm:$0xf0] }
  0xb2   :  { %1103 = vmatmul.bf16.gmra.mxu2 %v2140_v28  ;;  %2347 = vmatmul.msk.bf16.gmra.mxu1 %vm738_vm0, %v1928_v29  ;;  %v2476_v29 = vld [vmem:[%s4040_s0 + $0x294] sm:$0xf] }
  0xb3   :  { %v1498_v35 = vmax.f32 %v1218_v34, 0.0  ;;  %2376 = vmatmul.msk.bf16.gmra.mxu3 %vm738_vm0, %v2160_v33  ;;  %v1932_v34 = vor.u32 %v2417_v21, %v1931_v20 }
  0xb5   :  { %v1611_v36 = vpack.c.bf16 %v1498_v35, %v1498_v35  ;;  %v1064_v37 = vpop.f32.mrf.mxu2 }
  0xb6   :  { %v1065_v38 = vadd.f32 %v2816_v53, %v1064_v37  ;;  %v926_v39 = vpop.f32.mrf.mxu0  ;;  %v2892_v40 = vpop.f32.mrf.mxu3  ;;  %v2156_v37 = vor.u32 %v2473_v24, %v2155_v23 }
  0xb7   :  { %1725 = vst.msk [vmem:[%s4042_s3 + $0x8] sm:$0xf] %vm1722_vm1, %v1611_v36  ;;  %v927_v41 = vadd.f32 %v2816_v53, %v926_v39  ;;  %v1224_v42 = vpop.f32.mrf.mxu1 }
  0xb8   :  { %v1358_v43 = vadd.f32 %v2811_v51, %v1065_v38  ;;  %v2416_v51 = vld [vmem:[%s4040_s0 + $0xb4] sm:$0xf] }
  0xb9   :  { %v1220_v44 = vadd.f32 %v1219_v13, %v927_v41  ;;  %v1936_v63 = vor.u32 %v2416_v51, %v1933_v52 }
  0xba   :  { %v1554_v47 = vmax.f32 %v1358_v43, 0.0  ;;  %v2176_v43 = vor.u32 %v2476_v29, %v2173_v31 }
  0xbb   :  { %v1499_v50 = vmax.f32 %v1220_v44, 0.0 }
  0xbc   :  { %v1667_v54 = vpack.c.bf16 %v1554_v47, %v1554_v47 }
  0xbd   :  { %v1612_v57 = vpack.c.bf16 %v1499_v50, %v1499_v50  ;;  %v1066_v58 = vpop.f32.mrf.mxu2 }
  0xbe   :  { %1781 = vst.msk [vmem:[%s4042_s3 + $0xe8] sm:$0xf] %vm1722_vm1, %v1667_v54  ;;  %v1067_v60 = vadd.f32 %v2816_v53, %v1066_v58  ;;  %v929_v61 = vpop.f32.mrf.mxu0  ;;  %v2929_v0 = vpop.f32.mrf.mxu3  ;;  %v1939_v58 = vld [vmem:[%s4040_s0 + $0xc0] sm:$0xf] }
  0xbf   :  { %1726 = vst.msk [vmem:[%s4042_s3 + $0xc] sm:$0xf] %vm1722_vm1, %v1612_v57  ;;  %v930_v1 = vadd.f32 %v2816_v53, %v929_v61  ;;  %v1227_v3 = vpop.f32.mrf.mxu1  ;;  %v2163_v61 = vld [vmem:[%s4040_s0 + $0x280] sm:$0xf] }
  0xc0   :  { %v1360_v5 = vadd.f32 %v2842_v2, %v1067_v60 }
  0xc1   :  { %v1223_v6 = vadd.f32 %v1222_v32, %v930_v1  ;;  %968 = vmatmul.bf16.gmra.mxu0 %v1924_v59  ;;  %v2419_v59 = vld [vmem:[%s4040_s0 + $0xc4] sm:$0xf0]  ;;  %v1949_v1 = vld [vmem:[%s4040_s0 + $0xd8] sm:$0xf0] }
  0xc2   :  { %v1555_v7 = vmax.f32 %v1360_v5, 0.0  ;;  %1108 = vmatmul.bf16.gmra.mxu2 %v2148_v62  ;;  %2348 = vmatmul.msk.bf16.gmra.mxu1 %vm738_vm0, %v1936_v63  ;;  %v2475_v62 = vld [vmem:[%s4040_s0 + $0x284] sm:$0xf0]  ;;  %v2181_v5 = vld [vmem:[%s4040_s0 + $0x2a8] sm:$0xf0] }
  0xc3   :  { %v1500_v8 = vmax.f32 %v1223_v6, 0.0  ;;  %2377 = vmatmul.msk.bf16.gmra.mxu3 %vm738_vm0, %v2168_v4  ;;  %v2478_v4 = vld [vmem:[%s4040_s0 + $0x2a4] sm:$0xf] }
  0xc4   :  { %v1668_v10 = vpack.c.bf16 %v1555_v7, %v1555_v7 }
  0xc5   :  { %v1613_v12 = vpack.c.bf16 %v1500_v8, %v1500_v8  ;;  %v1069_v13 = vpop.f32.mrf.mxu2  ;;  %v1940_v8 = vor.u32 %v2419_v59, %v1939_v58 }
  0xc6   :  { %1782 = vst.msk [vmem:[%s4042_s3 + $0xec] sm:$0xf] %vm1722_vm1, %v1668_v10  ;;  %v1070_v14 = vadd.f32 %v2816_v53, %v1069_v13  ;;  %v931_v2 = vpop.f32.mrf.mxu0  ;;  %v2944_v15 = vpop.f32.mrf.mxu3  ;;  %v2164_v13 = vor.u32 %v2475_v62, %v2163_v61 }
  0xc7   :  { %1727 = vst.msk [vmem:[%s4042_s3 + $0x10] sm:$0xf] %vm1722_vm1, %v1613_v12  ;;  %v932_v16 = vadd.f32 %v2816_v53, %v931_v2  ;;  %v1229_v17 = vpop.f32.mrf.mxu1 }
  0xc8   :  { %v1363_v18 = vadd.f32 %v2849_v11, %v1070_v14  ;;  %v2418_v11 = vld [vmem:[%s4040_s0 + $0xc4] sm:$0xf] }
  0xc9   :  { %v1225_v19 = vadd.f32 %v1224_v42, %v932_v16  ;;  %v1944_v38 = vor.u32 %v2418_v11, %v1941_v27 }
  0xca   :  { %v1556_v22 = vmax.f32 %v1363_v18, 0.0  ;;  %v2184_v18 = vor.u32 %v2478_v4, %v2181_v5 }
  0xcb   :  { %v1501_v26 = vmax.f32 %v1225_v19, 0.0 }
  0xcc   :  { %v1669_v28 = vpack.c.bf16 %v1556_v22, %v1556_v22 }
  0xcd   :  { %v1614_v32 = vpack.c.bf16 %v1501_v26, %v1501_v26  ;;  %v1071_v33 = vpop.f32.mrf.mxu2 }
  0xce   :  { %1783 = vst.msk [vmem:[%s4042_s3 + $0xf0] sm:$0xf] %vm1722_vm1, %v1669_v28  ;;  %v1072_v35 = vadd.f32 %v2816_v53, %v1071_v33  ;;  %v934_v36 = vpop.f32.mrf.mxu0  ;;  %v2981_v39 = vpop.f32.mrf.mxu3  ;;  %v1947_v33 = vld [vmem:[%s4040_s0 + $0xd0] sm:$0xf] }
  0xcf   :  { %1728 = vst.msk [vmem:[%s4042_s3 + $0x14] sm:$0xf] %vm1722_vm1, %v1614_v32  ;;  %v935_v41 = vadd.f32 %v2816_v53, %v934_v36  ;;  %v1232_v42 = vpop.f32.mrf.mxu1  ;;  %v2171_v36 = vld [vmem:[%s4040_s0 + $0x290] sm:$0xf] }
  0xd0   :  { %v1365_v44 = vadd.f32 %v2882_v30, %v1072_v35 }
  0xd1   :  { %v1228_v45 = vadd.f32 %v1227_v3, %v935_v41  ;;  %973 = vmatmul.bf16.gmra.mxu0 %v1932_v34  ;;  %v2421_v34 = vld [vmem:[%s4040_s0 + $0xd4] sm:$0xf0]  ;;  %v1957_v41 = vld [vmem:[%s4040_s0 + $0xe8] sm:$0xf0] }
  0xd2   :  { %v1557_v46 = vmax.f32 %v1365_v44, 0.0  ;;  %1113 = vmatmul.bf16.gmra.mxu2 %v2156_v37  ;;  %2349 = vmatmul.msk.bf16.gmra.mxu1 %vm738_vm0, %v1944_v38  ;;  %v2477_v37 = vld [vmem:[%s4040_s0 + $0x294] sm:$0xf0]  ;;  %v2189_v44 = vld [vmem:[%s4040_s0 + $0x2b8] sm:$0xf0] }
  0xd3   :  { %v1502_v47 = vmax.f32 %v1228_v45, 0.0  ;;  %2378 = vmatmul.msk.bf16.gmra.mxu3 %vm738_vm0, %v2176_v43  ;;  %v2480_v43 = vld [vmem:[%s4040_s0 + $0x2b4] sm:$0xf] }
  0xd4   :  { %v1670_v48 = vpack.c.bf16 %v1557_v46, %v1557_v46 }
  0xd5   :  { %v1615_v49 = vpack.c.bf16 %v1502_v47, %v1502_v47  ;;  %v1074_v50 = vpop.f32.mrf.mxu2  ;;  %v1948_v47 = vor.u32 %v2421_v34, %v1947_v33 }
  0xd6   :  { %1784 = vst.msk [vmem:[%s4042_s3 + $0xf4] sm:$0xf] %vm1722_vm1, %v1670_v48  ;;  %v1075_v51 = vadd.f32 %v2816_v53, %v1074_v50  ;;  %v936_v30 = vpop.f32.mrf.mxu0  ;;  %v2996_v52 = vpop.f32.mrf.mxu3  ;;  %v2172_v50 = vor.u32 %v2477_v37, %v2171_v36 }
  0xd7   :  { %1729 = vst.msk [vmem:[%s4042_s3 + $0x18] sm:$0xf] %vm1722_vm1, %v1615_v49  ;;  %v937_v54 = vadd.f32 %v2816_v53, %v936_v30  ;;  %v1234_v55 = vpop.f32.mrf.mxu1 }
  0xd8   :  { %v1368_v56 = vadd.f32 %v2892_v40, %v1075_v51  ;;  %v2420_v40 = vld [vmem:[%s4040_s0 + $0xd4] sm:$0xf] }
  0xd9   :  { %v1230_v57 = vadd.f32 %v1229_v17, %v937_v54  ;;  %v1952_v14 = vor.u32 %v2420_v40, %v1949_v1 }
  0xda   :  { %v1558_v60 = vmax.f32 %v1368_v56, 0.0  ;;  %v2192_v56 = vor.u32 %v2480_v43, %v2189_v44 }
  0xdb   :  { %v1503_v63 = vmax.f32 %v1230_v57, 0.0 }
  0xdc   :  { %v1671_v3 = vpack.c.bf16 %v1558_v60, %v1558_v60 }
  0xdd   :  { %v1616_v6 = vpack.c.bf16 %v1503_v63, %v1503_v63  ;;  %v1076_v7 = vpop.f32.mrf.mxu2 }
  0xde   :  { %1785 = vst.msk [vmem:[%s4042_s3 + $0xf8] sm:$0xf] %vm1722_vm1, %v1671_v3  ;;  %v1077_v10 = vadd.f32 %v2816_v53, %v1076_v7  ;;  %v939_v12 = vpop.f32.mrf.mxu0  ;;  %v3033_v2 = vpop.f32.mrf.mxu3  ;;  %v1955_v7 = vld [vmem:[%s4040_s0 + $0xe0] sm:$0xf] }
  0xdf   :  { %1730 = vst.msk [vmem:[%s4042_s3 + $0x1c] sm:$0xf] %vm1722_vm1, %v1616_v6  ;;  %v940_v16 = vadd.f32 %v2816_v53, %v939_v12  ;;  %v1237_v17 = vpop.f32.mrf.mxu1  ;;  %v2179_v12 = vld [vmem:[%s4040_s0 + $0x2a0] sm:$0xf] }
  0xe0   :  { %v1370_v19 = vadd.f32 %v2929_v0, %v1077_v10 }
  0xe1   :  { %v1233_v20 = vadd.f32 %v1232_v42, %v940_v16  ;;  %978 = vmatmul.bf16.gmra.mxu0 %v1940_v8  ;;  %v2423_v8 = vld [vmem:[%s4040_s0 + $0xe4] sm:$0xf0]  ;;  %v1965_v16 = vld [vmem:[%s4040_s0 + $0xf8] sm:$0xf0] }
  0xe2   :  { %v1559_v21 = vmax.f32 %v1370_v19, 0.0  ;;  %1118 = vmatmul.bf16.gmra.mxu2 %v2164_v13  ;;  %2350 = vmatmul.msk.bf16.gmra.mxu1 %vm738_vm0, %v1952_v14  ;;  %v2479_v13 = vld [vmem:[%s4040_s0 + $0x2a4] sm:$0xf0]  ;;  %v2197_v19 = vld [vmem:[%s4040_s0 + $0x2c8] sm:$0xf0] }
  0xe3   :  { %v1504_v22 = vmax.f32 %v1233_v20, 0.0  ;;  %2379 = vmatmul.msk.bf16.gmra.mxu3 %vm738_vm0, %v2184_v18  ;;  %v2482_v18 = vld [vmem:[%s4040_s0 + $0x2c4] sm:$0xf] }
  0xe4   :  { %v1672_v23 = vpack.c.bf16 %v1559_v21, %v1559_v21 }
  0xe5   :  { %v1617_v24 = vpack.c.bf16 %v1504_v22, %v1504_v22  ;;  %v1079_v26 = vpop.f32.mrf.mxu2  ;;  %v1956_v22 = vor.u32 %v2423_v8, %v1955_v7 }
  0xe6   :  { %1786 = vst.msk [vmem:[%s4042_s3 + $0xfc] sm:$0xf] %vm1722_vm1, %v1672_v23  ;;  %v1080_v11 = vadd.f32 %v2816_v53, %v1079_v26  ;;  %v941_v0 = vpop.f32.mrf.mxu0  ;;  %v3048_v27 = vpop.f32.mrf.mxu3  ;;  %v2180_v26 = vor.u32 %v2479_v13, %v2179_v12 }
  0xe7   :  { %1731 = vst.msk [vmem:[%s4042_s3 + $0x20] sm:$0xf] %vm1722_vm1, %v1617_v24  ;;  %v942_v28 = vadd.f32 %v2816_v53, %v941_v0  ;;  %v1239_v29 = vpop.f32.mrf.mxu1 }
  0xe8   :  { %v1373_v31 = vadd.f32 %v2944_v15, %v1080_v11  ;;  %v2422_v15 = vld [vmem:[%s4040_s0 + $0xe4] sm:$0xf] }
  0xe9   :  { %v1235_v32 = vadd.f32 %v1234_v55, %v942_v28  ;;  %v1960_v51 = vor.u32 %v2422_v15, %v1957_v41 }
  0xea   :  { %v1560_v35 = vmax.f32 %v1373_v31, 0.0  ;;  %v2200_v31 = vor.u32 %v2482_v18, %v2197_v19 }
  0xeb   :  { %v1505_v38 = vmax.f32 %v1235_v32, 0.0 }
  0xec   :  { %v1673_v42 = vpack.c.bf16 %v1560_v35, %v1560_v35 }
  0xed   :  { %v1618_v45 = vpack.c.bf16 %v1505_v38, %v1505_v38  ;;  %v1081_v46 = vpop.f32.mrf.mxu2 }
  0xee   :  { %1787 = vst.msk [vmem:[%s4042_s3 + $0x100] sm:$0xf] %vm1722_vm1, %v1673_v42  ;;  %v1082_v48 = vadd.f32 %v2816_v53, %v1081_v46  ;;  %v944_v49 = vpop.f32.mrf.mxu0  ;;  %v3085_v30 = vpop.f32.mrf.mxu3  ;;  %v1963_v46 = vld [vmem:[%s4040_s0 + $0xf0] sm:$0xf] }
  0xef   :  { %1732 = vst.msk [vmem:[%s4042_s3 + $0x24] sm:$0xf] %vm1722_vm1, %v1618_v45  ;;  %v945_v54 = vadd.f32 %v2816_v53, %v944_v49  ;;  %v1242_v55 = vpop.f32.mrf.mxu1  ;;  %v2187_v49 = vld [vmem:[%s4040_s0 + $0x2b0] sm:$0xf] }
  0xf0   :  { %v1375_v57 = vadd.f32 %v2981_v39, %v1082_v48 }
  0xf1   :  { %v1238_v58 = vadd.f32 %v1237_v17, %v945_v54  ;;  %983 = vmatmul.bf16.gmra.mxu0 %v1948_v47  ;;  %v2425_v47 = vld [vmem:[%s4040_s0 + $0xf4] sm:$0xf0]  ;;  %v1973_v54 = vld [vmem:[%s4040_s0 + $0x108] sm:$0xf0] }
  0xf2   :  { %v1561_v59 = vmax.f32 %v1375_v57, 0.0  ;;  %1123 = vmatmul.bf16.gmra.mxu2 %v2172_v50  ;;  %2351 = vmatmul.msk.bf16.gmra.mxu1 %vm738_vm0, %v1960_v51  ;;  %v2481_v50 = vld [vmem:[%s4040_s0 + $0x2b4] sm:$0xf0]  ;;  %v2205_v57 = vld [vmem:[%s4040_s0 + $0x2d8] sm:$0xf0] }
  0xf3   :  { %v1506_v60 = vmax.f32 %v1238_v58, 0.0  ;;  %2380 = vmatmul.msk.bf16.gmra.mxu3 %vm738_vm0, %v2192_v56  ;;  %v2484_v56 = vld [vmem:[%s4040_s0 + $0x2d4] sm:$0xf] }
  0xf4   :  { %v1674_v61 = vpack.c.bf16 %v1561_v59, %v1561_v59 }
  0xf5   :  { %v1619_v62 = vpack.c.bf16 %v1506_v60, %v1506_v60  ;;  %v1084_v63 = vpop.f32.mrf.mxu2  ;;  %v1964_v60 = vor.u32 %v2425_v47, %v1963_v46 }
  0xf6   :  { %1788 = vst.msk [vmem:[%s4042_s3 + $0x104] sm:$0xf] %vm1722_vm1, %v1674_v61  ;;  %v1085_v40 = vadd.f32 %v2816_v53, %v1084_v63  ;;  %v946_v39 = vpop.f32.mrf.mxu0  ;;  %v3100_v1 = vpop.f32.mrf.mxu3  ;;  %v2188_v63 = vor.u32 %v2481_v50, %v2187_v49 }
  0xf7   :  { %1733 = vst.msk [vmem:[%s4042_s3 + $0x28] sm:$0xf] %vm1722_vm1, %v1619_v62  ;;  %v947_v3 = vadd.f32 %v2816_v53, %v946_v39  ;;  %v1244_v4 = vpop.f32.mrf.mxu1 }
  0xf8   :  { %v1378_v5 = vadd.f32 %v2996_v52, %v1085_v40  ;;  %v2424_v52 = vld [vmem:[%s4040_s0 + $0xf4] sm:$0xf] }
  0xf9   :  { %v1240_v6 = vadd.f32 %v1239_v29, %v947_v3  ;;  %v1968_v11 = vor.u32 %v2424_v52, %v1965_v16 }
  0xfa   :  { %v1562_v10 = vmax.f32 %v1378_v5, 0.0  ;;  %v2208_v5 = vor.u32 %v2484_v56, %v2205_v57 }
  0xfb   :  { %v1507_v14 = vmax.f32 %v1240_v6, 0.0 }
  0xfc   :  { %v1675_v17 = vpack.c.bf16 %v1562_v10, %v1562_v10 }
  0xfd   :  { %v1620_v20 = vpack.c.bf16 %v1507_v14, %v1507_v14  ;;  %v1086_v21 = vpop.f32.mrf.mxu2 }
  0xfe   :  { %1789 = vst.msk [vmem:[%s4042_s3 + $0x108] sm:$0xf] %vm1722_vm1, %v1675_v17  ;;  %v1087_v23 = vadd.f32 %v2816_v53, %v1086_v21  ;;  %v949_v24 = vpop.f32.mrf.mxu0  ;;  %v3137_v0 = vpop.f32.mrf.mxu3  ;;  %v1971_v21 = vld [vmem:[%s4040_s0 + $0x100] sm:$0xf] }
  0xff   :  { %1734 = vst.msk [vmem:[%s4042_s3 + $0x2c] sm:$0xf] %vm1722_vm1, %v1620_v20  ;;  %v950_v28 = vadd.f32 %v2816_v53, %v949_v24  ;;  %v1247_v29 = vpop.f32.mrf.mxu1  ;;  %v2195_v24 = vld [vmem:[%s4040_s0 + $0x2c0] sm:$0xf] }
 0x100   :  { %v1380_v32 = vadd.f32 %v3033_v2, %v1087_v23 }
 0x101   :  { %v1243_v33 = vadd.f32 %v1242_v55, %v950_v28  ;;  %988 = vmatmul.bf16.gmra.mxu0 %v1956_v22  ;;  %v2427_v22 = vld [vmem:[%s4040_s0 + $0x104] sm:$0xf0]  ;;  %v1981_v28 = vld [vmem:[%s4040_s0 + $0x118] sm:$0xf0] }
 0x102   :  { %v1563_v34 = vmax.f32 %v1380_v32, 0.0  ;;  %1128 = vmatmul.bf16.gmra.mxu2 %v2180_v26  ;;  %2352 = vmatmul.msk.bf16.gmra.mxu1 %vm738_vm0, %v1968_v11  ;;  %v2483_v26 = vld [vmem:[%s4040_s0 + $0x2c4] sm:$0xf0]  ;;  %v2213_v32 = vld [vmem:[%s4040_s0 + $0x2e8] sm:$0xf0] }
 0x103   :  { %v1508_v35 = vmax.f32 %v1243_v33, 0.0  ;;  %2381 = vmatmul.msk.bf16.gmra.mxu3 %vm738_vm0, %v2200_v31  ;;  %v2486_v31 = vld [vmem:[%s4040_s0 + $0x2e4] sm:$0xf] }
 0x104   :  { %v1676_v36 = vpack.c.bf16 %v1563_v34, %v1563_v34 }
 0x105   :  { %v1621_v37 = vpack.c.bf16 %v1508_v35, %v1508_v35  ;;  %v1089_v38 = vpop.f32.mrf.mxu2  ;;  %v1972_v35 = vor.u32 %v2427_v22, %v1971_v21 }
 0x106   :  { %1790 = vst.msk [vmem:[%s4042_s3 + $0x10c] sm:$0xf] %vm1722_vm1, %v1676_v36  ;;  %v1090_v15 = vadd.f32 %v2816_v53, %v1089_v38  ;;  %v951_v2 = vpop.f32.mrf.mxu0  ;;  %v3152_v41 = vpop.f32.mrf.mxu3  ;;  %v2196_v38 = vor.u32 %v2483_v26, %v2195_v24 }
 0x107   :  { %1735 = vst.msk [vmem:[%s4042_s3 + $0x30] sm:$0xf] %vm1722_vm1, %v1621_v37  ;;  %v952_v42 = vadd.f32 %v2816_v53, %v951_v2  ;;  %v1249_v43 = vpop.f32.mrf.mxu1 }
 0x108   :  { %v1383_v44 = vadd.f32 %v3048_v27, %v1090_v15  ;;  %v2426_v27 = vld [vmem:[%s4040_s0 + $0x104] sm:$0xf] }
 0x109   :  { %v1245_v45 = vadd.f32 %v1244_v4, %v952_v42  ;;  %v1976_v40 = vor.u32 %v2426_v27, %v1973_v54 }
 0x10a   :  { %v1564_v48 = vmax.f32 %v1383_v44, 0.0  ;;  %v2216_v44 = vor.u32 %v2486_v31, %v2213_v32 }
 0x10b   :  { %v1509_v51 = vmax.f32 %v1245_v45, 0.0 }
 0x10c   :  { %v1677_v55 = vpack.c.bf16 %v1564_v48, %v1564_v48 }
 0x10d   :  { %v1622_v58 = vpack.c.bf16 %v1509_v51, %v1509_v51  ;;  %v1091_v59 = vpop.f32.mrf.mxu2 }
 0x10e   :  { %1791 = vst.msk [vmem:[%s4042_s3 + $0x110] sm:$0xf] %vm1722_vm1, %v1677_v55  ;;  %v1092_v61 = vadd.f32 %v2816_v53, %v1091_v59  ;;  %v954_v62 = vpop.f32.mrf.mxu0  ;;  %v3189_v39 = vpop.f32.mrf.mxu3  ;;  %v1979_v59 = vld [vmem:[%s4040_s0 + $0x110] sm:$0xf] }
 0x10f   :  { %1736 = vst.msk [vmem:[%s4042_s3 + $0x34] sm:$0xf] %vm1722_vm1, %v1622_v58  ;;  %v955_v3 = vadd.f32 %v2816_v53, %v954_v62  ;;  %v1252_v4 = vpop.f32.mrf.mxu1  ;;  %v2203_v62 = vld [vmem:[%s4040_s0 + $0x2d0] sm:$0xf] }
 0x110   :  { %v1385_v6 = vadd.f32 %v3085_v30, %v1092_v61 }
 0x111   :  { %v1248_v7 = vadd.f32 %v1247_v29, %v955_v3  ;;  %993 = vmatmul.bf16.gmra.mxu0 %v1964_v60  ;;  %v2429_v60 = vld [vmem:[%s4040_s0 + $0x114] sm:$0xf0]  ;;  %v1989_v3 = vld [vmem:[%s4040_s0 + $0x128] sm:$0xf0] }
 0x112   :  { %v1565_v8 = vmax.f32 %v1385_v6, 0.0  ;;  %1133 = vmatmul.bf16.gmra.mxu2 %v2188_v63  ;;  %2353 = vmatmul.msk.bf16.gmra.mxu1 %vm738_vm0, %v1976_v40  ;;  %v2485_v63 = vld [vmem:[%s4040_s0 + $0x2d4] sm:$0xf0]  ;;  %v2221_v6 = vld [vmem:[%s4040_s0 + $0x2f8] sm:$0xf0] }
 0x113   :  { %v1510_v10 = vmax.f32 %v1248_v7, 0.0  ;;  %2382 = vmatmul.msk.bf16.gmra.mxu3 %vm738_vm0, %v2208_v5  ;;  %v2488_v5 = vld [vmem:[%s4040_s0 + $0x2f4] sm:$0xf] }
 0x114   :  { %v1678_v12 = vpack.c.bf16 %v1565_v8, %v1565_v8 }
 0x115   :  { %v1623_v13 = vpack.c.bf16 %v1510_v10, %v1510_v10  ;;  %v1094_v14 = vpop.f32.mrf.mxu2  ;;  %v1980_v10 = vor.u32 %v2429_v60, %v1979_v59 }
 0x116   :  { %1792 = vst.msk [vmem:[%s4042_s3 + $0x114] sm:$0xf] %vm1722_vm1, %v1678_v12  ;;  %v1095_v52 = vadd.f32 %v2816_v53, %v1094_v14  ;;  %v956_v30 = vpop.f32.mrf.mxu0  ;;  %v3204_v16 = vpop.f32.mrf.mxu3  ;;  %v2204_v14 = vor.u32 %v2485_v63, %v2203_v62 }
 0x117   :  { %1737 = vst.msk [vmem:[%s4042_s3 + $0x38] sm:$0xf] %vm1722_vm1, %v1623_v13  ;;  %v957_v17 = vadd.f32 %v2816_v53, %v956_v30  ;;  %v1254_v18 = vpop.f32.mrf.mxu1 }
 0x118   :  { %v1388_v19 = vadd.f32 %v3100_v1, %v1095_v52  ;;  %v2428_v1 = vld [vmem:[%s4040_s0 + $0x114] sm:$0xf] }
 0x119   :  { %v1250_v20 = vadd.f32 %v1249_v43, %v957_v17  ;;  %v1984_v15 = vor.u32 %v2428_v1, %v1981_v28 }
 0x11a   :  { %v1566_v23 = vmax.f32 %v1388_v19, 0.0  ;;  %v2224_v19 = vor.u32 %v2488_v5, %v2221_v6 }
 0x11b   :  { %v1511_v11 = vmax.f32 %v1250_v20, 0.0 }
 0x11c   :  { %v1679_v29 = vpack.c.bf16 %v1566_v23, %v1566_v23 }
 0x11d   :  { %v1624_v33 = vpack.c.bf16 %v1511_v11, %v1511_v11  ;;  %v1096_v34 = vpop.f32.mrf.mxu2 }
 0x11e   :  { %1793 = vst.msk [vmem:[%s4042_s3 + $0x118] sm:$0xf] %vm1722_vm1, %v1679_v29  ;;  %v1097_v36 = vadd.f32 %v2816_v53, %v1096_v34  ;;  %v959_v37 = vpop.f32.mrf.mxu0  ;;  %v3241_v2 = vpop.f32.mrf.mxu3  ;;  %v1987_v34 = vld [vmem:[%s4040_s0 + $0x120] sm:$0xf] }
 0x11f   :  { %1738 = vst.msk [vmem:[%s4042_s3 + $0x3c] sm:$0xf] %vm1722_vm1, %v1624_v33  ;;  %v960_v42 = vadd.f32 %v2816_v53, %v959_v37  ;;  %v1257_v43 = vpop.f32.mrf.mxu1  ;;  %v2211_v37 = vld [vmem:[%s4040_s0 + $0x2e0] sm:$0xf] }
 0x120   :  { %v1390_v45 = vadd.f32 %v3137_v0, %v1097_v36 }
 0x121   :  { %v1253_v46 = vadd.f32 %v1252_v4, %v960_v42  ;;  %998 = vmatmul.bf16.gmra.mxu0 %v1972_v35  ;;  %v2431_v35 = vld [vmem:[%s4040_s0 + $0x124] sm:$0xf0]  ;;  %v1997_v42 = vld [vmem:[%s4040_s0 + $0x138] sm:$0xf0] }
 0x122   :  { %v1567_v47 = vmax.f32 %v1390_v45, 0.0  ;;  %1138 = vmatmul.bf16.gmra.mxu2 %v2196_v38  ;;  %2354 = vmatmul.msk.bf16.gmra.mxu1 %vm738_vm0, %v1984_v15  ;;  %v2487_v38 = vld [vmem:[%s4040_s0 + $0x2e4] sm:$0xf0]  ;;  %v2229_v45 = vld [vmem:[%s4040_s0 + $0x308] sm:$0xf0] }
 0x123   :  { %v1512_v48 = vmax.f32 %v1253_v46, 0.0  ;;  %2383 = vmatmul.msk.bf16.gmra.mxu3 %vm738_vm0, %v2216_v44  ;;  %v2490_v44 = vld [vmem:[%s4040_s0 + $0x304] sm:$0xf] }
 0x124   :  { %v1680_v49 = vpack.c.bf16 %v1567_v47, %v1567_v47 }
 0x125   :  { %v1625_v50 = vpack.c.bf16 %v1512_v48, %v1512_v48  ;;  %v1099_v51 = vpop.f32.mrf.mxu2  ;;  %v1988_v48 = vor.u32 %v2431_v35, %v1987_v34 }
 0x126   :  { %1794 = vst.msk [vmem:[%s4042_s3 + $0x11c] sm:$0xf] %vm1722_vm1, %v1680_v49  ;;  %v1100_v27 = vadd.f32 %v2816_v53, %v1099_v51  ;;  %v961_v0 = vpop.f32.mrf.mxu0  ;;  %v3256_v54 = vpop.f32.mrf.mxu3  ;;  %v2212_v51 = vor.u32 %v2487_v38, %v2211_v37 }
 0x127   :  { %1739 = vst.msk [vmem:[%s4042_s3 + $0x40] sm:$0xf] %vm1722_vm1, %v1625_v50  ;;  %v962_v55 = vadd.f32 %v2816_v53, %v961_v0  ;;  %v1259_v56 = vpop.f32.mrf.mxu1 }
 0x128   :  { %v1393_v57 = vadd.f32 %v3152_v41, %v1100_v27  ;;  %v2430_v41 = vld [vmem:[%s4040_s0 + $0x124] sm:$0xf] }
 0x129   :  { %v1255_v58 = vadd.f32 %v1254_v18, %v962_v55  ;;  %v1992_v52 = vor.u32 %v2430_v41, %v1989_v3 }
 0x12a   :  { %v1568_v61 = vmax.f32 %v1393_v57, 0.0  ;;  %v2232_v57 = vor.u32 %v2490_v44, %v2229_v45 }
 0x12b   :  { %v1513_v40 = vmax.f32 %v1255_v58, 0.0 }
 0x12c   :  { %v1681_v4 = vpack.c.bf16 %v1568_v61, %v1568_v61 }
 0x12d   :  { %v1626_v7 = vpack.c.bf16 %v1513_v40, %v1513_v40  ;;  %v1101_v8 = vpop.f32.mrf.mxu2 }
 0x12e   :  { %1795 = vst.msk [vmem:[%s4042_s3 + $0x120] sm:$0xf] %vm1722_vm1, %v1681_v4  ;;  %v1102_v12 = vadd.f32 %v2816_v53, %v1101_v8  ;;  %v964_v13 = vpop.f32.mrf.mxu0  ;;  %v3293_v30 = vpop.f32.mrf.mxu3  ;;  %v1995_v8 = vld [vmem:[%s4040_s0 + $0x130] sm:$0xf] }
 0x12f   :  { %1740 = vst.msk [vmem:[%s4042_s3 + $0x44] sm:$0xf] %vm1722_vm1, %v1626_v7  ;;  %v965_v17 = vadd.f32 %v2816_v53, %v964_v13  ;;  %v1262_v18 = vpop.f32.mrf.mxu1  ;;  %v2219_v13 = vld [vmem:[%s4040_s0 + $0x2f0] sm:$0xf] }
 0x130   :  { %v1395_v20 = vadd.f32 %v3189_v39, %v1102_v12 }
 0x131   :  { %v1258_v21 = vadd.f32 %v1257_v43, %v965_v17  ;;  %1003 = vmatmul.bf16.gmra.mxu0 %v1980_v10  ;;  %v2433_v10 = vld [vmem:[%s4040_s0 + $0x134] sm:$0xf0]  ;;  %v2005_v17 = vld [vmem:[%s4040_s0 + $0x148] sm:$0xf0] }
 0x132   :  { %v1569_v22 = vmax.f32 %v1395_v20, 0.0  ;;  %1143 = vmatmul.bf16.gmra.mxu2 %v2204_v14  ;;  %2355 = vmatmul.msk.bf16.gmra.mxu1 %vm738_vm0, %v1992_v52  ;;  %v2489_v14 = vld [vmem:[%s4040_s0 + $0x2f4] sm:$0xf0]  ;;  %v2237_v20 = vld [vmem:[%s4040_s0 + $0x318] sm:$0xf0] }
 0x133   :  { %v1514_v23 = vmax.f32 %v1258_v21, 0.0  ;;  %2384 = vmatmul.msk.bf16.gmra.mxu3 %vm738_vm0, %v2224_v19  ;;  %v2492_v19 = vld [vmem:[%s4040_s0 + $0x314] sm:$0xf] }
 0x134   :  { %v1682_v24 = vpack.c.bf16 %v1569_v22, %v1569_v22 }
 0x135   :  { %v1627_v26 = vpack.c.bf16 %v1514_v23, %v1514_v23  ;;  %v1104_v11 = vpop.f32.mrf.mxu2  ;;  %v1996_v23 = vor.u32 %v2433_v10, %v1995_v8 }
 0x136   :  { %1796 = vst.msk [vmem:[%s4042_s3 + $0x124] sm:$0xf] %vm1722_vm1, %v1682_v24  ;;  %v1105_v1 = vadd.f32 %v2816_v53, %v1104_v11  ;;  %v966_v39 = vpop.f32.mrf.mxu0  ;;  %v3308_v28 = vpop.f32.mrf.mxu3  ;;  %v2220_v11 = vor.u32 %v2489_v14, %v2219_v13 }
 0x137   :  { %1741 = vst.msk [vmem:[%s4042_s3 + $0x48] sm:$0xf] %vm1722_vm1, %v1627_v26  ;;  %v967_v29 = vadd.f32 %v2816_v53, %v966_v39  ;;  %v1264_v31 = vpop.f32.mrf.mxu1 }
 0x138   :  { %v1398_v32 = vadd.f32 %v3204_v16, %v1105_v1  ;;  %v2432_v16 = vld [vmem:[%s4040_s0 + $0x134] sm:$0xf] }
 0x139   :  { %v1260_v33 = vadd.f32 %v1259_v56, %v967_v29  ;;  %v2000_v27 = vor.u32 %v2432_v16, %v1997_v42 }
 0x13a   :  { %v1570_v36 = vmax.f32 %v1398_v32, 0.0  ;;  %v2240_v32 = vor.u32 %v2492_v19, %v2237_v20 }
 0x13b   :  { %v1515_v15 = vmax.f32 %v1260_v33, 0.0 }
 0x13c   :  { %v1683_v43 = vpack.c.bf16 %v1570_v36, %v1570_v36 }
 0x13d   :  { %v1628_v46 = vpack.c.bf16 %v1515_v15, %v1515_v15  ;;  %v1106_v47 = vpop.f32.mrf.mxu2 }
 0x13e   :  { %1797 = vst.msk [vmem:[%s4042_s3 + $0x128] sm:$0xf] %vm1722_vm1, %v1683_v43  ;;  %v1107_v49 = vadd.f32 %v2816_v53, %v1106_v47  ;;  %v969_v50 = vpop.f32.mrf.mxu0  ;;  %v3345_v0 = vpop.f32.mrf.mxu3  ;;  %v2003_v47 = vld [vmem:[%s4040_s0 + $0x140] sm:$0xf] }
 0x13f   :  { %1742 = vst.msk [vmem:[%s4042_s3 + $0x4c] sm:$0xf] %vm1722_vm1, %v1628_v46  ;;  %v970_v55 = vadd.f32 %v2816_v53, %v969_v50  ;;  %v1267_v56 = vpop.f32.mrf.mxu1  ;;  %v2227_v50 = vld [vmem:[%s4040_s0 + $0x300] sm:$0xf] }
 0x140   :  { %v1400_v58 = vadd.f32 %v3241_v2, %v1107_v49 }
 0x141   :  { %v1263_v59 = vadd.f32 %v1262_v18, %v970_v55  ;;  %1008 = vmatmul.bf16.gmra.mxu0 %v1988_v48  ;;  %v2435_v48 = vld [vmem:[%s4040_s0 + $0x144] sm:$0xf0] }
 0x142   :  { %v1571_v60 = vmax.f32 %v1400_v58, 0.0  ;;  %1148 = vmatmul.bf16.gmra.mxu2 %v2212_v51  ;;  %2356 = vmatmul.msk.bf16.gmra.mxu1 %vm738_vm0, %v2000_v27  ;;  %v2013_v27 = vld [vmem:[%s4040_s0 + $0x158] sm:$0xf0] }
 0x143   :  { %v1516_v61 = vmax.f32 %v1263_v59, 0.0  ;;  %2385 = vmatmul.msk.bf16.gmra.mxu3 %vm738_vm0, %v2232_v57  ;;  %v2245_v57 = vld [vmem:[%s4040_s0 + $0x328] sm:$0xf0] }
 0x144   :  { %v1684_v62 = vpack.c.bf16 %v1571_v60, %v1571_v60  ;;  %v2004_v60 = vor.u32 %v2435_v48, %v2003_v47 }
 0x145   :  { %v1629_v63 = vpack.c.bf16 %v1516_v61, %v1516_v61  ;;  %v1109_v40 = vpop.f32.mrf.mxu2  ;;  %v3451_v61 = vld [vmem:[%s4041_s2] ss:$0 sm:$0xff] }
 0x146   :  { %1798 = vst.msk [vmem:[%s4042_s3 + $0x12c] sm:$0xf] %vm1722_vm1, %v1684_v62  ;;  %v1110_v41 = vadd.f32 %v2816_v53, %v1109_v40  ;;  %v971_v2 = vpop.f32.mrf.mxu0  ;;  %v3360_v3 = vpop.f32.mrf.mxu3 }
 0x147   :  { %1743 = vst.msk [vmem:[%s4042_s3 + $0x50] sm:$0xf] %vm1722_vm1, %v1629_v63  ;;  %v972_v4 = vadd.f32 %v2816_v53, %v971_v2  ;;  %v1269_v5 = vpop.f32.mrf.mxu1 }
 0x148   :  { %v1403_v6 = vadd.f32 %v3256_v54, %v1110_v41  ;;  %v2434_v54 = vld [vmem:[%s4040_s0 + $0x144] sm:$0xf] }
 0x149   :  { %v1265_v7 = vadd.f32 %v1264_v31, %v972_v4  ;;  %v2008_v1 = vor.u32 %v2434_v54, %v2005_v17 }
 0x14a   :  { %v1572_v12 = vmax.f32 %v1403_v6, 0.0 }
 0x14b   :  { %v1517_v52 = vmax.f32 %v1265_v7, 0.0 }
 0x14c   :  { %v1685_v18 = vpack.c.bf16 %v1572_v12, %v1572_v12 }
 0x14d   :  { %v1630_v21 = vpack.c.bf16 %v1517_v52, %v1517_v52  ;;  %v1111_v22 = vpop.f32.mrf.mxu2 }
 0x14e   :  { %1799 = vst.msk [vmem:[%s4042_s3 + $0x130] sm:$0xf] %vm1722_vm1, %v1685_v18  ;;  %v1112_v24 = vadd.f32 %v2816_v53, %v1111_v22  ;;  %v974_v26 = vpop.f32.mrf.mxu0  ;;  %v3397_v39 = vpop.f32.mrf.mxu3  ;;  %v2011_v22 = vld [vmem:[%s4040_s0 + $0x150] sm:$0xf] }
 0x14f   :  { %1744 = vst.msk [vmem:[%s4042_s3 + $0x54] sm:$0xf] %vm1722_vm1, %v1630_v21  ;;  %v975_v29 = vadd.f32 %v2816_v53, %v974_v26  ;;  %v1272_v31 = vpop.f32.mrf.mxu1  ;;  %v2235_v26 = vld [vmem:[%s4040_s0 + $0x310] sm:$0xf] }
 0x150   :  { %v1405_v33 = vadd.f32 %v3293_v30, %v1112_v24 }
 0x151   :  { %v1268_v34 = vadd.f32 %v1267_v56, %v975_v29  ;;  %1013 = vmatmul.bf16.gmra.mxu0 %v1996_v23  ;;  %v2494_v56 = vld [vmem:[%s4040_s0 + $0x324] sm:$0xf]  ;;  %v2437_v23 = vld [vmem:[%s4040_s0 + $0x154] sm:$0xf0]  ;;  %v2021_v29 = vld [vmem:[%s4040_s0 + $0x168] sm:$0xf0] }
 0x152   :  { %v1573_v35 = vmax.f32 %v1405_v33, 0.0  ;;  %1153 = vmatmul.bf16.gmra.mxu2 %v2220_v11  ;;  %2357 = vmatmul.msk.bf16.gmra.mxu1 %vm738_vm0, %v2008_v1  ;;  %v2248_v6 = vor.u32 %v2494_v56, %v2245_v57  ;;  %v2493_v11 = vld [vmem:[%s4040_s0 + $0x314] sm:$0xf0]  ;;  %v2253_v33 = vld [vmem:[%s4040_s0 + $0x338] sm:$0xf0] }
 0x153   :  { %v1518_v36 = vmax.f32 %v1268_v34, 0.0  ;;  %2386 = vmatmul.msk.bf16.gmra.mxu3 %vm738_vm0, %v2240_v32  ;;  %v2496_v32 = vld [vmem:[%s4040_s0 + $0x334] sm:$0xf] }
 0x154   :  { %v1686_v37 = vpack.c.bf16 %v1573_v35, %v1573_v35 }
 0x155   :  { %v1631_v38 = vpack.c.bf16 %v1518_v36, %v1518_v36  ;;  %v1114_v15 = vpop.f32.mrf.mxu2  ;;  %v2012_v36 = vor.u32 %v2437_v23, %v2011_v22 }
 0x156   :  { %1800 = vst.msk [vmem:[%s4042_s3 + $0x134] sm:$0xf] %vm1722_vm1, %v1686_v37  ;;  %v1115_v16 = vadd.f32 %v2816_v53, %v1114_v15  ;;  %v976_v30 = vpop.f32.mrf.mxu0  ;;  %v3412_v42 = vpop.f32.mrf.mxu3  ;;  %v2236_v15 = vor.u32 %v2493_v11, %v2235_v26 }
 0x157   :  { %1745 = vst.msk [vmem:[%s4042_s3 + $0x58] sm:$0xf] %vm1722_vm1, %v1631_v38  ;;  %v977_v43 = vadd.f32 %v2816_v53, %v976_v30  ;;  %v1274_v44 = vpop.f32.mrf.mxu1  ;;  %v2491_v53 = vld [vmem:[%s4040_s0 + $0x304] sm:$0xf0] }
 0x158   :  { %v1408_v45 = vadd.f32 %v3308_v28, %v1115_v16  ;;  %v2436_v28 = vld [vmem:[%s4040_s0 + $0x154] sm:$0xf]  ;;  %v2228_v40 = vor.u32 %v2491_v53, %v2227_v50 }
 0x159   :  { %v1270_v46 = vadd.f32 %v1269_v5, %v977_v43  ;;  %v2016_v41 = vor.u32 %v2436_v28, %v2013_v27 }
 0x15a   :  { %v1574_v49 = vmax.f32 %v1408_v45, 0.0  ;;  %v2256_v45 = vor.u32 %v2496_v32, %v2253_v33 }
 0x15b   :  { %v1519_v51 = vmax.f32 %v1270_v46, 0.0 }
 0x15c   :  { %v1687_v55 = vpack.c.bf16 %v1574_v49, %v1574_v49 }
 0x15d   :  { %v1632_v58 = vpack.c.bf16 %v1519_v51, %v1519_v51  ;;  %v1116_v59 = vpop.f32.mrf.mxu2 }
 0x15e   :  { %1801 = vst.msk [vmem:[%s4042_s3 + $0x138] sm:$0xf] %vm1722_vm1, %v1687_v55  ;;  %v1117_v62 = vadd.f32 %v3451_v61, %v1116_v59  ;;  %v979_v63 = vpop.f32.mrf.mxu0  ;;  %v3454_v2 = vpop.f32.mrf.mxu3  ;;  %v2019_v59 = vld [vmem:[%s4040_s0 + $0x160] sm:$0xf] }
 0x15f   :  { %1746 = vst.msk [vmem:[%s4042_s3 + $0x5c] sm:$0xf] %vm1722_vm1, %v1632_v58  ;;  %v980_v4 = vadd.f32 %v3451_v61, %v979_v63  ;;  %v1277_v5 = vpop.f32.mrf.mxu1  ;;  %v2243_v63 = vld [vmem:[%s4040_s0 + $0x320] sm:$0xf] }
 0x160   :  { %v1410_v7 = vadd.f32 %v3345_v0, %v1117_v62 }
 0x161   :  { %v1273_v8 = vadd.f32 %v1272_v31, %v980_v4  ;;  %1018 = vmatmul.bf16.gmra.mxu0 %v2004_v60  ;;  %v2439_v60 = vld [vmem:[%s4040_s0 + $0x164] sm:$0xf0]  ;;  %v2029_v4 = vld [vmem:[%s4040_s0 + $0x178] sm:$0xf0] }
 0x162   :  { %v1575_v10 = vmax.f32 %v1410_v7, 0.0  ;;  %1158 = vmatmul.bf16.gmra.mxu2 %v2228_v40  ;;  %2358 = vmatmul.msk.bf16.gmra.mxu1 %vm738_vm0, %v2016_v41  ;;  %v2495_v40 = vld [vmem:[%s4040_s0 + $0x324] sm:$0xf0]  ;;  %v2261_v7 = vld [vmem:[%s4040_s0 + $0x348] sm:$0xf0] }
 0x163   :  { %v1520_v12 = vmax.f32 %v1273_v8, 0.0  ;;  %2387 = vmatmul.msk.bf16.gmra.mxu3 %vm738_vm0, %v2248_v6  ;;  %v2498_v6 = vld [vmem:[%s4040_s0 + $0x344] sm:$0xf] }
 0x164   :  { %v1688_v13 = vpack.c.bf16 %v1575_v10, %v1575_v10 }
 0x165   :  { %v1633_v14 = vpack.c.bf16 %v1520_v12, %v1520_v12  ;;  %v1119_v52 = vpop.f32.mrf.mxu2  ;;  %v2020_v12 = vor.u32 %v2439_v60, %v2019_v59 }
 0x166   :  { %1802 = vst.msk [vmem:[%s4042_s3 + $0x13c] sm:$0xf] %vm1722_vm1, %v1688_v13  ;;  %v1120_v54 = vadd.f32 %v3451_v61, %v1119_v52  ;;  %v981_v0 = vpop.f32.mrf.mxu0  ;;  %v3469_v17 = vpop.f32.mrf.mxu3  ;;  %v2244_v52 = vor.u32 %v2495_v40, %v2243_v63 }
 0x167   :  { %1747 = vst.msk [vmem:[%s4042_s3 + $0x60] sm:$0xf] %vm1722_vm1, %v1633_v14  ;;  %v982_v18 = vadd.f32 %v3451_v61, %v981_v0  ;;  %v1279_v19 = vpop.f32.mrf.mxu1 }
 0x168   :  { %v1413_v20 = vadd.f32 %v3360_v3, %v1120_v54  ;;  %v2438_v3 = vld [vmem:[%s4040_s0 + $0x164] sm:$0xf] }
 0x169   :  { %v1275_v21 = vadd.f32 %v1274_v44, %v982_v18  ;;  %v2024_v16 = vor.u32 %v2438_v3, %v2021_v29 }
 0x16a   :  { %v1576_v24 = vmax.f32 %v1413_v20, 0.0  ;;  %v2264_v20 = vor.u32 %v2498_v6, %v2261_v7 }
 0x16b   :  { %v1521_v1 = vmax.f32 %v1275_v21, 0.0 }
 0x16c   :  { %v1689_v31 = vpack.c.bf16 %v1576_v24, %v1576_v24 }
 0x16d   :  { %v1634_v34 = vpack.c.bf16 %v1521_v1, %v1521_v1  ;;  %v1121_v35 = vpop.f32.mrf.mxu2 }
 0x16e   :  { %1803 = vst.msk [vmem:[%s4042_s3 + $0x140] sm:$0xf] %vm1722_vm1, %v1689_v31  ;;  %v1122_v37 = vadd.f32 %v3451_v61, %v1121_v35  ;;  %v984_v38 = vpop.f32.mrf.mxu0  ;;  %v3506_v30 = vpop.f32.mrf.mxu3  ;;  %v2027_v35 = vld [vmem:[%s4040_s0 + $0x170] sm:$0xf] }
 0x16f   :  { %1748 = vst.msk [vmem:[%s4042_s3 + $0x64] sm:$0xf] %vm1722_vm1, %v1634_v34  ;;  %v985_v43 = vadd.f32 %v3451_v61, %v984_v38  ;;  %v1282_v44 = vpop.f32.mrf.mxu1  ;;  %v2251_v38 = vld [vmem:[%s4040_s0 + $0x330] sm:$0xf] }
 0x170   :  { %v1415_v46 = vadd.f32 %v3397_v39, %v1122_v37 }
 0x171   :  { %v1278_v47 = vadd.f32 %v1277_v5, %v985_v43  ;;  %1023 = vmatmul.bf16.gmra.mxu0 %v2012_v36  ;;  %v2441_v36 = vld [vmem:[%s4040_s0 + $0x174] sm:$0xf0]  ;;  %v2037_v43 = vld [vmem:[%s4040_s0 + $0x188] sm:$0xf0] }
 0x172   :  { %v1577_v48 = vmax.f32 %v1415_v46, 0.0  ;;  %1163 = vmatmul.bf16.gmra.mxu2 %v2236_v15  ;;  %2359 = vmatmul.msk.bf16.gmra.mxu1 %vm738_vm0, %v2024_v16  ;;  %v2497_v15 = vld [vmem:[%s4040_s0 + $0x334] sm:$0xf0]  ;;  %v2269_v46 = vld [vmem:[%s4040_s0 + $0x358] sm:$0xf0] }
 0x173   :  { %v1522_v49 = vmax.f32 %v1278_v47, 0.0  ;;  %2388 = vmatmul.msk.bf16.gmra.mxu3 %vm738_vm0, %v2256_v45  ;;  %v2500_v45 = vld [vmem:[%s4040_s0 + $0x354] sm:$0xf] }
 0x174   :  { %v1690_v50 = vpack.c.bf16 %v1577_v48, %v1577_v48 }
 0x175   :  { %v1635_v53 = vpack.c.bf16 %v1522_v49, %v1522_v49  ;;  %v1124_v51 = vpop.f32.mrf.mxu2  ;;  %v2028_v49 = vor.u32 %v2441_v36, %v2027_v35 }
 0x176   :  { %1804 = vst.msk [vmem:[%s4042_s3 + $0x144] sm:$0xf] %vm1722_vm1, %v1690_v50  ;;  %v1125_v28 = vadd.f32 %v3451_v61, %v1124_v51  ;;  %v986_v39 = vpop.f32.mrf.mxu0  ;;  %v3521_v27 = vpop.f32.mrf.mxu3  ;;  %v2252_v51 = vor.u32 %v2497_v15, %v2251_v38 }
 0x177   :  { %1749 = vst.msk [vmem:[%s4042_s3 + $0x68] sm:$0xf] %vm1722_vm1, %v1635_v53  ;;  %v987_v55 = vadd.f32 %v3451_v61, %v986_v39  ;;  %v1284_v56 = vpop.f32.mrf.mxu1 }
 0x178   :  { %v1418_v57 = vadd.f32 %v3412_v42, %v1125_v28  ;;  %v2440_v42 = vld [vmem:[%s4040_s0 + $0x174] sm:$0xf] }
 0x179   :  { %v1280_v58 = vadd.f32 %v1279_v19, %v987_v55  ;;  %v2032_v54 = vor.u32 %v2440_v42, %v2029_v4 }
 0x17a   :  { %v1578_v62 = vmax.f32 %v1418_v57, 0.0  ;;  %v2272_v57 = vor.u32 %v2500_v45, %v2269_v46 }
 0x17b   :  { %v1523_v41 = vmax.f32 %v1280_v58, 0.0 }
 0x17c   :  { %v1691_v5 = vpack.c.bf16 %v1578_v62, %v1578_v62 }
 0x17d   :  { %v1636_v8 = vpack.c.bf16 %v1523_v41, %v1523_v41  ;;  %v1126_v10 = vpop.f32.mrf.mxu2 }
 0x17e   :  { %1805 = vst.msk [vmem:[%s4042_s3 + $0x148] sm:$0xf] %vm1722_vm1, %v1691_v5  ;;  %v1127_v13 = vadd.f32 %v3451_v61, %v1126_v10  ;;  %v989_v14 = vpop.f32.mrf.mxu0  ;;  %v3558_v0 = vpop.f32.mrf.mxu3  ;;  %v2035_v10 = vld [vmem:[%s4040_s0 + $0x180] sm:$0xf] }
 0x17f   :  { %1750 = vst.msk [vmem:[%s4042_s3 + $0x6c] sm:$0xf] %vm1722_vm1, %v1636_v8  ;;  %v990_v18 = vadd.f32 %v3451_v61, %v989_v14  ;;  %v1287_v19 = vpop.f32.mrf.mxu1  ;;  %v2259_v14 = vld [vmem:[%s4040_s0 + $0x340] sm:$0xf] }
 0x180   :  { %v1420_v21 = vadd.f32 %v3454_v2, %v1127_v13 }
 0x181   :  { %v1283_v22 = vadd.f32 %v1282_v44, %v990_v18  ;;  %1028 = vmatmul.bf16.gmra.mxu0 %v2020_v12  ;;  %v2443_v12 = vld [vmem:[%s4040_s0 + $0x184] sm:$0xf0]  ;;  %v2045_v18 = vld [vmem:[%s4040_s0 + $0x198] sm:$0xf0] }
 0x182   :  { %v1579_v23 = vmax.f32 %v1420_v21, 0.0  ;;  %1168 = vmatmul.bf16.gmra.mxu2 %v2244_v52  ;;  %2360 = vmatmul.msk.bf16.gmra.mxu1 %vm738_vm0, %v2032_v54  ;;  %v2499_v52 = vld [vmem:[%s4040_s0 + $0x344] sm:$0xf0]  ;;  %v2277_v21 = vld [vmem:[%s4040_s0 + $0x368] sm:$0xf0] }
 0x183   :  { %v1524_v24 = vmax.f32 %v1283_v22, 0.0  ;;  %2389 = vmatmul.msk.bf16.gmra.mxu3 %vm738_vm0, %v2264_v20  ;;  %v2502_v20 = vld [vmem:[%s4040_s0 + $0x364] sm:$0xf] }
 0x184   :  { %v1692_v26 = vpack.c.bf16 %v1579_v23, %v1579_v23 }
 0x185   :  { %v1637_v11 = vpack.c.bf16 %v1524_v24, %v1524_v24  ;;  %v1129_v1 = vpop.f32.mrf.mxu2  ;;  %v2036_v24 = vor.u32 %v2443_v12, %v2035_v10 }
 0x186   :  { %1806 = vst.msk [vmem:[%s4042_s3 + $0x14c] sm:$0xf] %vm1722_vm1, %v1692_v26  ;;  %v1130_v3 = vadd.f32 %v3451_v61, %v1129_v1  ;;  %v991_v2 = vpop.f32.mrf.mxu0  ;;  %v3573_v29 = vpop.f32.mrf.mxu3  ;;  %v2260_v1 = vor.u32 %v2499_v52, %v2259_v14 }
 0x187   :  { %1751 = vst.msk [vmem:[%s4042_s3 + $0x70] sm:$0xf] %vm1722_vm1, %v1637_v11  ;;  %v992_v31 = vadd.f32 %v3451_v61, %v991_v2  ;;  %v1289_v32 = vpop.f32.mrf.mxu1 }
 0x188   :  { %v1423_v33 = vadd.f32 %v3469_v17, %v1130_v3  ;;  %v2442_v17 = vld [vmem:[%s4040_s0 + $0x184] sm:$0xf] }
 0x189   :  { %v1285_v34 = vadd.f32 %v1284_v56, %v992_v31  ;;  %v2040_v28 = vor.u32 %v2442_v17, %v2037_v43 }
 0x18a   :  { %v1580_v37 = vmax.f32 %v1423_v33, 0.0  ;;  %v2280_v33 = vor.u32 %v2502_v20, %v2277_v21 }
 0x18b   :  { %v1525_v16 = vmax.f32 %v1285_v34, 0.0 }
 0x18c   :  { %v1693_v44 = vpack.c.bf16 %v1580_v37, %v1580_v37 }
 0x18d   :  { %v1638_v47 = vpack.c.bf16 %v1525_v16, %v1525_v16  ;;  %v1131_v48 = vpop.f32.mrf.mxu2 }
 0x18e   :  { %1807 = vst.msk [vmem:[%s4042_s3 + $0x150] sm:$0xf] %vm1722_vm1, %v1693_v44  ;;  %v1132_v50 = vadd.f32 %v3451_v61, %v1131_v48  ;;  %v994_v53 = vpop.f32.mrf.mxu0  ;;  %v3610_v39 = vpop.f32.mrf.mxu3  ;;  %v2043_v48 = vld [vmem:[%s4040_s0 + $0x190] sm:$0xf] }
 0x18f   :  { %1752 = vst.msk [vmem:[%s4042_s3 + $0x74] sm:$0xf] %vm1722_vm1, %v1638_v47  ;;  %v995_v55 = vadd.f32 %v3451_v61, %v994_v53  ;;  %v1292_v56 = vpop.f32.mrf.mxu1  ;;  %v2267_v53 = vld [vmem:[%s4040_s0 + $0x350] sm:$0xf] }
 0x190   :  { %v1425_v58 = vadd.f32 %v3506_v30, %v1132_v50 }
 0x191   :  { %v1288_v59 = vadd.f32 %v1287_v19, %v995_v55  ;;  %1033 = vmatmul.bf16.gmra.mxu0 %v2028_v49  ;;  %v2445_v49 = vld [vmem:[%s4040_s0 + $0x194] sm:$0xf0]  ;;  %v2053_v55 = vld [vmem:[%s4040_s0 + $0x1a8] sm:$0xf0] }
 0x192   :  { %v1581_v60 = vmax.f32 %v1425_v58, 0.0  ;;  %1173 = vmatmul.bf16.gmra.mxu2 %v2252_v51  ;;  %2361 = vmatmul.msk.bf16.gmra.mxu1 %vm738_vm0, %v2040_v28  ;;  %v2501_v51 = vld [vmem:[%s4040_s0 + $0x354] sm:$0xf0]  ;;  %v2285_v58 = vld [vmem:[%s4040_s0 + $0x378] sm:$0xf0] }
 0x193   :  { %v1526_v62 = vmax.f32 %v1288_v59, 0.0  ;;  %2390 = vmatmul.msk.bf16.gmra.mxu3 %vm738_vm0, %v2272_v57  ;;  %v2504_v57 = vld [vmem:[%s4040_s0 + $0x374] sm:$0xf] }
 0x194   :  { %v1694_v63 = vpack.c.bf16 %v1581_v60, %v1581_v60 }
 0x195   :  { %v1639_v40 = vpack.c.bf16 %v1526_v62, %v1526_v62  ;;  %v1134_v41 = vpop.f32.mrf.mxu2  ;;  %v2044_v62 = vor.u32 %v2445_v49, %v2043_v48 }
 0x196   :  { %1808 = vst.msk [vmem:[%s4042_s3 + $0x154] sm:$0xf] %vm1722_vm1, %v1694_v63  ;;  %v1135_v42 = vadd.f32 %v3451_v61, %v1134_v41  ;;  %v996_v30 = vpop.f32.mrf.mxu0  ;;  %v3625_v4 = vpop.f32.mrf.mxu3  ;;  %v2268_v41 = vor.u32 %v2501_v51, %v2267_v53 }
 0x197   :  { %1753 = vst.msk [vmem:[%s4042_s3 + $0x78] sm:$0xf] %vm1722_vm1, %v1639_v40  ;;  %v997_v5 = vadd.f32 %v3451_v61, %v996_v30  ;;  %v1294_v6 = vpop.f32.mrf.mxu1 }
 0x198   :  { %v1428_v7 = vadd.f32 %v3521_v27, %v1135_v42  ;;  %v2444_v27 = vld [vmem:[%s4040_s0 + $0x194] sm:$0xf] }
 0x199   :  { %v1290_v8 = vadd.f32 %v1289_v32, %v997_v5  ;;  %v2048_v3 = vor.u32 %v2444_v27, %v2045_v18 }
 0x19a   :  { %v1582_v13 = vmax.f32 %v1428_v7, 0.0  ;;  %v2288_v7 = vor.u32 %v2504_v57, %v2285_v58 }
 0x19b   :  { %v1527_v54 = vmax.f32 %v1290_v8, 0.0 }
 0x19c   :  { %v1695_v19 = vpack.c.bf16 %v1582_v13, %v1582_v13 }
 0x19d   :  { %v1640_v22 = vpack.c.bf16 %v1527_v54, %v1527_v54  ;;  %v1136_v23 = vpop.f32.mrf.mxu2 }
 0x19e   :  { %1809 = vst.msk [vmem:[%s4042_s3 + $0x158] sm:$0xf] %vm1722_vm1, %v1695_v19  ;;  %v1137_v26 = vadd.f32 %v3451_v61, %v1136_v23  ;;  %v999_v11 = vpop.f32.mrf.mxu0  ;;  %v3662_v2 = vpop.f32.mrf.mxu3 }
 0x19f   :  { %1754 = vst.msk [vmem:[%s4042_s3 + $0x7c] sm:$0xf] %vm1722_vm1, %v1640_v22  ;;  %v1000_v31 = vadd.f32 %v3451_v61, %v999_v11  ;;  %v1297_v32 = vpop.f32.mrf.mxu1  ;;  %v3740_v22 = vld [vmem:[%s4040_s0 + $0x380] sm:$0x33] }
 0x1a0   :  { %v1430_v34 = vadd.f32 %v3558_v0, %v1137_v26  ;;  %v2447_v26 = vld [vmem:[%s4040_s0 + $0x1a4] sm:$0xf0] }
 0x1a1   :  { %v1293_v35 = vadd.f32 %v1292_v56, %v1000_v31  ;;  %1038 = vmatmul.bf16.gmra.mxu0 %v2036_v24  ;;  %v2051_v24 = vld [vmem:[%s4040_s0 + $0x1a0] sm:$0xf]  ;;  %v2448_v31 = vld [vmem:[%s4040_s0 + $0x1b4] sm:$0xf] }
 0x1a2   :  { %v1583_v36 = vmax.f32 %v1430_v34, 0.0  ;;  %1178 = vmatmul.bf16.gmra.mxu2 %v2260_v1  ;;  %2362 = vmatmul.msk.bf16.gmra.mxu1 %vm738_vm0, %v2048_v3  ;;  %v2275_v1 = vld [vmem:[%s4040_s0 + $0x360] sm:$0xf] }
 0x1a3   :  { %v1528_v37 = vmax.f32 %v1293_v35, 0.0  ;;  %2391 = vmatmul.msk.bf16.gmra.mxu3 %vm738_vm0, %v2280_v33  ;;  %v494_v33 = vunpack.c.h.b16 %v3740_v22 }
 0x1a4   :  { %v1696_v38 = vpack.c.bf16 %v1583_v36, %v1583_v36 }
 0x1a5   :  { %v1641_v15 = vpack.c.bf16 %v1528_v37, %v1528_v37  ;;  %v1139_v16 = vpop.f32.mrf.mxu2  ;;  %v2052_v37 = vor.u32 %v2447_v26, %v2051_v24 }
 0x1a6   :  { %1810 = vst.msk [vmem:[%s4042_s3 + $0x15c] sm:$0xf] %vm1722_vm1, %v1696_v38  ;;  %v1140_v17 = vadd.f32 %v3451_v61, %v1139_v16  ;;  %v1001_v0 = vpop.f32.mrf.mxu0  ;;  %v3677_v43 = vpop.f32.mrf.mxu3 }
 0x1a7   :  { %1755 = vst.msk [vmem:[%s4042_s3 + $0x80] sm:$0xf] %vm1722_vm1, %v1641_v15  ;;  %v1002_v44 = vadd.f32 %v3451_v61, %v1001_v0  ;;  %v1299_v45 = vpop.f32.mrf.mxu1 }
 0x1a8   :  { %v1433_v46 = vadd.f32 %v3573_v29, %v1140_v17  ;;  %v2446_v29 = vld [vmem:[%s4040_s0 + $0x1a4] sm:$0xf] }
 0x1a9   :  { %v1295_v47 = vadd.f32 %v1294_v6, %v1002_v44  ;;  %v2056_v42 = vor.u32 %v2446_v29, %v2053_v55 }
 0x1aa   :  { %v1584_v50 = vmax.f32 %v1433_v46, 0.0  ;;  %v608_v46 = vpack.c.b16 %v494_v33, %v494_v33 }
 0x1ab   :  { %v1529_v28 = vmax.f32 %v1295_v47, 0.0 }
 0x1ac   :  { %v1697_v56 = vpack.c.bf16 %v1584_v50, %v1584_v50 }
 0x1ad   :  { %v1642_v59 = vpack.c.bf16 %v1529_v28, %v1529_v28  ;;  %v1141_v60 = vpop.f32.mrf.mxu2 }
 0x1ae   :  { %1811 = vst.msk [vmem:[%s4042_s3 + $0x160] sm:$0xf] %vm1722_vm1, %v1697_v56  ;;  %v1142_v63 = vadd.f32 %v3451_v61, %v1141_v60  ;;  %v1004_v40 = vpop.f32.mrf.mxu0  ;;  %v3714_v30 = vpop.f32.mrf.mxu3  ;;  %v2059_v60 = vld [vmem:[%s4040_s0 + $0x1b0] sm:$0xf] }
 0x1af   :  { %1756 = vst.msk [vmem:[%s4042_s3 + $0x84] sm:$0xf] %vm1722_vm1, %v1642_v59  ;;  %v1005_v5 = vadd.f32 %v3451_v61, %v1004_v40  ;;  %v1302_v6 = vpop.f32.mrf.mxu1  ;;  %v2283_v40 = vld [vmem:[%s4040_s0 + $0x370] sm:$0xf] }
 0x1b0   :  { %v1435_v8 = vadd.f32 %v3610_v39, %v1142_v63 }
 0x1b1   :  { %v1298_v10 = vadd.f32 %v1297_v32, %v1005_v5  ;;  %1043 = vmatmul.bf16.gmra.mxu0 %v2044_v62  ;;  %v2061_v32 = vld [vmem:[%s4040_s0 + $0x1b8] sm:$0xf0]  ;;  %v2449_v62 = vld [vmem:[%s4040_s0 + $0x1b4] sm:$0xf0]  ;;  %v2069_v5 = vld [vmem:[%s4040_s0 + $0x1c8] sm:$0xf0] }
 0x1b2   :  { %v1585_v12 = vmax.f32 %v1435_v8, 0.0  ;;  %1183 = vmatmul.bf16.gmra.mxu2 %v2268_v41  ;;  %2363 = vmatmul.msk.bf16.gmra.mxu1 %vm738_vm0, %v2056_v42  ;;  %v2064_v17 = vor.u32 %v2448_v31, %v2061_v32  ;;  %v2505_v41 = vld [vmem:[%s4040_s0 + $0x374] sm:$0xf0] }
 0x1b3   :  { %v1530_v13 = vmax.f32 %v1298_v10, 0.0  ;;  %2392 = vmatmul.msk.bf16.gmra.mxu3 %vm738_vm0, %v2288_v7  ;;  %v2060_v10 = vor.u32 %v2449_v62, %v2059_v60 }
 0x1b4   :  { %v1698_v14 = vpack.c.bf16 %v1585_v12, %v1585_v12 }
 0x1b5   :  { %v1643_v52 = vpack.c.bf16 %v1530_v13, %v1530_v13  ;;  %v1144_v54 = vpop.f32.mrf.mxu2 }
 0x1b6   :  { %1812 = vst.msk [vmem:[%s4042_s3 + $0x164] sm:$0xf] %vm1722_vm1, %v1698_v14  ;;  %v1145_v27 = vadd.f32 %v3451_v61, %v1144_v54  ;;  %v1006_v39 = vpop.f32.mrf.mxu0  ;;  %v3729_v18 = vpop.f32.mrf.mxu3  ;;  %v2284_v14 = vor.u32 %v2505_v41, %v2283_v40 }
 0x1b7   :  { %1757 = vst.msk [vmem:[%s4042_s3 + $0x88] sm:$0xf] %vm1722_vm1, %v1643_v52  ;;  %v1007_v19 = vadd.f32 %v3451_v61, %v1006_v39  ;;  %v1304_v20 = vpop.f32.mrf.mxu1 }
 0x1b8   :  { %v1438_v21 = vadd.f32 %v3625_v4, %v1145_v27  ;;  %v2503_v4 = vld [vmem:[%s4040_s0 + $0x364] sm:$0xf0] }
 0x1b9   :  { %v1300_v23 = vadd.f32 %v1299_v45, %v1007_v19  ;;  %v2276_v16 = vor.u32 %v2503_v4, %v2275_v1 }
 0x1ba   :  { %v1586_v11 = vmax.f32 %v1438_v21, 0.0 }
 0x1bb   :  { %v1531_v3 = vmax.f32 %v1300_v23, 0.0 }
 0x1bc   :  { %v1699_v34 = vpack.c.bf16 %v1586_v11, %v1586_v11 }
 0x1bd   :  { %v1644_v35 = vpack.c.bf16 %v1531_v3, %v1531_v3  ;;  %v1146_v36 = vpop.f32.mrf.mxu2 }
 0x1be   :  { %1813 = vst.msk [vmem:[%s4042_s3 + $0x168] sm:$0xf] %vm1722_vm1, %v1699_v34  ;;  %v1147_v38 = vadd.f32 %v3451_v61, %v1146_v36  ;;  %v1009_v15 = vpop.f32.mrf.mxu0  ;;  %v3766_v0 = vpop.f32.mrf.mxu3 }
 0x1bf   :  { %1758 = vst.msk [vmem:[%s4042_s3 + $0x8c] sm:$0xf] %vm1722_vm1, %v1644_v35  ;;  %v1010_v44 = vadd.f32 %v3451_v61, %v1009_v15  ;;  %v1307_v45 = vpop.f32.mrf.mxu1  ;;  %v493_v35 = vunpack.c.l.b16 %v3740_v22 }
 0x1c0   :  { %v1440_v47 = vadd.f32 %v3662_v2, %v1147_v38 }
 0x1c1   :  { %v1303_v48 = vadd.f32 %v1302_v6, %v1010_v44  ;;  %1048 = vmatmul.bf16.gmra.mxu0 %v2052_v37  ;;  %v607_v44 = vpack.c.b16 %v493_v35, %v493_v35 }
 0x1c2   :  { %v1587_v49 = vmax.f32 %v1440_v47, 0.0  ;;  %1188 = vmatmul.bf16.gmra.mxu2 %v2276_v16  ;;  %2364 = vmatmul.msk.bf16.gmra.mxu1 %vm738_vm0, %v2064_v17 }
 0x1c3   :  { %v1532_v50 = vmax.f32 %v1303_v48, 0.0  ;;  %2393 = vmatmul.msk.bf16.gmra.mxu3 %vm738_vm0, %v608_v46 }
 0x1c4   :  { %v1700_v53 = vpack.c.bf16 %v1587_v49, %v1587_v49 }
 0x1c5   :  { %v1645_v51 = vpack.c.bf16 %v1532_v50, %v1532_v50  ;;  %v1149_v28 = vpop.f32.mrf.mxu2 }
 0x1c6   :  { %1814 = vst.msk [vmem:[%s4042_s3 + $0x16c] sm:$0xf] %vm1722_vm1, %v1700_v53  ;;  %v1150_v29 = vadd.f32 %v3451_v61, %v1149_v28  ;;  %v1011_v2 = vpop.f32.mrf.mxu0  ;;  %v3781_v55 = vpop.f32.mrf.mxu3 }
 0x1c7   :  { %1759 = vst.msk [vmem:[%s4042_s3 + $0x90] sm:$0xf] %vm1722_vm1, %v1645_v51  ;;  %v1012_v56 = vadd.f32 %v3451_v61, %v1011_v2  ;;  %v1309_v57 = vpop.f32.mrf.mxu1 }
 0x1c8   :  { %v1443_v58 = vadd.f32 %v3677_v43, %v1150_v29  ;;  %v2450_v43 = vld [vmem:[%s4040_s0 + $0x1c4] sm:$0xf] }
 0x1c9   :  { %v1305_v59 = vadd.f32 %v1304_v20, %v1012_v56  ;;  %v2072_v52 = vor.u32 %v2450_v43, %v2069_v5 }
 0x1ca   :  { %v1588_v63 = vmax.f32 %v1443_v58, 0.0 }
 0x1cb   :  { %v1533_v42 = vmax.f32 %v1305_v59, 0.0 }
 0x1cc   :  { %v1701_v6 = vpack.c.bf16 %v1588_v63, %v1588_v63 }
 0x1cd   :  { %v1646_v7 = vpack.c.bf16 %v1533_v42, %v1533_v42  ;;  %v1151_v8 = vpop.f32.mrf.mxu2 }
 0x1ce   :  { %1815 = vst.msk [vmem:[%s4042_s3 + $0x170] sm:$0xf] %vm1722_vm1, %v1701_v6  ;;  %v1152_v12 = vadd.f32 %v3451_v61, %v1151_v8  ;;  %v1014_v13 = vpop.f32.mrf.mxu0  ;;  %v3812_v54 = vpop.f32.mrf.mxu3 }
 0x1cf   :  { %1760 = vst.msk [vmem:[%s4042_s3 + $0x94] sm:$0xf] %vm1722_vm1, %v1646_v7  ;;  %v1015_v27 = vadd.f32 %v3451_v61, %v1014_v13  ;;  %v1312_v39 = vpop.f32.mrf.mxu1 }
 0x1d0   :  { %v1445_v19 = vadd.f32 %v3714_v30, %v1152_v12 }
 0x1d1   :  { %v1308_v20 = vadd.f32 %v1307_v45, %v1015_v27  ;;  %1053 = vmatmul.bf16.gmra.mxu0 %v2060_v10 }
 0x1d2   :  { %v1589_v21 = vmax.f32 %v1445_v19, 0.0  ;;  %1193 = vmatmul.bf16.gmra.mxu2 %v2284_v14  ;;  %2365 = vmatmul.msk.bf16.gmra.mxu1 %vm738_vm0, %v2072_v52 }
 0x1d3   :  { %v1534_v23 = vmax.f32 %v1308_v20, 0.0 }
 0x1d4   :  { %v1702_v24 = vpack.c.bf16 %v1589_v21, %v1589_v21 }
 0x1d5   :  { %v1647_v26 = vpack.c.bf16 %v1534_v23, %v1534_v23  ;;  %v1154_v11 = vpop.f32.mrf.mxu2 }
 0x1d6   :  { %1816 = vst.msk [vmem:[%s4042_s3 + $0x174] sm:$0xf] %vm1722_vm1, %v1702_v24  ;;  %v1155_v1 = vadd.f32 %v3451_v61, %v1154_v11  ;;  %v1016_v4 = vpop.f32.mrf.mxu0  ;;  %v3826_v3 = vpop.f32.mrf.mxu3 }
 0x1d7   :  { %1761 = vst.msk [vmem:[%s4042_s3 + $0x98] sm:$0xf] %vm1722_vm1, %v1647_v26  ;;  %v1017_v30 = vadd.f32 %v3451_v61, %v1016_v4  ;;  %v1314_v31 = vpop.f32.mrf.mxu1 }
 0x1d8   :  { %v1448_v32 = vadd.f32 %v3729_v18, %v1155_v1 }
 0x1d9   :  { %v1310_v33 = vadd.f32 %v1309_v57, %v1017_v30 }
 0x1da   :  { %v1590_v34 = vmax.f32 %v1448_v32, 0.0 }
 0x1db   :  { %v1535_v36 = vmax.f32 %v1310_v33, 0.0 }
 0x1dc   :  { %v1703_v37 = vpack.c.bf16 %v1590_v34, %v1590_v34 }
 0x1dd   :  { %v1648_v38 = vpack.c.bf16 %v1535_v36, %v1535_v36  ;;  %v1156_v15 = vpop.f32.mrf.mxu2 }
 0x1de   :  { %1817 = vst.msk [vmem:[%s4042_s3 + $0x178] sm:$0xf] %vm1722_vm1, %v1703_v37  ;;  %v1157_v16 = vadd.f32 %v3451_v61, %v1156_v15  ;;  %v1019_v17 = vpop.f32.mrf.mxu0  ;;  %v1459_v45 = vpop.f32.mrf.mxu3 }
 0x1df   :  { %1762 = vst.msk [vmem:[%s4042_s3 + $0x9c] sm:$0xf] %vm1722_vm1, %v1648_v38  ;;  %v1020_v18 = vadd.f32 %v3451_v61, %v1019_v17  ;;  %v1317_v22 = vpop.f32.mrf.mxu1 }
 0x1e0   :  { %v1450_v46 = vadd.f32 %v3766_v0, %v1157_v16 }
 0x1e1   :  { %v1313_v47 = vadd.f32 %v1312_v39, %v1020_v18 }
 0x1e2   :  { %v1591_v48 = vmax.f32 %v1450_v46, 0.0  ;;  %1198 = vmatmul.bf16.gmra.mxu2 %v607_v44 }
 0x1e3   :  { %v1536_v49 = vmax.f32 %v1313_v47, 0.0 }
 0x1e4   :  { %v1704_v50 = vpack.c.bf16 %v1591_v48, %v1591_v48 }
 0x1e5   :  { %v1649_v53 = vpack.c.bf16 %v1536_v49, %v1536_v49  ;;  %v1159_v51 = vpop.f32.mrf.mxu2 }
 0x1e6   :  { %1818 = vst.msk [vmem:[%s4042_s3 + $0x17c] sm:$0xf] %vm1722_vm1, %v1704_v50  ;;  %v1160_v28 = vadd.f32 %v3451_v61, %v1159_v51  ;;  %v1021_v29 = vpop.f32.mrf.mxu0  ;;  %v1462_v2 = vpop.f32.mrf.mxu3 }
 0x1e7   :  { %1763 = vst.msk [vmem:[%s4042_s3 + $0xa0] sm:$0xf] %vm1722_vm1, %v1649_v53  ;;  %v1022_v0 = vadd.f32 %v3451_v61, %v1021_v29  ;;  %v1319_v56 = vpop.f32.mrf.mxu1 }
 0x1e8   :  { %v1453_v57 = vadd.f32 %v3781_v55, %v1160_v28 }
 0x1e9   :  { %v1315_v58 = vadd.f32 %v1314_v31, %v1022_v0 }
 0x1ea   :  { %v1592_v59 = vmax.f32 %v1453_v57, 0.0 }
 0x1eb   :  { %v1537_v60 = vmax.f32 %v1315_v58, 0.0 }
 0x1ec   :  { %v1705_v62 = vpack.c.bf16 %v1592_v59, %v1592_v59 }
 0x1ed   :  { %v1650_v63 = vpack.c.bf16 %v1537_v60, %v1537_v60  ;;  %v1161_v40 = vpop.f32.mrf.mxu2 }
 0x1ee   :  { %1819 = vst.msk [vmem:[%s4042_s3 + $0x180] sm:$0xf] %vm1722_vm1, %v1705_v62  ;;  %v1162_v41 = vadd.f32 %v3451_v61, %v1161_v40  ;;  %v1024_v42 = vpop.f32.mrf.mxu0  ;;  %v1464_v43 = vpop.f32.mrf.mxu3 }
 0x1ef   :  { %1764 = vst.msk [vmem:[%s4042_s3 + $0xa4] sm:$0xf] %vm1722_vm1, %v1650_v63  ;;  %v1025_v55 = vadd.f32 %v3451_v61, %v1024_v42  ;;  %v1322_v5 = vpop.f32.mrf.mxu1 }
 0x1f0   :  { %v1455_v6 = vadd.f32 %v3812_v54, %v1162_v41 }
 0x1f1   :  { %v1318_v7 = vadd.f32 %v1317_v22, %v1025_v55 }
 0x1f2   :  { %v1593_v8 = vmax.f32 %v1455_v6, 0.0 }
 0x1f3   :  { %v1538_v10 = vmax.f32 %v1318_v7, 0.0 }
 0x1f4   :  { %v1706_v12 = vpack.c.bf16 %v1593_v8, %v1593_v8 }
 0x1f5   :  { %v1651_v13 = vpack.c.bf16 %v1538_v10, %v1538_v10  ;;  %v1164_v14 = vpop.f32.mrf.mxu2 }
 0x1f6   :  { %1820 = vst.msk [vmem:[%s4042_s3 + $0x184] sm:$0xf] %vm1722_vm1, %v1706_v12  ;;  %v1165_v52 = vadd.f32 %v3451_v61, %v1164_v14  ;;  %v1026_v27 = vpop.f32.mrf.mxu0  ;;  %v1467_v39 = vpop.f32.mrf.mxu3 }
 0x1f7   :  { %1765 = vst.msk [vmem:[%s4042_s3 + $0xa8] sm:$0xf] %vm1722_vm1, %v1651_v13  ;;  %v1027_v54 = vadd.f32 %v3451_v61, %v1026_v27  ;;  %v1324_v19 = vpop.f32.mrf.mxu1 }
 0x1f8   :  { %v1458_v20 = vadd.f32 %v3826_v3, %v1165_v52 }
 0x1f9   :  { %v1320_v21 = vadd.f32 %v1319_v56, %v1027_v54 }
 0x1fa   :  { %v1594_v23 = vmax.f32 %v1458_v20, 0.0 }
 0x1fb   :  { %v1539_v24 = vmax.f32 %v1320_v21, 0.0 }
 0x1fc   :  { %v1707_v26 = vpack.c.bf16 %v1594_v23, %v1594_v23 }
 0x1fd   :  { %v1652_v11 = vpack.c.bf16 %v1539_v24, %v1539_v24  ;;  %v1166_v1 = vpop.f32.mrf.mxu2 }
 0x1fe   :  { %1821 = vst.msk [vmem:[%s4042_s3 + $0x188] sm:$0xf] %vm1722_vm1, %v1707_v26  ;;  %v1167_v4 = vadd.f32 %v3451_v61, %v1166_v1  ;;  %v1029_v30 = vpop.f32.mrf.mxu0  ;;  %v1469_v31 = vpop.f32.mrf.mxu3 }
 0x1ff   :  { %1766 = vst.msk [vmem:[%s4042_s3 + $0xac] sm:$0xf] %vm1722_vm1, %v1652_v11  ;;  %v1030_v3 = vadd.f32 %v3451_v61, %v1029_v30  ;;  %v1327_v32 = vpop.f32.mrf.mxu1 }
 0x200   :  { %v1460_v33 = vadd.f32 %v1459_v45, %v1167_v4 }
 0x201   :  { %v1323_v34 = vadd.f32 %v1322_v5, %v1030_v3 }
 0x202   :  { %v1595_v35 = vmax.f32 %v1460_v33, 0.0 }
 0x203   :  { %v1540_v36 = vmax.f32 %v1323_v34, 0.0 }
 0x204   :  { %v1708_v37 = vpack.c.bf16 %v1595_v35, %v1595_v35 }
 0x205   :  { %v1653_v38 = vpack.c.bf16 %v1540_v36, %v1540_v36  ;;  %v1169_v15 = vpop.f32.mrf.mxu2 }
 0x206   :  { %1822 = vst.msk [vmem:[%s4042_s3 + $0x18c] sm:$0xf] %vm1722_vm1, %v1708_v37  ;;  %v1170_v16 = vadd.f32 %v3451_v61, %v1169_v15  ;;  %v1031_v17 = vpop.f32.mrf.mxu0  ;;  %v1472_v44 = vpop.f32.mrf.mxu3 }
 0x207   :  { %1767 = vst.msk [vmem:[%s4042_s3 + $0xb0] sm:$0xf] %vm1722_vm1, %v1653_v38  ;;  %v1032_v45 = vadd.f32 %v3451_v61, %v1031_v17  ;;  %v1329_v18 = vpop.f32.mrf.mxu1 }
 0x208   :  { %v1463_v22 = vadd.f32 %v1462_v2, %v1170_v16 }
 0x209   :  { %v1325_v46 = vadd.f32 %v1324_v19, %v1032_v45 }
 0x20a   :  { %v1596_v47 = vmax.f32 %v1463_v22, 0.0 }
 0x20b   :  { %v1541_v48 = vmax.f32 %v1325_v46, 0.0 }
 0x20c   :  { %v1709_v49 = vpack.c.bf16 %v1596_v47, %v1596_v47 }
 0x20d   :  { %v1654_v50 = vpack.c.bf16 %v1541_v48, %v1541_v48  ;;  %v1171_v53 = vpop.f32.mrf.mxu2 }
 0x20e   :  { %1823 = vst.msk [vmem:[%s4042_s3 + $0x190] sm:$0xf] %vm1722_vm1, %v1709_v49  ;;  %v1172_v51 = vadd.f32 %v3451_v61, %v1171_v53  ;;  %v1034_v28 = vpop.f32.mrf.mxu0  ;;  %v1474_v29 = vpop.f32.mrf.mxu3 }
 0x20f   :  { %1768 = vst.msk [vmem:[%s4042_s3 + $0xb4] sm:$0xf] %vm1722_vm1, %v1654_v50  ;;  %v1035_v2 = vadd.f32 %v3451_v61, %v1034_v28  ;;  %v1332_v0 = vpop.f32.mrf.mxu1 }
 0x210   :  { %v1465_v56 = vadd.f32 %v1464_v43, %v1172_v51 }
 0x211   :  { %v1328_v57 = vadd.f32 %v1327_v32, %v1035_v2 }
 0x212   :  { %v1597_v58 = vmax.f32 %v1465_v56, 0.0 }
 0x213   :  { %v1542_v59 = vmax.f32 %v1328_v57, 0.0 }
 0x214   :  { %v1710_v60 = vpack.c.bf16 %v1597_v58, %v1597_v58 }
 0x215   :  { %v1655_v62 = vpack.c.bf16 %v1542_v59, %v1542_v59  ;;  %v1174_v63 = vpop.f32.mrf.mxu2 }
 0x216   :  { %1824 = vst.msk [vmem:[%s4042_s3 + $0x194] sm:$0xf] %vm1722_vm1, %v1710_v60  ;;  %v1175_v40 = vadd.f32 %v3451_v61, %v1174_v63  ;;  %v1036_v41 = vpop.f32.mrf.mxu0  ;;  %v1477_v42 = vpop.f32.mrf.mxu3 }
 0x217   :  { %1769 = vst.msk [vmem:[%s4042_s3 + $0xb8] sm:$0xf] %vm1722_vm1, %v1655_v62  ;;  %v1037_v43 = vadd.f32 %v3451_v61, %v1036_v41  ;;  %v1334_v55 = vpop.f32.mrf.mxu1 }
 0x218   :  { %v1468_v5 = vadd.f32 %v1467_v39, %v1175_v40 }
 0x219   :  { %v1330_v6 = vadd.f32 %v1329_v18, %v1037_v43 }
 0x21a   :  { %v1598_v7 = vmax.f32 %v1468_v5, 0.0 }
 0x21b   :  { %v1543_v8 = vmax.f32 %v1330_v6, 0.0 }
 0x21c   :  { %v1711_v10 = vpack.c.bf16 %v1598_v7, %v1598_v7 }
 0x21d   :  { %v1656_v12 = vpack.c.bf16 %v1543_v8, %v1543_v8  ;;  %v1176_v13 = vpop.f32.mrf.mxu2 }
 0x21e   :  { %1825 = vst.msk [vmem:[%s4042_s3 + $0x198] sm:$0xf] %vm1722_vm1, %v1711_v10  ;;  %v1177_v14 = vadd.f32 %v3451_v61, %v1176_v13  ;;  %v1039_v52 = vpop.f32.mrf.mxu0  ;;  %v1479_v27 = vpop.f32.mrf.mxu3 }
 0x21f   :  { %1770 = vst.msk [vmem:[%s4042_s3 + $0xbc] sm:$0xf] %vm1722_vm1, %v1656_v12  ;;  %v1040_v39 = vadd.f32 %v3451_v61, %v1039_v52  ;;  %v1337_v54 = vpop.f32.mrf.mxu1 }
 0x220   :  { %v1470_v19 = vadd.f32 %v1469_v31, %v1177_v14 }
 0x221   :  { %v1333_v20 = vadd.f32 %v1332_v0, %v1040_v39 }
 0x222   :  { %v1599_v21 = vmax.f32 %v1470_v19, 0.0 }
 0x223   :  { %v1544_v23 = vmax.f32 %v1333_v20, 0.0 }
 0x224   :  { %v1712_v24 = vpack.c.bf16 %v1599_v21, %v1599_v21 }
 0x225   :  { %v1657_v26 = vpack.c.bf16 %v1544_v23, %v1544_v23  ;;  %v1179_v11 = vpop.f32.mrf.mxu2 }
 0x226   :  { %1826 = vst.msk [vmem:[%s4042_s3 + $0x19c] sm:$0xf] %vm1722_vm1, %v1712_v24  ;;  %v1180_v1 = vadd.f32 %v3451_v61, %v1179_v11  ;;  %v1041_v4 = vpop.f32.mrf.mxu0  ;;  %v1482_v30 = vpop.f32.mrf.mxu3 }
 0x227   :  { %1771 = vst.msk [vmem:[%s4042_s3 + $0xc0] sm:$0xf] %vm1722_vm1, %v1657_v26  ;;  %v1042_v31 = vadd.f32 %v3451_v61, %v1041_v4  ;;  %v1339_v3 = vpop.f32.mrf.mxu1 }
 0x228   :  { %v1473_v32 = vadd.f32 %v1472_v44, %v1180_v1 }
 0x229   :  { %v1335_v33 = vadd.f32 %v1334_v55, %v1042_v31 }
 0x22a   :  { %v1600_v34 = vmax.f32 %v1473_v32, 0.0 }
 0x22b   :  { %v1545_v35 = vmax.f32 %v1335_v33, 0.0 }
 0x22c   :  { %v1713_v36 = vpack.c.bf16 %v1600_v34, %v1600_v34 }
 0x22d   :  { %v1658_v37 = vpack.c.bf16 %v1545_v35, %v1545_v35  ;;  %v1181_v38 = vpop.f32.mrf.mxu2 }
 0x22e   :  { %1827 = vst.msk [vmem:[%s4042_s3 + $0x1a0] sm:$0xf] %vm1722_vm1, %v1713_v36  ;;  %v1182_v15 = vadd.f32 %v3451_v61, %v1181_v38  ;;  %v1044_v16 = vpop.f32.mrf.mxu0  ;;  %v1484_v17 = vpop.f32.mrf.mxu3 }
 0x22f   :  { %1772 = vst.msk [vmem:[%s4042_s3 + $0xc4] sm:$0xf] %vm1722_vm1, %v1658_v37  ;;  %v1045_v44 = vadd.f32 %v3451_v61, %v1044_v16  ;;  %v1342_v45 = vpop.f32.mrf.mxu1 }
 0x230   :  { %v1475_v18 = vadd.f32 %v1474_v29, %v1182_v15 }
 0x231   :  { %v1338_v22 = vadd.f32 %v1337_v54, %v1045_v44 }
 0x232   :  { %v1601_v46 = vmax.f32 %v1475_v18, 0.0 }
 0x233   :  { %v1546_v47 = vmax.f32 %v1338_v22, 0.0 }
 0x234   :  { %v1714_v48 = vpack.c.bf16 %v1601_v46, %v1601_v46 }
 0x235   :  { %v1659_v49 = vpack.c.bf16 %v1546_v47, %v1546_v47  ;;  %v1184_v50 = vpop.f32.mrf.mxu2 }
 0x236   :  { %1828 = vst.msk [vmem:[%s4042_s3 + $0x1a4] sm:$0xf] %vm1722_vm1, %v1714_v48  ;;  %v1185_v53 = vadd.f32 %v3451_v61, %v1184_v50  ;;  %v1046_v51 = vpop.f32.mrf.mxu0  ;;  %v3954_v28 = vpop.f32.mrf.mxu3 }
 0x237   :  { %1773 = vst.msk [vmem:[%s4042_s3 + $0xc8] sm:$0xf] %vm1722_vm1, %v1659_v49  ;;  %v1047_v29 = vadd.f32 %v3451_v61, %v1046_v51  ;;  %v1344_v2 = vpop.f32.mrf.mxu1 }
 0x238   :  { %v1478_v0 = vadd.f32 %v1477_v42, %v1185_v53  ;;  %v3975_v42 = vld [vmem:[%s4041_s2] ss:$0 sm:$0xff] }
 0x239   :  { %v1340_v56 = vadd.f32 %v1339_v3, %v1047_v29  ;;  %v1060_v11 = vadd.f32 %v3975_v42, %v2847_v9  ;;  %v1062_v44 = vadd.f32 %v3975_v42, %v2880_v25 }
 0x23a   :  { %v1602_v57 = vmax.f32 %v1478_v0, 0.0 }
 0x23b   :  { %v1547_v58 = vmax.f32 %v1340_v56, 0.0 }
 0x23c   :  { %v1715_v59 = vpack.c.bf16 %v1602_v57, %v1602_v57 }
 0x23d   :  { %v1660_v60 = vpack.c.bf16 %v1547_v58, %v1547_v58  ;;  %v1186_v62 = vpop.f32.mrf.mxu2 }
 0x23e   :  { %1829 = vst.msk [vmem:[%s4042_s3 + $0x1a8] sm:$0xf] %vm1722_vm1, %v1715_v59  ;;  %v1187_v63 = vadd.f32 %v3451_v61, %v1186_v62  ;;  %v1049_v40 = vpop.f32.mrf.mxu0  ;;  %v3966_v41 = vpop.f32.mrf.mxu3 }
 0x23f   :  { %1774 = vst.msk [vmem:[%s4042_s3 + $0xcc] sm:$0xf] %vm1722_vm1, %v1660_v60  ;;  %v1050_v43 = vadd.f32 %v3975_v42, %v1049_v40  ;;  %v1347_v55 = vpop.f32.mrf.mxu1 }
 0x240   :  { %v1480_v5 = vadd.f32 %v1479_v27, %v1187_v63 }
 0x241   :  { %v1343_v6 = vadd.f32 %v1342_v45, %v1050_v43 }
 0x242   :  { %v1603_v7 = vmax.f32 %v1480_v5, 0.0 }
 0x243   :  { %v1548_v61 = vmax.f32 %v1343_v6, 0.0 }
 0x244   :  { %v1716_v8 = vpack.c.bf16 %v1603_v7, %v1603_v7 }
 0x245   :  { %v1661_v10 = vpack.c.bf16 %v1548_v61, %v1548_v61  ;;  %v1189_v12 = vpop.f32.mrf.mxu2 }
 0x246   :  { %1830 = vst.msk [vmem:[%s4042_s3 + $0x1ac] sm:$0xf] %vm1722_vm1, %v1716_v8  ;;  %v1190_v13 = vadd.f32 %v3975_v42, %v1189_v12  ;;  %v1051_v14 = vpop.f32.mrf.mxu0  ;;  %v1492_v52 = vpop.f32.mrf.mxu3 }
 0x247   :  { %1775 = vst.msk [vmem:[%s4042_s3 + $0xd0] sm:$0xf] %vm1722_vm1, %v1661_v10  ;;  %v1052_v27 = vadd.f32 %v3975_v42, %v1051_v14  ;;  %v1349_v39 = vpop.f32.mrf.mxu1 }
 0x248   :  { %v1483_v54 = vadd.f32 %v1482_v30, %v1190_v13 }
 0x249   :  { %v1345_v19 = vadd.f32 %v1344_v2, %v1052_v27 }
 0x24a   :  { %v1604_v20 = vmax.f32 %v1483_v54, 0.0 }
 0x24b   :  { %v1549_v21 = vmax.f32 %v1345_v19, 0.0 }
 0x24c   :  { %v1717_v23 = vpack.c.bf16 %v1604_v20, %v1604_v20 }
 0x24d   :  { %v1662_v24 = vpack.c.bf16 %v1549_v21, %v1549_v21  ;;  %v1191_v26 = vpop.f32.mrf.mxu2 }
 0x24e   :  { %1831 = vst.msk [vmem:[%s4042_s3 + $0x1b0] sm:$0xf] %vm1722_vm1, %v1717_v23  ;;  %v1192_v1 = vadd.f32 %v3975_v42, %v1191_v26  ;;  %v1054_v4 = vpop.f32.mrf.mxu0  ;;  %v1494_v31 = vpop.f32.mrf.mxu3 }
 0x24f   :  { %1776 = vst.msk [vmem:[%s4042_s3 + $0xd4] sm:$0xf] %vm1722_vm1, %v1662_v24  ;;  %v1055_v30 = vadd.f32 %v3975_v42, %v1054_v4  ;;  %v1352_v3 = vpop.f32.mrf.mxu1 }
 0x250   :  { %v1485_v32 = vadd.f32 %v1484_v17, %v1192_v1  ;;  %v1353_v33 = vadd.f32 %v1352_v3, %v1060_v11 }
 0x251   :  { %v1348_v9 = vadd.f32 %v1347_v55, %v1055_v30 }
 0x252   :  { %v1605_v34 = vmax.f32 %v1485_v32, 0.0  ;;  %v1552_v35 = vmax.f32 %v1353_v33, 0.0 }
 0x253   :  { %v1550_v36 = vmax.f32 %v1348_v9, 0.0 }
 0x254   :  { %v1718_v37 = vpack.c.bf16 %v1605_v34, %v1605_v34  ;;  %v1665_v38 = vpack.c.bf16 %v1552_v35, %v1552_v35 }
 0x255   :  { %v1663_v15 = vpack.c.bf16 %v1550_v36, %v1550_v36  ;;  %v1194_v16 = vpop.f32.mrf.mxu2 }
 0x256   :  { %1832 = vst.msk [vmem:[%s4042_s3 + $0x1b4] sm:$0xf] %vm1722_vm1, %v1718_v37  ;;  %v1195_v45 = vadd.f32 %v3975_v42, %v1194_v16  ;;  %v1056_v17 = vpop.f32.mrf.mxu0 }
 0x257   :  { %1777 = vst.msk [vmem:[%s4042_s3 + $0xd8] sm:$0xf] %vm1722_vm1, %v1663_v15  ;;  %v1057_v18 = vadd.f32 %v3975_v42, %v1056_v17  ;;  %v1354_v22 = vpop.f32.mrf.mxu1 }
 0x258   :  { %1779 = vst.msk [vmem:[%s4042_s3 + $0xe0] sm:$0xf] %vm1722_vm1, %v1665_v38  ;;  %v1488_v25 = vadd.f32 %v3954_v28, %v1195_v45  ;;  %v1355_v46 = vadd.f32 %v1354_v22, %v1062_v44 }
 0x259   :  { %v1350_v47 = vadd.f32 %v1349_v39, %v1057_v18 }
 0x25a   :  { %v1606_v48 = vmax.f32 %v1488_v25, 0.0  ;;  %v1553_v49 = vmax.f32 %v1355_v46, 0.0 }
 0x25b   :  { %v1551_v50 = vmax.f32 %v1350_v47, 0.0 }
 0x25c   :  { %v1719_v53 = vpack.c.bf16 %v1606_v48, %v1606_v48  ;;  %v1666_v51 = vpack.c.bf16 %v1553_v49, %v1553_v49 }
 0x25d   :  { %v1664_v29 = vpack.c.bf16 %v1551_v50, %v1551_v50  ;;  %v1196_v2 = vpop.f32.mrf.mxu2 }
 0x25e   :  { %1833 = vst.msk [vmem:[%s4042_s3 + $0x1b8] sm:$0xf] %vm1722_vm1, %v1719_v53  ;;  %v1197_v0 = vadd.f32 %v3975_v42, %v1196_v2 }
 0x25f   :  { %1778 = vst.msk [vmem:[%s4042_s3 + $0xdc] sm:$0xf] %vm1722_vm1, %v1664_v29 }
 0x260   :  { %1780 = vst.msk [vmem:[%s4042_s3 + $0xe4] sm:$0xf] %vm1722_vm1, %v1666_v51  ;;  %v1490_v28 = vadd.f32 %v3966_v41, %v1197_v0 }
 0x262   :  { %v1607_v56 = vmax.f32 %v1490_v28, 0.0 }
 0x264   :  { %v1720_v57 = vpack.c.bf16 %v1607_v56, %v1607_v56 }
 0x265   :  { %v1199_v58 = vpop.f32.mrf.mxu2 }
 0x266   :  { %1834 = vst.msk [vmem:[%s4042_s3 + $0x1bc] sm:$0xf] %vm1722_vm1, %v1720_v57  ;;  %v1200_v59 = vadd.f32 %v3975_v42, %v1199_v58 }
 0x268   :  { %v1493_v60 = vadd.f32 %v1492_v52, %v1200_v59 }
 0x26a   :  { %v1608_v62 = vmax.f32 %v1493_v60, 0.0 }
 0x26c   :  { %v1721_v63 = vpack.c.bf16 %v1608_v62, %v1608_v62 }
 0x26d   :  { %v1201_v40 = vpop.f32.mrf.mxu2 }
 0x26e   :  { %1836 = vst.msk [vmem:[%s4042_s3 + $0x1c0] sm:$0x3] %vm1835_vm2, %v1721_v63 }

// kernel: siamese_forward.4
= control target key start
LH: loop header
LB: loop body
LE: loop exit
PB: predicated region body
PF: predicated region fallthrough
CT: control target
= control target key end

     0   :  { %vm398_vm0 = vcmask 257024   ;;  %s885_s1 = inlined_call_operand.vmem [shape: bf16[256,32], index: 1, kind: input, shape index: {}]   ;;  %s886_s2 = inlined_call_operand.vmem [shape: f32[1,32], index: 2, kind: input, shape index: {}]   ;;  %s887_s0 = inlined_call_operand.vmem [shape: bf16[144,256], index: 0, kind: input, shape index: {}]   ;;  %s888_s3 = inlined_call_operand.vmem [shape: bf16[144,32], index: 3, kind: output, shape index: {}]  }
   0x1   :  { %v582_v0 = vld [vmem:[%s885_s1 + $0x38] sm:$0xff]  ;;  %v581_v2 = vld [vmem:[%s885_s1 + $0x30] sm:$0xff]  ;;  %v580_v4 = vld [vmem:[%s885_s1 + $0x28] sm:$0xff] }
   0x2   :  { %v590_v1 = vld [vmem:[%s885_s1 + $0x78] sm:$0xff]  ;;  %254 = vmatpush.bf16.msra.mxu0 %v582_v0  ;;  %591 = vmatpush.bf16.msra.mxu2 %v582_v0  ;;  %v589_v3 = vld [vmem:[%s885_s1 + $0x70] sm:$0xff]  ;;  %v588_v5 = vld [vmem:[%s885_s1 + $0x68] sm:$0xff] }
   0x3   :  { %308 = vmatpush.bf16.msra.mxu1 %v590_v1  ;;  %599 = vmatpush.bf16.msra.mxu3 %v590_v1  ;;  %v579_v6 = vld [vmem:[%s885_s1 + $0x20] sm:$0xff]  ;;  %v578_v8 = vld [vmem:[%s885_s1 + $0x18] sm:$0xff]  ;;  %v577_v10 = vld [vmem:[%s885_s1 + $0x10] sm:$0xff] }
   0x4   :  { %v587_v7 = vld [vmem:[%s885_s1 + $0x60] sm:$0xff]  ;;  %v586_v9 = vld [vmem:[%s885_s1 + $0x58] sm:$0xff]  ;;  %v585_v11 = vld [vmem:[%s885_s1 + $0x50] sm:$0xff] }
   0x5   :  { %v576_v12 = vld [vmem:[%s885_s1 + $0x8] sm:$0xff]  ;;  %v575_v14 = vld [vmem:[%s885_s1] sm:$0xff]  ;;  %v567_v22 = vld [vmem:[%s887_s0 + $0x54] sm:$0xf] }
   0x6   :  { %255 = vmatpush.bf16.msra.mxu0 %v581_v2  ;;  %592 = vmatpush.bf16.msra.mxu2 %v581_v2  ;;  %v584_v13 = vld [vmem:[%s885_s1 + $0x48] sm:$0xff]  ;;  %v583_v15 = vld [vmem:[%s885_s1 + $0x40] sm:$0xff]  ;;  %v465_v23 = vld [vmem:[%s887_s0 + $0x58] sm:$0xf0] }
   0x7   :  { %309 = vmatpush.bf16.msra.mxu1 %v589_v3  ;;  %600 = vmatpush.bf16.msra.mxu3 %v589_v3  ;;  %v423_v16 = vld [vmem:[%s887_s0] sm:$0xf]  ;;  %v558_v17 = vld [vmem:[%s887_s0 + $0x4] sm:$0xf0]  ;;  %v557_v20 = vld [vmem:[%s887_s0 + $0x4] sm:$0xf]  ;;  %v468_v27 = vor.u32 %v567_v22, %v465_v23 }
   0x8   :  { %v455_v18 = vld [vmem:[%s887_s0 + $0x40] sm:$0xf]  ;;  %v566_v19 = vld [vmem:[%s887_s0 + $0x44] sm:$0xf0]  ;;  %v425_v21 = vld [vmem:[%s887_s0 + $0x8] sm:$0xf0]  ;;  %v424_v24 = vor.u32 %v558_v17, %v423_v16 }
   0x9   :  { %v456_v25 = vor.u32 %v566_v19, %v455_v18  ;;  %v428_v26 = vor.u32 %v557_v20, %v425_v21  ;;  %v431_v28 = vld [vmem:[%s887_s0 + $0x10] sm:$0xf]  ;;  %v560_v29 = vld [vmem:[%s887_s0 + $0x14] sm:$0xf0]  ;;  %v559_v32 = vld [vmem:[%s887_s0 + $0x14] sm:$0xf] }
   0xa   :  { %256 = vmatpush.bf16.msra.mxu0 %v580_v4  ;;  %593 = vmatpush.bf16.msra.mxu2 %v580_v4  ;;  %v463_v30 = vld [vmem:[%s887_s0 + $0x50] sm:$0xf]  ;;  %v568_v31 = vld [vmem:[%s887_s0 + $0x54] sm:$0xf0]  ;;  %v433_v33 = vld [vmem:[%s887_s0 + $0x18] sm:$0xf0]  ;;  %v432_v36 = vor.u32 %v560_v29, %v431_v28 }
   0xb   :  { %310 = vmatpush.bf16.msra.mxu1 %v588_v5  ;;  %601 = vmatpush.bf16.msra.mxu3 %v588_v5  ;;  %v569_v34 = vld [vmem:[%s887_s0 + $0x64] sm:$0xf]  ;;  %v473_v35 = vld [vmem:[%s887_s0 + $0x68] sm:$0xf0]  ;;  %v464_v37 = vor.u32 %v568_v31, %v463_v30  ;;  %v436_v38 = vor.u32 %v559_v32, %v433_v33  ;;  %v439_v40 = vld [vmem:[%s887_s0 + $0x20] sm:$0xf] }
   0xc   :  { %v476_v39 = vor.u32 %v569_v34, %v473_v35  ;;  %v562_v41 = vld [vmem:[%s887_s0 + $0x24] sm:$0xf0]  ;;  %v471_v42 = vld [vmem:[%s887_s0 + $0x60] sm:$0xf]  ;;  %v561_v44 = vld [vmem:[%s887_s0 + $0x24] sm:$0xf] }
   0xd   :  { %v570_v43 = vld [vmem:[%s887_s0 + $0x64] sm:$0xf0]  ;;  %v441_v45 = vld [vmem:[%s887_s0 + $0x28] sm:$0xf0]  ;;  %v571_v46 = vld [vmem:[%s887_s0 + $0x74] sm:$0xf]  ;;  %v440_v48 = vor.u32 %v562_v41, %v439_v40 }
   0xe   :  { %257 = vmatpush.bf16.msra.mxu0 %v579_v6  ;;  %594 = vmatpush.bf16.msra.mxu2 %v579_v6  ;;  %v481_v47 = vld [vmem:[%s887_s0 + $0x78] sm:$0xf0]  ;;  %v472_v49 = vor.u32 %v570_v43, %v471_v42  ;;  %v444_v50 = vor.u32 %v561_v44, %v441_v45  ;;  %v447_v52 = vld [vmem:[%s887_s0 + $0x30] sm:$0xf]  ;;  %v564_v53 = vld [vmem:[%s887_s0 + $0x34] sm:$0xf0] }
   0xf   :  { %311 = vmatpush.bf16.msra.mxu1 %v587_v7  ;;  %602 = vmatpush.bf16.msra.mxu3 %v587_v7  ;;  %v484_v51 = vor.u32 %v571_v46, %v481_v47  ;;  %v479_v54 = vld [vmem:[%s887_s0 + $0x70] sm:$0xf]  ;;  %v572_v55 = vld [vmem:[%s887_s0 + $0x74] sm:$0xf0]  ;;  %v563_v56 = vld [vmem:[%s887_s0 + $0x34] sm:$0xf]  ;;  %v448_v60 = vor.u32 %v564_v53, %v447_v52 }
  0x10   :  { %v449_v57 = vld [vmem:[%s887_s0 + $0x38] sm:$0xf0]  ;;  %v573_v58 = vld [vmem:[%s887_s0 + $0x84] sm:$0xf]  ;;  %v489_v59 = vld [vmem:[%s887_s0 + $0x88] sm:$0xf0]  ;;  %v480_v61 = vor.u32 %v572_v55, %v479_v54 }
  0x11   :  { %v452_v62 = vor.u32 %v563_v56, %v449_v57  ;;  %v492_v63 = vor.u32 %v573_v58, %v489_v59  ;;  %v487_v0 = vld [vmem:[%s887_s0 + $0x80] sm:$0xf]  ;;  %v574_v1 = vld [vmem:[%s887_s0 + $0x84] sm:$0xf0]  ;;  %v565_v2 = vld [vmem:[%s887_s0 + $0x44] sm:$0xf] }
  0x12   :  { %258 = vmatpush.bf16.msra.mxu0 %v578_v8  ;;  %595 = vmatpush.bf16.msra.mxu2 %v578_v8  ;;  %v457_v3 = vld [vmem:[%s887_s0 + $0x48] sm:$0xf0]  ;;  %v488_v4 = vor.u32 %v574_v1, %v487_v0  ;;  %v787_v6 = vld [vmem:[%s886_s2] ss:$0 sm:$0xff] }
  0x13   :  { %312 = vmatpush.bf16.msra.mxu1 %v586_v9  ;;  %603 = vmatpush.bf16.msra.mxu3 %v586_v9  ;;  %v460_v5 = vor.u32 %v565_v2, %v457_v3 }
  0x16   :  { %259 = vmatpush.bf16.msra.mxu0 %v577_v10  ;;  %596 = vmatpush.bf16.msra.mxu2 %v577_v10 }
  0x17   :  { %313 = vmatpush.bf16.msra.mxu1 %v585_v11  ;;  %604 = vmatpush.bf16.msra.mxu3 %v585_v11 }
  0x1a   :  { %260 = vmatpush.bf16.msra.mxu0 %v576_v12  ;;  %597 = vmatpush.bf16.msra.mxu2 %v576_v12 }
  0x1b   :  { %314 = vmatpush.bf16.msra.mxu1 %v584_v13  ;;  %605 = vmatpush.bf16.msra.mxu3 %v584_v13 }
  0x1e   :  { %261 = vmatpush.bf16.msra.mxu0 %v575_v14  ;;  %598 = vmatpush.bf16.msra.mxu2 %v575_v14 }
  0x1f   :  { %315 = vmatpush.bf16.msra.mxu1 %v583_v15  ;;  %606 = vmatpush.bf16.msra.mxu3 %v583_v15 }
  0x21   :  { %262 = vmatmul.bf16.vlgmr.msra.gmra.mxu0 %v424_v24  ;;  %282 = vmatmul.bf16.vlgmr.msra.gmra.mxu2 %v456_v25 }
  0x22   :  { %316 = vmatmul.bf16.vlgmr.msra.gmra.mxu1 %v428_v26  ;;  %341 = vmatmul.bf16.vlgmr.msra.gmra.mxu3 %v468_v27 }
  0x31   :  { %267 = vmatmul.bf16.gmra.mxu0 %v432_v36  ;;  %287 = vmatmul.bf16.gmra.mxu2 %v464_v37 }
  0x32   :  { %321 = vmatmul.bf16.gmra.mxu1 %v436_v38  ;;  %346 = vmatmul.bf16.gmra.mxu3 %v476_v39 }
  0x41   :  { %272 = vmatmul.bf16.gmra.mxu0 %v440_v48  ;;  %292 = vmatmul.bf16.gmra.mxu2 %v472_v49 }
  0x42   :  { %326 = vmatmul.bf16.gmra.mxu1 %v444_v50  ;;  %351 = vmatmul.bf16.gmra.mxu3 %v484_v51 }
  0x51   :  { %277 = vmatmul.bf16.gmra.mxu0 %v448_v60  ;;  %297 = vmatmul.bf16.gmra.mxu2 %v480_v61 }
  0x52   :  { %331 = vmatmul.bf16.gmra.mxu1 %v452_v62  ;;  %356 = vmatmul.bf16.gmra.mxu3 %v492_v63 }
  0x61   :  { %302 = vmatmul.bf16.gmra.mxu2 %v488_v4 }
  0x62   :  { %336 = vmatmul.bf16.gmra.mxu1 %v460_v5 }
  0x9e   :  { %v263_v7 = vpop.f32.mrf.mxu0 }
  0x9f   :  { %v264_v8 = vadd.f32 %v787_v6, %v263_v7  ;;  %v317_v9 = vpop.f32.mrf.mxu1 }
  0xa1   :  { %v318_v10 = vadd.f32 %v317_v9, %v264_v8 }
  0xa3   :  { %v362_v11 = vmax.f32 %v318_v10, 0.0 }
  0xa4   :  { %v790_v12 = vpop.f32.mrf.mxu2 }
  0xa5   :  { %v380_v13 = vpack.c.bf16 %v362_v11, %v362_v11  ;;  %v342_v17 = vpop.f32.mrf.mxu3 }
  0xa6   :  { %v265_v14 = vpop.f32.mrf.mxu0 }
  0xa7   :  { %399 = vst.msk [vmem:[%s888_s3] sm:$0xf] %vm398_vm0, %v380_v13  ;;  %v266_v15 = vadd.f32 %v787_v6, %v265_v14  ;;  %v319_v16 = vpop.f32.mrf.mxu1 }
  0xa9   :  { %v320_v18 = vadd.f32 %v319_v16, %v266_v15 }
  0xab   :  { %v363_v19 = vmax.f32 %v320_v18, 0.0 }
  0xac   :  { %v797_v20 = vpop.f32.mrf.mxu2 }
  0xad   :  { %v381_v21 = vpack.c.bf16 %v363_v19, %v363_v19  ;;  %v344_v26 = vpop.f32.mrf.mxu3 }
  0xae   :  { %v268_v22 = vpop.f32.mrf.mxu0 }
  0xaf   :  { %400 = vst.msk [vmem:[%s888_s3 + $0x4] sm:$0xf] %vm398_vm0, %v381_v21  ;;  %v269_v23 = vadd.f32 %v787_v6, %v268_v22  ;;  %v322_v24 = vpop.f32.mrf.mxu1 }
  0xb1   :  { %v323_v25 = vadd.f32 %v322_v24, %v269_v23 }
  0xb3   :  { %v364_v27 = vmax.f32 %v323_v25, 0.0 }
  0xb4   :  { %v288_v28 = vpop.f32.mrf.mxu2 }
  0xb5   :  { %v382_v29 = vpack.c.bf16 %v364_v27, %v364_v27  ;;  %v289_v30 = vadd.f32 %v787_v6, %v288_v28  ;;  %v347_v40 = vpop.f32.mrf.mxu3 }
  0xb6   :  { %v270_v31 = vpop.f32.mrf.mxu0 }
  0xb7   :  { %401 = vst.msk [vmem:[%s888_s3 + $0x8] sm:$0xf] %vm398_vm0, %v382_v29  ;;  %v343_v32 = vadd.f32 %v342_v17, %v289_v30  ;;  %v271_v33 = vadd.f32 %v787_v6, %v270_v31  ;;  %v324_v34 = vpop.f32.mrf.mxu1  ;;  %v284_v29 = vadd.f32 %v787_v6, %v790_v12 }
  0xb9   :  { %v372_v35 = vmax.f32 %v343_v32, 0.0  ;;  %v325_v36 = vadd.f32 %v324_v34, %v271_v33 }
  0xbb   :  { %v390_v37 = vpack.c.bf16 %v372_v35, %v372_v35  ;;  %v365_v38 = vmax.f32 %v325_v36, 0.0 }
  0xbc   :  { %v290_v39 = vpop.f32.mrf.mxu2 }
  0xbd   :  { %409 = vst.msk [vmem:[%s888_s3 + $0x28] sm:$0xf] %vm398_vm0, %v390_v37  ;;  %v383_v41 = vpack.c.bf16 %v365_v38, %v365_v38  ;;  %v291_v42 = vadd.f32 %v787_v6, %v290_v39  ;;  %v349_v55 = vpop.f32.mrf.mxu3  ;;  %v286_v39 = vadd.f32 %v787_v6, %v797_v20 }
  0xbe   :  { %v273_v43 = vpop.f32.mrf.mxu0 }
  0xbf   :  { %402 = vst.msk [vmem:[%s888_s3 + $0xc] sm:$0xf] %vm398_vm0, %v383_v41  ;;  %v345_v44 = vadd.f32 %v344_v26, %v291_v42  ;;  %v274_v45 = vadd.f32 %v787_v6, %v273_v43  ;;  %v327_v46 = vpop.f32.mrf.mxu1 }
  0xc1   :  { %v373_v47 = vmax.f32 %v345_v44, 0.0  ;;  %v328_v48 = vadd.f32 %v327_v46, %v274_v45 }
  0xc3   :  { %v391_v49 = vpack.c.bf16 %v373_v47, %v373_v47  ;;  %v366_v50 = vmax.f32 %v328_v48, 0.0 }
  0xc4   :  { %v293_v51 = vpop.f32.mrf.mxu2 }
  0xc5   :  { %410 = vst.msk [vmem:[%s888_s3 + $0x2c] sm:$0xf] %vm398_vm0, %v391_v49  ;;  %v384_v52 = vpack.c.bf16 %v366_v50, %v366_v50  ;;  %v294_v53 = vadd.f32 %v787_v6, %v293_v51  ;;  %v352_v7 = vpop.f32.mrf.mxu3 }
  0xc6   :  { %v275_v54 = vpop.f32.mrf.mxu0 }
  0xc7   :  { %403 = vst.msk [vmem:[%s888_s3 + $0x10] sm:$0xf] %vm398_vm0, %v384_v52  ;;  %v348_v56 = vadd.f32 %v347_v40, %v294_v53  ;;  %v276_v57 = vadd.f32 %v787_v6, %v275_v54  ;;  %v329_v58 = vpop.f32.mrf.mxu1 }
  0xc9   :  { %v374_v59 = vmax.f32 %v348_v56, 0.0  ;;  %v330_v60 = vadd.f32 %v329_v58, %v276_v57 }
  0xcb   :  { %v392_v61 = vpack.c.bf16 %v374_v59, %v374_v59  ;;  %v367_v62 = vmax.f32 %v330_v60, 0.0 }
  0xcc   :  { %v295_v63 = vpop.f32.mrf.mxu2 }
  0xcd   :  { %411 = vst.msk [vmem:[%s888_s3 + $0x30] sm:$0xf] %vm398_vm0, %v392_v61  ;;  %v385_v0 = vpack.c.bf16 %v367_v62, %v367_v62  ;;  %v296_v1 = vadd.f32 %v787_v6, %v295_v63  ;;  %v354_v23 = vpop.f32.mrf.mxu3 }
  0xce   :  { %v278_v2 = vpop.f32.mrf.mxu0 }
  0xcf   :  { %404 = vst.msk [vmem:[%s888_s3 + $0x14] sm:$0xf] %vm398_vm0, %v385_v0  ;;  %v350_v3 = vadd.f32 %v349_v55, %v296_v1  ;;  %v279_v4 = vadd.f32 %v787_v6, %v278_v2  ;;  %v332_v5 = vpop.f32.mrf.mxu1 }
  0xd1   :  { %v375_v8 = vmax.f32 %v350_v3, 0.0  ;;  %v333_v9 = vadd.f32 %v332_v5, %v279_v4 }
  0xd3   :  { %v393_v10 = vpack.c.bf16 %v375_v8, %v375_v8  ;;  %v368_v11 = vmax.f32 %v333_v9, 0.0 }
  0xd4   :  { %v298_v13 = vpop.f32.mrf.mxu2 }
  0xd5   :  { %412 = vst.msk [vmem:[%s888_s3 + $0x34] sm:$0xf] %vm398_vm0, %v393_v10  ;;  %v386_v14 = vpack.c.bf16 %v368_v11, %v368_v11  ;;  %v299_v15 = vadd.f32 %v787_v6, %v298_v13  ;;  %v357_v37 = vpop.f32.mrf.mxu3 }
  0xd6   :  { %v280_v16 = vpop.f32.mrf.mxu0 }
  0xd7   :  { %405 = vst.msk [vmem:[%s888_s3 + $0x18] sm:$0xf] %vm398_vm0, %v386_v14  ;;  %v353_v17 = vadd.f32 %v352_v7, %v299_v15  ;;  %v281_v18 = vadd.f32 %v787_v6, %v280_v16  ;;  %v334_v19 = vpop.f32.mrf.mxu1 }
  0xd9   :  { %v376_v21 = vmax.f32 %v353_v17, 0.0  ;;  %v335_v22 = vadd.f32 %v334_v19, %v281_v18 }
  0xdb   :  { %v394_v24 = vpack.c.bf16 %v376_v21, %v376_v21  ;;  %v369_v25 = vmax.f32 %v335_v22, 0.0 }
  0xdc   :  { %v300_v26 = vpop.f32.mrf.mxu2 }
  0xdd   :  { %413 = vst.msk [vmem:[%s888_s3 + $0x38] sm:$0xf] %vm398_vm0, %v394_v24  ;;  %v387_v27 = vpack.c.bf16 %v369_v25, %v369_v25  ;;  %v301_v28 = vadd.f32 %v787_v6, %v300_v26  ;;  %v359_v48 = vpop.f32.mrf.mxu3 }
  0xdf   :  { %406 = vst.msk [vmem:[%s888_s3 + $0x1c] sm:$0xf] %vm398_vm0, %v387_v27  ;;  %v355_v30 = vadd.f32 %v354_v23, %v301_v28  ;;  %v337_v31 = vpop.f32.mrf.mxu1 }
  0xe0   :  { %v338_v32 = vadd.f32 %v337_v31, %v284_v29 }
  0xe1   :  { %v377_v33 = vmax.f32 %v355_v30, 0.0 }
  0xe2   :  { %v370_v34 = vmax.f32 %v338_v32, 0.0 }
  0xe3   :  { %v395_v35 = vpack.c.bf16 %v377_v33, %v377_v33 }
  0xe4   :  { %v388_v36 = vpack.c.bf16 %v370_v34, %v370_v34  ;;  %v303_v38 = vpop.f32.mrf.mxu2 }
  0xe5   :  { %414 = vst.msk [vmem:[%s888_s3 + $0x3c] sm:$0xf] %vm398_vm0, %v395_v35  ;;  %v304_v12 = vadd.f32 %v787_v6, %v303_v38 }
  0xe6   :  { %407 = vst.msk [vmem:[%s888_s3 + $0x20] sm:$0xf] %vm398_vm0, %v388_v36 }
  0xe7   :  { %v358_v40 = vadd.f32 %v357_v37, %v304_v12  ;;  %v339_v41 = vpop.f32.mrf.mxu1 }
  0xe8   :  { %v340_v42 = vadd.f32 %v339_v41, %v286_v39 }
  0xe9   :  { %v378_v43 = vmax.f32 %v358_v40, 0.0 }
  0xea   :  { %v371_v44 = vmax.f32 %v340_v42, 0.0 }
  0xeb   :  { %v396_v45 = vpack.c.bf16 %v378_v43, %v378_v43 }
  0xec   :  { %v389_v46 = vpack.c.bf16 %v371_v44, %v371_v44  ;;  %v305_v47 = vpop.f32.mrf.mxu2 }
  0xed   :  { %415 = vst.msk [vmem:[%s888_s3 + $0x40] sm:$0xf] %vm398_vm0, %v396_v45  ;;  %v306_v20 = vadd.f32 %v787_v6, %v305_v47 }
  0xee   :  { %408 = vst.msk [vmem:[%s888_s3 + $0x24] sm:$0xf] %vm398_vm0, %v389_v46 }
  0xef   :  { %v360_v49 = vadd.f32 %v359_v48, %v306_v20 }
  0xf1   :  { %v379_v50 = vmax.f32 %v360_v49, 0.0 }
  0xf3   :  { %v397_v51 = vpack.c.bf16 %v379_v50, %v379_v50 }
  0xf5   :  { %416 = vst.msk [vmem:[%s888_s3 + $0x44] sm:$0xf] %vm398_vm0, %v397_v51 }

// kernel: siamese_forward.5
= control target key start
LH: loop header
LB: loop body
LE: loop exit
PB: predicated region body
PF: predicated region fallthrough
CT: control target
= control target key end

     0   :  { %s5918_s0 = inlined_call_operand.vmem [shape: bf16[2,2304], index: 0, kind: input, shape index: {}]   ;;  %s5919_s1 = inlined_call_operand.vmem [shape: bf16[2304,256], index: 1, kind: input, shape index: {}]   ;;  %s5920_s2 = inlined_call_operand.vmem [shape: f32[1,256], index: 2, kind: input, shape index: {}]   ;;  %s5921_s3 = inlined_call_operand.vmem [shape: bf16[256,2], index: 3, kind: input, shape index: {}]   ;;  %s5922_s4 = inlined_call_operand.vmem [shape: f32[1,2], index: 4, kind: input, shape index: {}]   ;;  %s5923_s5 = inlined_call_operand.hbm [shape: f32[2,2], index: 5, kind: output, shape index: {}]  }
   0x1   :  { %v2506_v0 = vld [vmem:[%s5919_s1 + $0x70] sm:$0xf]  ;;  %v3679_v1 = vld [vmem:[%s5919_s1 + $0x74] sm:$0xf0]  ;;  %v2498_v11 = vld [vmem:[%s5919_s1 + $0x60] sm:$0xf] }
   0x2   :  { %v2570_v2 = vld [vmem:[%s5919_s1 + $0xf0] sm:$0xf]  ;;  %v2507_v3 = vor.u32 %v3679_v1, %v2506_v0  ;;  %v3695_v4 = vld [vmem:[%s5919_s1 + $0xf4] sm:$0xf0]  ;;  %v3677_v13 = vld [vmem:[%s5919_s1 + $0x64] sm:$0xf0] }
   0x3   :  { %v2634_v5 = vld [vmem:[%s5919_s1 + $0x170] sm:$0xf]  ;;  %v3711_v6 = vld [vmem:[%s5919_s1 + $0x174] sm:$0xf0]  ;;  %v2571_v7 = vor.u32 %v3695_v4, %v2570_v2  ;;  %v2562_v14 = vld [vmem:[%s5919_s1 + $0xe0] sm:$0xf]  ;;  %v2499_v16 = vor.u32 %v3677_v13, %v2498_v11 }
   0x4   :  { %v2635_v8 = vor.u32 %v3711_v6, %v2634_v5  ;;  %v2698_v9 = vld [vmem:[%s5919_s1 + $0x1f0] sm:$0xf]  ;;  %v3727_v10 = vld [vmem:[%s5919_s1 + $0x1f4] sm:$0xf0]  ;;  %1800 = vmatpush.bf16.msra.mxu0 %v2507_v3  ;;  %v3693_v15 = vld [vmem:[%s5919_s1 + $0xe4] sm:$0xf0] }
   0x5   :  { %v2699_v12 = vor.u32 %v3727_v10, %v2698_v9  ;;  %1813 = vmatpush.bf16.msra.mxu1 %v2571_v7  ;;  %v2563_v17 = vor.u32 %v3693_v15, %v2562_v14  ;;  %v2626_v18 = vld [vmem:[%s5919_s1 + $0x160] sm:$0xf]  ;;  %v3709_v19 = vld [vmem:[%s5919_s1 + $0x164] sm:$0xf0]  ;;  %v2490_v23 = vld [vmem:[%s5919_s1 + $0x50] sm:$0xf] }
   0x6   :  { %1826 = vmatpush.bf16.msra.mxu2 %v2635_v8  ;;  %v2690_v20 = vld [vmem:[%s5919_s1 + $0x1e0] sm:$0xf]  ;;  %v2627_v21 = vor.u32 %v3709_v19, %v2626_v18  ;;  %v3725_v22 = vld [vmem:[%s5919_s1 + $0x1e4] sm:$0xf0]  ;;  %v3675_v24 = vld [vmem:[%s5919_s1 + $0x54] sm:$0xf0] }
   0x7   :  { %1839 = vmatpush.bf16.msra.mxu3 %v2699_v12  ;;  %v2691_v25 = vor.u32 %v3725_v22, %v2690_v20  ;;  %v2554_v26 = vld [vmem:[%s5919_s1 + $0xd0] sm:$0xf]  ;;  %v3691_v27 = vld [vmem:[%s5919_s1 + $0xd4] sm:$0xf0]  ;;  %v2491_v29 = vor.u32 %v3675_v24, %v2490_v23  ;;  %v2482_v35 = vld [vmem:[%s5919_s1 + $0x40] sm:$0xf] }
   0x8   :  { %v2618_v28 = vld [vmem:[%s5919_s1 + $0x150] sm:$0xf]  ;;  %1801 = vmatpush.bf16.msra.mxu0 %v2499_v16  ;;  %v3707_v30 = vld [vmem:[%s5919_s1 + $0x154] sm:$0xf0]  ;;  %v2555_v33 = vor.u32 %v3691_v27, %v2554_v26  ;;  %v3673_v36 = vld [vmem:[%s5919_s1 + $0x44] sm:$0xf0] }
   0x9   :  { %v2682_v31 = vld [vmem:[%s5919_s1 + $0x1d0] sm:$0xf]  ;;  %v3723_v32 = vld [vmem:[%s5919_s1 + $0x1d4] sm:$0xf0]  ;;  %1814 = vmatpush.bf16.msra.mxu1 %v2563_v17  ;;  %v2619_v34 = vor.u32 %v3707_v30, %v2618_v28  ;;  %v2546_v37 = vld [vmem:[%s5919_s1 + $0xc0] sm:$0xf]  ;;  %v2483_v44 = vor.u32 %v3673_v36, %v2482_v35 }
   0xa   :  { %1827 = vmatpush.bf16.msra.mxu2 %v2627_v21  ;;  %v2683_v38 = vor.u32 %v3723_v32, %v2682_v31  ;;  %v3689_v39 = vld [vmem:[%s5919_s1 + $0xc4] sm:$0xf0]  ;;  %v2610_v40 = vld [vmem:[%s5919_s1 + $0x140] sm:$0xf]  ;;  %v2474_v47 = vld [vmem:[%s5919_s1 + $0x30] sm:$0xf] }
   0xb   :  { %1840 = vmatpush.bf16.msra.mxu3 %v2691_v25  ;;  %v3705_v41 = vld [vmem:[%s5919_s1 + $0x144] sm:$0xf0]  ;;  %v2674_v42 = vld [vmem:[%s5919_s1 + $0x1c0] sm:$0xf]  ;;  %v2547_v45 = vor.u32 %v3689_v39, %v2546_v37  ;;  %v3671_v48 = vld [vmem:[%s5919_s1 + $0x34] sm:$0xf0] }
   0xc   :  { %v3721_v43 = vld [vmem:[%s5919_s1 + $0x1c4] sm:$0xf0]  ;;  %1802 = vmatpush.bf16.msra.mxu0 %v2491_v29  ;;  %v2611_v46 = vor.u32 %v3705_v41, %v2610_v40  ;;  %v2538_v49 = vld [vmem:[%s5919_s1 + $0xb0] sm:$0xf]  ;;  %v3687_v51 = vld [vmem:[%s5919_s1 + $0xb4] sm:$0xf0]  ;;  %v2475_v56 = vor.u32 %v3671_v48, %v2474_v47 }
   0xd   :  { %1815 = vmatpush.bf16.msra.mxu1 %v2555_v33  ;;  %v2675_v50 = vor.u32 %v3721_v43, %v2674_v42  ;;  %v2602_v52 = vld [vmem:[%s5919_s1 + $0x130] sm:$0xf]  ;;  %v3703_v53 = vld [vmem:[%s5919_s1 + $0x134] sm:$0xf0]  ;;  %v2539_v57 = vor.u32 %v3687_v51, %v2538_v49  ;;  %v2466_v59 = vld [vmem:[%s5919_s1 + $0x20] sm:$0xf] }
   0xe   :  { %1828 = vmatpush.bf16.msra.mxu2 %v2619_v34  ;;  %v2666_v54 = vld [vmem:[%s5919_s1 + $0x1b0] sm:$0xf]  ;;  %v3719_v55 = vld [vmem:[%s5919_s1 + $0x1b4] sm:$0xf0]  ;;  %v2603_v58 = vor.u32 %v3703_v53, %v2602_v52  ;;  %v3669_v60 = vld [vmem:[%s5919_s1 + $0x24] sm:$0xf0] }
   0xf   :  { %1841 = vmatpush.bf16.msra.mxu3 %v2683_v38  ;;  %v2530_v61 = vld [vmem:[%s5919_s1 + $0xa0] sm:$0xf]  ;;  %v2667_v62 = vor.u32 %v3719_v55, %v2666_v54  ;;  %v3685_v63 = vld [vmem:[%s5919_s1 + $0xa4] sm:$0xf0]  ;;  %v2467_v4 = vor.u32 %v3669_v60, %v2466_v59  ;;  %v2458_v7 = vld [vmem:[%s5919_s1 + $0x10] sm:$0xf] }
  0x10   :  { %1803 = vmatpush.bf16.msra.mxu0 %v2483_v44  ;;  %v2594_v0 = vld [vmem:[%s5919_s1 + $0x120] sm:$0xf]  ;;  %v3701_v1 = vld [vmem:[%s5919_s1 + $0x124] sm:$0xf0]  ;;  %v2531_v5 = vor.u32 %v3685_v63, %v2530_v61  ;;  %v3667_v8 = vld [vmem:[%s5919_s1 + $0x14] sm:$0xf0] }
  0x11   :  { %1816 = vmatpush.bf16.msra.mxu1 %v2547_v45  ;;  %v2658_v2 = vld [vmem:[%s5919_s1 + $0x1a0] sm:$0xf]  ;;  %v3717_v3 = vld [vmem:[%s5919_s1 + $0x1a4] sm:$0xf0]  ;;  %v2595_v6 = vor.u32 %v3701_v1, %v2594_v0  ;;  %v2522_v9 = vld [vmem:[%s5919_s1 + $0x90] sm:$0xf]  ;;  %v2459_v16 = vor.u32 %v3667_v8, %v2458_v7 }
  0x12   :  { %1829 = vmatpush.bf16.msra.mxu2 %v2611_v46  ;;  %v2659_v10 = vor.u32 %v3717_v3, %v2658_v2  ;;  %v3683_v11 = vld [vmem:[%s5919_s1 + $0x94] sm:$0xf0]  ;;  %v2586_v12 = vld [vmem:[%s5919_s1 + $0x110] sm:$0xf]  ;;  %v2450_v17 = vld [vmem:[%s5919_s1] sm:$0xf] }
  0x13   :  { %1842 = vmatpush.bf16.msra.mxu3 %v2675_v50  ;;  %v3699_v13 = vld [vmem:[%s5919_s1 + $0x114] sm:$0xf0]  ;;  %v2650_v14 = vld [vmem:[%s5919_s1 + $0x190] sm:$0xf]  ;;  %v3665_v18 = vld [vmem:[%s5919_s1 + $0x4] sm:$0xf0]  ;;  %v2523_v19 = vor.u32 %v3683_v11, %v2522_v9 }
  0x14   :  { %1804 = vmatpush.bf16.msra.mxu0 %v2475_v56  ;;  %v3715_v15 = vld [vmem:[%s5919_s1 + $0x194] sm:$0xf0]  ;;  %v2587_v20 = vor.u32 %v3699_v13, %v2586_v12  ;;  %v2514_v21 = vld [vmem:[%s5919_s1 + $0x80] sm:$0xf]  ;;  %v3681_v22 = vld [vmem:[%s5919_s1 + $0x84] sm:$0xf0]  ;;  %v2451_v31 = vor.u32 %v3665_v18, %v2450_v17 }
  0x15   :  { %1817 = vmatpush.bf16.msra.mxu1 %v2539_v57  ;;  %v2578_v23 = vld [vmem:[%s5919_s1 + $0x100] sm:$0xf]  ;;  %v2651_v24 = vor.u32 %v3715_v15, %v2650_v14  ;;  %v3697_v25 = vld [vmem:[%s5919_s1 + $0x104] sm:$0xf0]  ;;  %v2762_v28 = vld [vmem:[%s5919_s1 + $0x270] sm:$0xf]  ;;  %v2515_v35 = vor.u32 %v3681_v22, %v2514_v21 }
  0x16   :  { %1830 = vmatpush.bf16.msra.mxu2 %v2603_v58  ;;  %v2642_v26 = vld [vmem:[%s5919_s1 + $0x180] sm:$0xf]  ;;  %v3713_v27 = vld [vmem:[%s5919_s1 + $0x184] sm:$0xf0]  ;;  %v3743_v29 = vld [vmem:[%s5919_s1 + $0x274] sm:$0xf0]  ;;  %v2579_v36 = vor.u32 %v3697_v25, %v2578_v23 }
  0x17   :  { %1843 = vmatpush.bf16.msra.mxu3 %v2667_v62  ;;  %v2826_v30 = vld [vmem:[%s5919_s1 + $0x2f0] sm:$0xf]  ;;  %v3759_v32 = vld [vmem:[%s5919_s1 + $0x2f4] sm:$0xf0]  ;;  %v2643_v39 = vor.u32 %v3713_v27, %v2642_v26  ;;  %v2763_v40 = vor.u32 %v3743_v29, %v2762_v28  ;;  %v2754_v43 = vld [vmem:[%s5919_s1 + $0x260] sm:$0xf] }
  0x18   :  { %1805 = vmatpush.bf16.msra.mxu0 %v2467_v4  ;;  %v2890_v33 = vld [vmem:[%s5919_s1 + $0x370] sm:$0xf]  ;;  %v3775_v34 = vld [vmem:[%s5919_s1 + $0x374] sm:$0xf0]  ;;  %v2827_v41 = vor.u32 %v3759_v32, %v2826_v30  ;;  %v3741_v44 = vld [vmem:[%s5919_s1 + $0x264] sm:$0xf0] }
  0x19   :  { %1818 = vmatpush.bf16.msra.mxu1 %v2531_v5  ;;  %v2954_v37 = vld [vmem:[%s5919_s1 + $0x3f0] sm:$0xf]  ;;  %v3791_v38 = vld [vmem:[%s5919_s1 + $0x3f4] sm:$0xf0]  ;;  %v2891_v42 = vor.u32 %v3775_v34, %v2890_v33  ;;  %v2818_v45 = vld [vmem:[%s5919_s1 + $0x2e0] sm:$0xf]  ;;  %v2755_v52 = vor.u32 %v3741_v44, %v2754_v43 }
  0x1a   :  { %1831 = vmatpush.bf16.msra.mxu2 %v2595_v6  ;;  %v2955_v46 = vor.u32 %v3791_v38, %v2954_v37  ;;  %v3757_v47 = vld [vmem:[%s5919_s1 + $0x2e4] sm:$0xf0]  ;;  %v2882_v48 = vld [vmem:[%s5919_s1 + $0x360] sm:$0xf]  ;;  %v2746_v55 = vld [vmem:[%s5919_s1 + $0x250] sm:$0xf] }
  0x1b   :  { %1844 = vmatpush.bf16.msra.mxu3 %v2659_v10  ;;  %v3773_v49 = vld [vmem:[%s5919_s1 + $0x364] sm:$0xf0]  ;;  %v2946_v50 = vld [vmem:[%s5919_s1 + $0x3e0] sm:$0xf]  ;;  %v2819_v53 = vor.u32 %v3757_v47, %v2818_v45  ;;  %v3739_v56 = vld [vmem:[%s5919_s1 + $0x254] sm:$0xf0] }
  0x1c   :  { %1806 = vmatpush.bf16.msra.mxu0 %v2459_v16  ;;  %v3789_v51 = vld [vmem:[%s5919_s1 + $0x3e4] sm:$0xf0]  ;;  %v2883_v54 = vor.u32 %v3773_v49, %v2882_v48  ;;  %v2810_v57 = vld [vmem:[%s5919_s1 + $0x2d0] sm:$0xf]  ;;  %v3755_v59 = vld [vmem:[%s5919_s1 + $0x2d4] sm:$0xf0]  ;;  %v2747_v0 = vor.u32 %v3739_v56, %v2746_v55 }
  0x1d   :  { %1819 = vmatpush.bf16.msra.mxu1 %v2523_v19  ;;  %v2947_v58 = vor.u32 %v3789_v51, %v2946_v50  ;;  %v2874_v60 = vld [vmem:[%s5919_s1 + $0x350] sm:$0xf]  ;;  %v3771_v61 = vld [vmem:[%s5919_s1 + $0x354] sm:$0xf0]  ;;  %v2738_v1 = vld [vmem:[%s5919_s1 + $0x240] sm:$0xf]  ;;  %v2811_v3 = vor.u32 %v3755_v59, %v2810_v57 }
  0x1e   :  { %1832 = vmatpush.bf16.msra.mxu2 %v2587_v20  ;;  %v2938_v62 = vld [vmem:[%s5919_s1 + $0x3d0] sm:$0xf]  ;;  %v3787_v63 = vld [vmem:[%s5919_s1 + $0x3d4] sm:$0xf0]  ;;  %v21_v2 = vld [vmem:[%s5918_s0] sm:$0xff]  ;;  %v2875_v4 = vor.u32 %v3771_v61, %v2874_v60 }
  0x1f   :  { %1845 = vmatpush.bf16.msra.mxu3 %v2651_v24  ;;  %v3737_v5 = vld [vmem:[%s5919_s1 + $0x244] sm:$0xf0]  ;;  %v2802_v6 = vld [vmem:[%s5919_s1 + $0x2c0] sm:$0xf]  ;;  %319 = vst [vmem:[#allocation1] ss:$9 sm:$0xff] %v21_v2  ;;  %v2939_v7 = vor.u32 %v3787_v63, %v2938_v62 }
  0x20   :  { %1807 = vmatpush.bf16.msra.mxu0 %v2451_v31  ;;  %v3753_v8 = vld [vmem:[%s5919_s1 + $0x2c4] sm:$0xf0]  ;;  %v2866_v9 = vld [vmem:[%s5919_s1 + $0x340] sm:$0xf]  ;;  %v2739_v13 = vor.u32 %v3737_v5, %v2738_v1  ;;  %v2730_v16 = vld [vmem:[%s5919_s1 + $0x230] sm:$0xf] }
  0x21   :  { %1820 = vmatpush.bf16.msra.mxu1 %v2515_v35  ;;  %v3769_v10 = vld [vmem:[%s5919_s1 + $0x344] sm:$0xf0]  ;;  %v2930_v11 = vld [vmem:[%s5919_s1 + $0x3c0] sm:$0xf]  ;;  %v2803_v14 = vor.u32 %v3753_v8, %v2802_v6  ;;  %v3735_v17 = vld [vmem:[%s5919_s1 + $0x234] sm:$0xf0] }
  0x22   :  { %1833 = vmatpush.bf16.msra.mxu2 %v2579_v36  ;;  %v3785_v12 = vld [vmem:[%s5919_s1 + $0x3c4] sm:$0xf0]  ;;  %v2867_v15 = vor.u32 %v3769_v10, %v2866_v9  ;;  %v2794_v18 = vld [vmem:[%s5919_s1 + $0x2b0] sm:$0xf]  ;;  %v3751_v20 = vld [vmem:[%s5919_s1 + $0x2b4] sm:$0xf0]  ;;  %v2731_v26 = vor.u32 %v3735_v17, %v2730_v16 }
  0x23   :  { %1846 = vmatpush.bf16.msra.mxu3 %v2643_v39  ;;  %v2931_v19 = vor.u32 %v3785_v12, %v2930_v11  ;;  %v2858_v21 = vld [vmem:[%s5919_s1 + $0x330] sm:$0xf]  ;;  %v3767_v22 = vld [vmem:[%s5919_s1 + $0x334] sm:$0xf0]  ;;  %v2722_v25 = vld [vmem:[%s5919_s1 + $0x220] sm:$0xf]  ;;  %v2795_v30 = vor.u32 %v3751_v20, %v2794_v18 }
  0x24   :  { %1852 = vmatpush.bf16.msrb.mxu0 %v2763_v40  ;;  %v2922_v23 = vld [vmem:[%s5919_s1 + $0x3b0] sm:$0xf]  ;;  %v3783_v24 = vld [vmem:[%s5919_s1 + $0x3b4] sm:$0xf0]  ;;  %v2859_v31 = vor.u32 %v3767_v22, %v2858_v21  ;;  %v3733_v32 = vld [vmem:[%s5919_s1 + $0x224] sm:$0xf0] }
  0x25   :  { %1865 = vmatpush.bf16.msrb.mxu1 %v2827_v41  ;;  %v2786_v33 = vld [vmem:[%s5919_s1 + $0x2a0] sm:$0xf]  ;;  %v2923_v35 = vor.u32 %v3783_v24, %v2922_v23  ;;  %v3749_v36 = vld [vmem:[%s5919_s1 + $0x2a4] sm:$0xf0]  ;;  %v2723_v41 = vor.u32 %v3733_v32, %v2722_v25  ;;  %v3731_v45 = vld [vmem:[%s5919_s1 + $0x214] sm:$0xf0] }
  0x26   :  { %1878 = vmatpush.bf16.msrb.mxu2 %v2891_v42  ;;  %v4347_v27 = vld [vmem:[#allocation1 + $0x12] sm:$0xff]  ;;  %v4349_v28 = vld [vmem:[#allocation1] sm:$0xff]  ;;  %v4359_v34 = vld [vmem:[#allocation1 + $0x9] sm:$0xff]  ;;  %v2787_v43 = vor.u32 %v3749_v36, %v2786_v33 }
  0x27   :  { %1891 = vmatpush.bf16.msrb.mxu3 %v2955_v46  ;;  %v4351_v29 = vld [vmem:[#allocation1 + $0x1b] sm:$0xff]  ;;  %v3765_v38 = vld [vmem:[%s5919_s1 + $0x324] sm:$0xf0]  ;;  %1834 = vmatmul.bf16.vlgmr.msra.gmra.mxu2 %v4347_v27  ;;  %v2714_v42 = vld [vmem:[%s5919_s1 + $0x210] sm:$0xf] }
  0x28   :  { %1853 = vmatpush.bf16.msrb.mxu0 %v2755_v52  ;;  %v2850_v37 = vld [vmem:[%s5919_s1 + $0x320] sm:$0xf]  ;;  %v3781_v40 = vld [vmem:[%s5919_s1 + $0x3a4] sm:$0xf0]  ;;  %1847 = vmatmul.bf16.vlgmr.msra.gmra.mxu3 %v4351_v29  ;;  %v2778_v46 = vld [vmem:[%s5919_s1 + $0x290] sm:$0xf]  ;;  %v2715_v55 = vor.u32 %v3731_v45, %v2714_v42 }
  0x29   :  { %1866 = vmatpush.bf16.msrb.mxu1 %v2819_v53  ;;  %v2914_v39 = vld [vmem:[%s5919_s1 + $0x3a0] sm:$0xf]  ;;  %1808 = vmatmul.bf16.vlgmr.msra.gmra.mxu0 %v4349_v28  ;;  %v2851_v44 = vor.u32 %v3765_v38, %v2850_v37  ;;  %v3747_v47 = vld [vmem:[%s5919_s1 + $0x294] sm:$0xf0]  ;;  %v2842_v49 = vld [vmem:[%s5919_s1 + $0x310] sm:$0xf] }
  0x2a   :  { %1879 = vmatpush.bf16.msrb.mxu2 %v2883_v54  ;;  %1821 = vmatmul.bf16.vlgmr.msra.gmra.mxu1 %v4359_v34  ;;  %v2915_v48 = vor.u32 %v3781_v40, %v2914_v39  ;;  %v3763_v50 = vld [vmem:[%s5919_s1 + $0x314] sm:$0xf0]  ;;  %v2906_v51 = vld [vmem:[%s5919_s1 + $0x390] sm:$0xf]  ;;  %v2706_v53 = vld [vmem:[%s5919_s1 + $0x200] sm:$0xf]  ;;  %v2779_v62 = vor.u32 %v3747_v47, %v2778_v46 }
  0x2b   :  { %1892 = vmatpush.bf16.msrb.mxu3 %v2947_v58  ;;  %v3779_v52 = vld [vmem:[%s5919_s1 + $0x394] sm:$0xf0]  ;;  %v3729_v54 = vld [vmem:[%s5919_s1 + $0x204] sm:$0xf0]  ;;  %v2770_v56 = vld [vmem:[%s5919_s1 + $0x280] sm:$0xf]  ;;  %v2843_v63 = vor.u32 %v3763_v50, %v2842_v49 }
  0x2c   :  { %1854 = vmatpush.bf16.msrb.mxu0 %v2747_v0  ;;  %v3745_v57 = vld [vmem:[%s5919_s1 + $0x284] sm:$0xf0]  ;;  %v2834_v58 = vld [vmem:[%s5919_s1 + $0x300] sm:$0xf]  ;;  %v4422_v60 = vld [vmem:[#allocation1 + $0x36] sm:$0xff]  ;;  %v2707_v9 = vor.u32 %v3729_v54, %v2706_v53 }
  0x2d   :  { %1867 = vmatpush.bf16.msrb.mxu1 %v2811_v3  ;;  %v3761_v59 = vld [vmem:[%s5919_s1 + $0x304] sm:$0xf0]  ;;  %v4429_v1 = vld [vmem:[#allocation1 + $0x3f] sm:$0xff]  ;;  %v4431_v2 = vld [vmem:[#allocation1 + $0x2d] sm:$0xff]  ;;  %v2907_v3 = vor.u32 %v3779_v52, %v2906_v51 }
  0x2e   :  { %1880 = vmatpush.bf16.msrb.mxu2 %v2875_v4  ;;  %v22_v61 = vld [vmem:[%s5918_s0 + $0x8] sm:$0xff]  ;;  %v2898_v4 = vld [vmem:[%s5919_s1 + $0x380] sm:$0xf]  ;;  %v3018_v6 = vld [vmem:[%s5919_s1 + $0x470] sm:$0xf] }
  0x2f   :  { %1893 = vmatpush.bf16.msrb.mxu3 %v2939_v7  ;;  %v4427_v0 = vld [vmem:[#allocation1 + $0x24] sm:$0xff]  ;;  %v3807_v7 = vld [vmem:[%s5919_s1 + $0x474] sm:$0xf0]  ;;  %v3082_v8 = vld [vmem:[%s5919_s1 + $0x4f0] sm:$0xf] }
  0x30   :  { %1855 = vmatpush.bf16.msrb.mxu0 %v2739_v13  ;;  %v3777_v5 = vld [vmem:[%s5919_s1 + $0x384] sm:$0xf0]  ;;  %329 = vst [vmem:[#allocation1] ss:$9 sm:$0xff] %v22_v61  ;;  %v3823_v10 = vld [vmem:[%s5919_s1 + $0x4f4] sm:$0xf0]  ;;  %v2771_v13 = vor.u32 %v3745_v57, %v2770_v56  ;;  %v3019_v18 = vor.u32 %v3807_v7, %v3018_v6 }
  0x31   :  { %1868 = vmatpush.bf16.msrb.mxu1 %v2803_v14  ;;  %v3146_v11 = vld [vmem:[%s5919_s1 + $0x570] sm:$0xf]  ;;  %v3839_v12 = vld [vmem:[%s5919_s1 + $0x574] sm:$0xf0]  ;;  %v2835_v14 = vor.u32 %v3761_v59, %v2834_v58  ;;  %v2899_v17 = vor.u32 %v3777_v5, %v2898_v4  ;;  %v3010_v21 = vld [vmem:[%s5919_s1 + $0x460] sm:$0xf] }
  0x32   :  { %1881 = vmatpush.bf16.msrb.mxu2 %v2867_v15  ;;  %v3210_v15 = vld [vmem:[%s5919_s1 + $0x5f0] sm:$0xf]  ;;  %v3855_v16 = vld [vmem:[%s5919_s1 + $0x5f4] sm:$0xf0]  ;;  %v3147_v20 = vor.u32 %v3839_v12, %v3146_v11  ;;  %v3805_v22 = vld [vmem:[%s5919_s1 + $0x464] sm:$0xf0] }
  0x33   :  { %1894 = vmatpush.bf16.msrb.mxu3 %v2931_v19  ;;  %v3083_v19 = vor.u32 %v3823_v10, %v3082_v8  ;;  %v3074_v23 = vld [vmem:[%s5919_s1 + $0x4e0] sm:$0xf]  ;;  %v3211_v24 = vor.u32 %v3855_v16, %v3210_v15  ;;  %v3821_v25 = vld [vmem:[%s5919_s1 + $0x4e4] sm:$0xf0]  ;;  %v3011_v33 = vor.u32 %v3805_v22, %v3010_v21  ;;  %v3002_v37 = vld [vmem:[%s5919_s1 + $0x450] sm:$0xf] }
  0x34   :  { %1856 = vmatpush.bf16.msrb.mxu0 %v2731_v26  ;;  %v3138_v26 = vld [vmem:[%s5919_s1 + $0x560] sm:$0xf]  ;;  %v3853_v32 = vld [vmem:[%s5919_s1 + $0x5e4] sm:$0xf0]  ;;  %v3803_v38 = vld [vmem:[%s5919_s1 + $0x454] sm:$0xf0] }
  0x35   :  { %1869 = vmatpush.bf16.msrb.mxu1 %v2795_v30  ;;  %v3837_v30 = vld [vmem:[%s5919_s1 + $0x564] sm:$0xf0]  ;;  %v3066_v39 = vld [vmem:[%s5919_s1 + $0x4d0] sm:$0xf]  ;;  %v3851_v45 = vld [vmem:[%s5919_s1 + $0x5d4] sm:$0xf0]  ;;  %v3003_v46 = vor.u32 %v3803_v38, %v3002_v37 }
  0x36   :  { %1882 = vmatpush.bf16.msrb.mxu2 %v2859_v31  ;;  %v3202_v31 = vld [vmem:[%s5919_s1 + $0x5e0] sm:$0xf]  ;;  %v3139_v36 = vor.u32 %v3837_v30, %v3138_v26  ;;  %v3130_v42 = vld [vmem:[%s5919_s1 + $0x550] sm:$0xf]  ;;  %v3801_v50 = vld [vmem:[%s5919_s1 + $0x444] sm:$0xf0] }
  0x37   :  { %1895 = vmatpush.bf16.msrb.mxu3 %v2923_v35  ;;  %v3075_v35 = vor.u32 %v3821_v25, %v3074_v23  ;;  %v3203_v40 = vor.u32 %v3853_v32, %v3202_v31  ;;  %v2994_v49 = vld [vmem:[%s5919_s1 + $0x440] sm:$0xf]  ;;  %v3817_v53 = vld [vmem:[%s5919_s1 + $0x4c4] sm:$0xf0]  ;;  %v3815_v5 = vld [vmem:[%s5919_s1 + $0x4b4] sm:$0xf0] }
  0x38   :  { %1857 = vmatpush.bf16.msrb.mxu0 %v2723_v41  ;;  %v3819_v41 = vld [vmem:[%s5919_s1 + $0x4d4] sm:$0xf0]  ;;  %v3058_v51 = vld [vmem:[%s5919_s1 + $0x4c0] sm:$0xf]  ;;  %v3849_v57 = vld [vmem:[%s5919_s1 + $0x5c4] sm:$0xf0]  ;;  %v2995_v58 = vor.u32 %v3801_v50, %v2994_v49 }
  0x39   :  { %1870 = vmatpush.bf16.msrb.mxu1 %v2787_v43  ;;  %v3835_v43 = vld [vmem:[%s5919_s1 + $0x554] sm:$0xf0]  ;;  %v3067_v47 = vor.u32 %v3819_v41, %v3066_v39  ;;  %v3122_v54 = vld [vmem:[%s5919_s1 + $0x540] sm:$0xf]  ;;  %v3059_v59 = vor.u32 %v3817_v53, %v3058_v51  ;;  %v3114_v6 = vld [vmem:[%s5919_s1 + $0x530] sm:$0xf] }
  0x3a   :  { %1883 = vmatpush.bf16.msrb.mxu2 %v2851_v44  ;;  %v3194_v44 = vld [vmem:[%s5919_s1 + $0x5d0] sm:$0xf]  ;;  %v3186_v56 = vld [vmem:[%s5919_s1 + $0x5c0] sm:$0xf]  ;;  %v3831_v7 = vld [vmem:[%s5919_s1 + $0x534] sm:$0xf0] }
  0x3b   :  { %1896 = vmatpush.bf16.msrb.mxu3 %v2915_v48  ;;  %v3131_v48 = vor.u32 %v3835_v43, %v3130_v42  ;;  %v3195_v52 = vor.u32 %v3851_v45, %v3194_v44  ;;  %v3187_v4 = vor.u32 %v3849_v57, %v3186_v56  ;;  %v3178_v8 = vld [vmem:[%s5919_s1 + $0x5b0] sm:$0xf]  ;;  %v3115_v12 = vor.u32 %v3831_v7, %v3114_v6  ;;  %v3042_v15 = vld [vmem:[%s5919_s1 + $0x4a0] sm:$0xf]  ;;  %v3845_v21 = vld [vmem:[%s5919_s1 + $0x5a4] sm:$0xf0] }
  0x3c   :  { %1858 = vmatpush.bf16.msrb.mxu0 %v2715_v55  ;;  %v3833_v55 = vld [vmem:[%s5919_s1 + $0x544] sm:$0xf0]  ;;  %v2970_v25 = vld [vmem:[%s5919_s1 + $0x410] sm:$0xf]  ;;  %v3795_v26 = vld [vmem:[%s5919_s1 + $0x414] sm:$0xf0] }
  0x3d   :  { %1871 = vmatpush.bf16.msrb.mxu1 %v2779_v62  ;;  %v3123_v61 = vor.u32 %v3833_v55, %v3122_v54  ;;  %v2986_v62 = vld [vmem:[%s5919_s1 + $0x430] sm:$0xf]  ;;  %v3811_v32 = vld [vmem:[%s5919_s1 + $0x494] sm:$0xf0]  ;;  %v2971_v38 = vor.u32 %v3795_v26, %v2970_v25  ;;  %v2962_v39 = vld [vmem:[%s5919_s1 + $0x400] sm:$0xf] }
  0x3e   :  { %1884 = vmatpush.bf16.msrb.mxu2 %v2843_v63  ;;  %v3799_v63 = vld [vmem:[%s5919_s1 + $0x434] sm:$0xf0]  ;;  %v3034_v30 = vld [vmem:[%s5919_s1 + $0x490] sm:$0xf]  ;;  %v3026_v43 = vld [vmem:[%s5919_s1 + $0x480] sm:$0xf] }
  0x3f   :  { %1897 = vmatpush.bf16.msrb.mxu3 %v2907_v3  ;;  %v3050_v3 = vld [vmem:[%s5919_s1 + $0x4b0] sm:$0xf]  ;;  %v2987_v10 = vor.u32 %v3799_v63, %v2986_v62  ;;  %v3843_v37 = vld [vmem:[%s5919_s1 + $0x594] sm:$0xf0]  ;;  %v3035_v41 = vor.u32 %v3811_v32, %v3034_v30  ;;  %v3809_v44 = vld [vmem:[%s5919_s1 + $0x484] sm:$0xf0] }
  0x40   :  { %1859 = vmatpush.bf16.msrb.mxu0 %v2707_v9  ;;  %v3847_v9 = vld [vmem:[%s5919_s1 + $0x5b4] sm:$0xf0]  ;;  %v3051_v11 = vor.u32 %v3815_v5, %v3050_v3  ;;  %v3090_v45 = vld [vmem:[%s5919_s1 + $0x500] sm:$0xf]  ;;  %v3841_v49 = vld [vmem:[%s5919_s1 + $0x584] sm:$0xf0]  ;;  %v3027_v57 = vor.u32 %v3809_v44, %v3026_v43 }
  0x41   :  { %1872 = vmatpush.bf16.msrb.mxu1 %v2771_v13  ;;  %v2978_v13 = vld [vmem:[%s5919_s1 + $0x420] sm:$0xf]  ;;  %v3179_v16 = vor.u32 %v3847_v9, %v3178_v8  ;;  %v3274_v50 = vld [vmem:[%s5919_s1 + $0x670] sm:$0xf]  ;;  %v3871_v51 = vld [vmem:[%s5919_s1 + $0x674] sm:$0xf0] }
  0x42   :  { %1885 = vmatpush.bf16.msrb.mxu2 %v2835_v14  ;;  %v3797_v14 = vld [vmem:[%s5919_s1 + $0x424] sm:$0xf0]  ;;  %v3887_v54 = vld [vmem:[%s5919_s1 + $0x6f4] sm:$0xf0]  ;;  %v3402_v55 = vld [vmem:[%s5919_s1 + $0x770] sm:$0xf]  ;;  %v3275_v63 = vor.u32 %v3871_v51, %v3274_v50 }
  0x43   :  { %1898 = vmatpush.bf16.msrb.mxu3 %v2899_v17  ;;  %1860 = vmatmul.bf16.vlgmr.msrb.gmra.mxu0 %v4427_v0  ;;  %v3813_v17 = vld [vmem:[%s5919_s1 + $0x4a4] sm:$0xf0]  ;;  %v2979_v22 = vor.u32 %v3797_v14, %v2978_v13  ;;  %v3903_v56 = vld [vmem:[%s5919_s1 + $0x774] sm:$0xf0]  ;;  %v3266_v5 = vld [vmem:[%s5919_s1 + $0x660] sm:$0xf] }
  0x44   :  { %1904 = vmatpush.bf16.msra.mxu0 %v3019_v18  ;;  %1873 = vmatmul.bf16.vlgmr.msrb.gmra.mxu1 %v4431_v2  ;;  %v3106_v18 = vld [vmem:[%s5919_s1 + $0x520] sm:$0xf]  ;;  %v3043_v23 = vor.u32 %v3813_v17, %v3042_v15  ;;  %v3869_v6 = vld [vmem:[%s5919_s1 + $0x664] sm:$0xf0]  ;;  %v4685_v15 = vld [vmem:[#allocation1 + $0x12] sm:$0xff] }
  0x45   :  { %1917 = vmatpush.bf16.msra.mxu1 %v3083_v19  ;;  %1886 = vmatmul.bf16.vlgmr.msrb.gmra.mxu2 %v4422_v60  ;;  %v3829_v19 = vld [vmem:[%s5919_s1 + $0x524] sm:$0xf0]  ;;  %v3330_v7 = vld [vmem:[%s5919_s1 + $0x6e0] sm:$0xf]  ;;  %v3883_v25 = vld [vmem:[%s5919_s1 + $0x6d4] sm:$0xf0] }
  0x46   :  { %1930 = vmatpush.bf16.msra.mxu2 %v3147_v20  ;;  %1899 = vmatmul.bf16.vlgmr.msrb.gmra.mxu3 %v4429_v1  ;;  %v3170_v20 = vld [vmem:[%s5919_s1 + $0x5a0] sm:$0xf]  ;;  %v3885_v9 = vld [vmem:[%s5919_s1 + $0x6e4] sm:$0xf0]  ;;  %v3386_v26 = vld [vmem:[%s5919_s1 + $0x750] sm:$0xf] }
  0x47   :  { %1943 = vmatpush.bf16.msra.mxu3 %v3211_v24  ;;  %v3107_v24 = vor.u32 %v3829_v19, %v3106_v18  ;;  %v3171_v31 = vor.u32 %v3845_v21, %v3170_v20  ;;  %v3458_v13 = vld [vmem:[%s5919_s1 + $0x7e0] sm:$0xf]  ;;  %v3917_v14 = vld [vmem:[%s5919_s1 + $0x7e4] sm:$0xf0]  ;;  %v3267_v18 = vor.u32 %v3869_v6, %v3266_v5  ;;  %v3331_v19 = vor.u32 %v3885_v9, %v3330_v7  ;;  %v3258_v21 = vld [vmem:[%s5919_s1 + $0x650] sm:$0xf] }
  0x48   :  { %1905 = vmatpush.bf16.msra.mxu0 %v3011_v33  ;;  %v3098_v33 = vld [vmem:[%s5919_s1 + $0x510] sm:$0xf]  ;;  %v4689_v17 = vld [vmem:[#allocation1 + $0x1b] sm:$0xff]  ;;  %v3897_v43 = vld [vmem:[%s5919_s1 + $0x744] sm:$0xf0] }
  0x49   :  { %1918 = vmatpush.bf16.msra.mxu1 %v3075_v35  ;;  %v3827_v35 = vld [vmem:[%s5919_s1 + $0x514] sm:$0xf0]  ;;  %v3442_v44 = vld [vmem:[%s5919_s1 + $0x7c0] sm:$0xf] }
  0x4a   :  { %1931 = vmatpush.bf16.msra.mxu2 %v3139_v36  ;;  %v3162_v36 = vld [vmem:[%s5919_s1 + $0x590] sm:$0xf]  ;;  %v3099_v42 = vor.u32 %v3827_v35, %v3098_v33  ;;  %v3899_v30 = vld [vmem:[%s5919_s1 + $0x754] sm:$0xf0]  ;;  %v3250_v35 = vld [vmem:[%s5919_s1 + $0x640] sm:$0xf] }
  0x4b   :  { %1944 = vmatpush.bf16.msra.mxu3 %v3203_v40  ;;  %v3793_v40 = vld [vmem:[%s5919_s1 + $0x404] sm:$0xf0]  ;;  %v3915_v32 = vld [vmem:[%s5919_s1 + $0x7d4] sm:$0xf0] }
  0x4c   :  { %1906 = vmatpush.bf16.msra.mxu0 %v3003_v46  ;;  %v3163_v46 = vor.u32 %v3843_v37, %v3162_v36  ;;  %v2963_v53 = vor.u32 %v3793_v40, %v2962_v39  ;;  %v3387_v37 = vor.u32 %v3899_v30, %v3386_v26  ;;  %v3314_v39 = vld [vmem:[%s5919_s1 + $0x6c0] sm:$0xf]  ;;  %v3881_v40 = vld [vmem:[%s5919_s1 + $0x6c4] sm:$0xf0] }
  0x4d   :  { %1919 = vmatpush.bf16.msra.mxu1 %v3067_v47  ;;  %v3825_v47 = vld [vmem:[%s5919_s1 + $0x504] sm:$0xf0] }
  0x4e   :  { %1932 = vmatpush.bf16.msra.mxu2 %v3131_v48  ;;  %v3154_v48 = vld [vmem:[%s5919_s1 + $0x580] sm:$0xf] }
  0x4f   :  { %1945 = vmatpush.bf16.msra.mxu3 %v3195_v52  ;;  %v3338_v52 = vld [vmem:[%s5919_s1 + $0x6f0] sm:$0xf]  ;;  %v3155_v62 = vor.u32 %v3841_v49, %v3154_v48 }
  0x50   :  { %1907 = vmatpush.bf16.msra.mxu0 %v2995_v58  ;;  %v3091_v58 = vor.u32 %v3825_v47, %v3090_v45  ;;  %v3339_v3 = vor.u32 %v3887_v54, %v3338_v52  ;;  %v3913_v45 = vld [vmem:[%s5919_s1 + $0x7c4] sm:$0xf0] }
  0x51   :  { %1920 = vmatpush.bf16.msra.mxu1 %v3059_v59  ;;  %v3466_v59 = vld [vmem:[%s5919_s1 + $0x7f0] sm:$0xf] }
  0x52   :  { %1933 = vmatpush.bf16.msra.mxu2 %v3123_v61  ;;  %v3919_v61 = vld [vmem:[%s5919_s1 + $0x7f4] sm:$0xf0] }
  0x53   :  { %1946 = vmatpush.bf16.msra.mxu3 %v3187_v4  ;;  %v3403_v4 = vor.u32 %v3903_v56, %v3402_v55  ;;  %v3467_v8 = vor.u32 %v3919_v61, %v3466_v59 }
  0x54   :  { %1908 = vmatpush.bf16.msra.mxu0 %v2987_v10  ;;  %v3394_v10 = vld [vmem:[%s5919_s1 + $0x760] sm:$0xf] }
  0x55   :  { %1921 = vmatpush.bf16.msra.mxu1 %v3051_v11  ;;  %v3901_v11 = vld [vmem:[%s5919_s1 + $0x764] sm:$0xf0] }
  0x56   :  { %1934 = vmatpush.bf16.msra.mxu2 %v3115_v12  ;;  %v4677_v12 = vld [vmem:[#allocation1] sm:$0xff]  ;;  %v3395_v20 = vor.u32 %v3901_v11, %v3394_v10 }
  0x57   :  { %1947 = vmatpush.bf16.msra.mxu3 %v3179_v16  ;;  %v4687_v16 = vld [vmem:[#allocation1 + $0x9] sm:$0xff] }
  0x58   :  { %1909 = vmatpush.bf16.msra.mxu0 %v2979_v22  ;;  %v3867_v22 = vld [vmem:[%s5919_s1 + $0x654] sm:$0xf0] }
  0x59   :  { %1922 = vmatpush.bf16.msra.mxu1 %v3043_v23  ;;  %v3322_v23 = vld [vmem:[%s5919_s1 + $0x6d0] sm:$0xf]  ;;  %v3259_v33 = vor.u32 %v3867_v22, %v3258_v21 }
  0x5a   :  { %1935 = vmatpush.bf16.msra.mxu2 %v3107_v24  ;;  %v3459_v24 = vor.u32 %v3917_v14, %v3458_v13  ;;  %v3323_v36 = vor.u32 %v3883_v25, %v3322_v23 }
  0x5b   :  { %1948 = vmatpush.bf16.msra.mxu3 %v3171_v31  ;;  %v3450_v31 = vld [vmem:[%s5919_s1 + $0x7d0] sm:$0xf] }
  0x5c   :  { %1910 = vmatpush.bf16.msra.mxu0 %v2971_v38  ;;  %v3865_v38 = vld [vmem:[%s5919_s1 + $0x644] sm:$0xf0] }
  0x5d   :  { %1923 = vmatpush.bf16.msra.mxu1 %v3035_v41  ;;  %v3451_v41 = vor.u32 %v3915_v32, %v3450_v31 }
  0x5e   :  { %1936 = vmatpush.bf16.msra.mxu2 %v3099_v42  ;;  %v3378_v42 = vld [vmem:[%s5919_s1 + $0x740] sm:$0xf] }
  0x5f   :  { %1949 = vmatpush.bf16.msra.mxu3 %v3163_v46 }
  0x60   :  { %1911 = vmatpush.bf16.msra.mxu0 %v2963_v53 }
  0x61   :  { %1924 = vmatpush.bf16.msra.mxu1 %v3027_v57 }
  0x62   :  { %1937 = vmatpush.bf16.msra.mxu2 %v3091_v58 }
  0x63   :  { %1950 = vmatpush.bf16.msra.mxu3 %v3155_v62  ;;  %1912 = vmatmul.bf16.vlgmr.msra.gmra.mxu0 %v4677_v12 }
  0x64   :  { %1956 = vmatpush.bf16.msrb.mxu0 %v3275_v63  ;;  %1925 = vmatmul.bf16.vlgmr.msra.gmra.mxu1 %v4687_v16 }
  0x65   :  { %1969 = vmatpush.bf16.msrb.mxu1 %v3339_v3  ;;  %1938 = vmatmul.bf16.vlgmr.msra.gmra.mxu2 %v4685_v15 }
  0x66   :  { %1982 = vmatpush.bf16.msrb.mxu2 %v3403_v4  ;;  %1951 = vmatmul.bf16.vlgmr.msra.gmra.mxu3 %v4689_v17 }
  0x67   :  { %1995 = vmatpush.bf16.msrb.mxu3 %v3467_v8 }
  0x68   :  { %1957 = vmatpush.bf16.msrb.mxu0 %v3267_v18 }
  0x69   :  { %1970 = vmatpush.bf16.msrb.mxu1 %v3331_v19 }
  0x6a   :  { %1983 = vmatpush.bf16.msrb.mxu2 %v3395_v20 }
  0x6b   :  { %1996 = vmatpush.bf16.msrb.mxu3 %v3459_v24 }
  0x6c   :  { %10 = vsyncpa [#allocation3], 0  ;;  %1958 = vmatpush.bf16.msrb.mxu0 %v3259_v33  ;;  %v3251_v46 = vor.u32 %v3865_v38, %v3250_v35  ;;  %v3315_v47 = vor.u32 %v3881_v40, %v3314_v39  ;;  %v3379_v48 = vor.u32 %v3897_v43, %v3378_v42  ;;  %v3242_v49 = vld [vmem:[%s5919_s1 + $0x630] sm:$0xf]  ;;  %v3863_v50 = vld [vmem:[%s5919_s1 + $0x634] sm:$0xf0]  ;;  %v3443_v52 = vor.u32 %v3913_v45, %v3442_v44 }
  0x6d   :  { %1971 = vmatpush.bf16.msrb.mxu1 %v3323_v36  ;;  %v3306_v51 = vld [vmem:[%s5919_s1 + $0x6b0] sm:$0xf]  ;;  %v3879_v53 = vld [vmem:[%s5919_s1 + $0x6b4] sm:$0xf0]  ;;  %v3243_v58 = vor.u32 %v3863_v50, %v3242_v49  ;;  %v3234_v62 = vld [vmem:[%s5919_s1 + $0x620] sm:$0xf] }
  0x6e   :  { %1984 = vmatpush.bf16.msrb.mxu2 %v3387_v37  ;;  %v3370_v54 = vld [vmem:[%s5919_s1 + $0x730] sm:$0xf]  ;;  %v3895_v55 = vld [vmem:[%s5919_s1 + $0x734] sm:$0xf0]  ;;  %v3307_v59 = vor.u32 %v3879_v53, %v3306_v51  ;;  %v3861_v63 = vld [vmem:[%s5919_s1 + $0x624] sm:$0xf0] }
  0x6f   :  { %1997 = vmatpush.bf16.msrb.mxu3 %v3451_v41  ;;  %v3434_v56 = vld [vmem:[%s5919_s1 + $0x7b0] sm:$0xf]  ;;  %v3911_v57 = vld [vmem:[%s5919_s1 + $0x7b4] sm:$0xf0]  ;;  %v3371_v61 = vor.u32 %v3895_v55, %v3370_v54  ;;  %v3298_v3 = vld [vmem:[%s5919_s1 + $0x6a0] sm:$0xf]  ;;  %v3235_v10 = vor.u32 %v3861_v63, %v3234_v62 }
  0x70   :  { %1959 = vmatpush.bf16.msrb.mxu0 %v3251_v46  ;;  %v3435_v4 = vor.u32 %v3911_v57, %v3434_v56  ;;  %v3877_v5 = vld [vmem:[%s5919_s1 + $0x6a4] sm:$0xf0]  ;;  %v3362_v6 = vld [vmem:[%s5919_s1 + $0x720] sm:$0xf]  ;;  %v3226_v11 = vld [vmem:[%s5919_s1 + $0x610] sm:$0xf] }
  0x71   :  { %1972 = vmatpush.bf16.msrb.mxu1 %v3315_v47  ;;  %v3893_v7 = vld [vmem:[%s5919_s1 + $0x724] sm:$0xf0]  ;;  %v3426_v8 = vld [vmem:[%s5919_s1 + $0x7a0] sm:$0xf]  ;;  %v3299_v13 = vor.u32 %v3877_v5, %v3298_v3  ;;  %v3859_v18 = vld [vmem:[%s5919_s1 + $0x614] sm:$0xf0] }
  0x72   :  { %1985 = vmatpush.bf16.msrb.mxu2 %v3379_v48  ;;  %v3909_v9 = vld [vmem:[%s5919_s1 + $0x7a4] sm:$0xf0]  ;;  %v3363_v14 = vor.u32 %v3893_v7, %v3362_v6  ;;  %v3290_v19 = vld [vmem:[%s5919_s1 + $0x690] sm:$0xf]  ;;  %v3875_v20 = vld [vmem:[%s5919_s1 + $0x694] sm:$0xf0]  ;;  %v3227_v31 = vor.u32 %v3859_v18, %v3226_v11 }
  0x73   :  { %1998 = vmatpush.bf16.msrb.mxu3 %v3443_v52  ;;  %v3427_v21 = vor.u32 %v3909_v9, %v3426_v8  ;;  %v3354_v22 = vld [vmem:[%s5919_s1 + $0x710] sm:$0xf]  ;;  %v3891_v23 = vld [vmem:[%s5919_s1 + $0x714] sm:$0xf0]  ;;  %v3218_v26 = vld [vmem:[%s5919_s1 + $0x600] sm:$0xf]  ;;  %v3291_v37 = vor.u32 %v3875_v20, %v3290_v19 }
  0x74   :  { %1960 = vmatpush.bf16.msrb.mxu0 %v3243_v58  ;;  %v3418_v24 = vld [vmem:[%s5919_s1 + $0x790] sm:$0xf]  ;;  %v3907_v25 = vld [vmem:[%s5919_s1 + $0x794] sm:$0xf0]  ;;  %v3857_v30 = vld [vmem:[%s5919_s1 + $0x604] sm:$0xf0]  ;;  %v3355_v38 = vor.u32 %v3891_v23, %v3354_v22 }
  0x75   :  { %1973 = vmatpush.bf16.msrb.mxu1 %v3307_v59  ;;  %v3282_v32 = vld [vmem:[%s5919_s1 + $0x680] sm:$0xf]  ;;  %v3873_v33 = vld [vmem:[%s5919_s1 + $0x684] sm:$0xf0]  ;;  %v3530_v41 = vld [vmem:[%s5919_s1 + $0x870] sm:$0xf]  ;;  %v3419_v43 = vor.u32 %v3907_v25, %v3418_v24  ;;  %v3219_v51 = vor.u32 %v3857_v30, %v3218_v26 }
  0x76   :  { %1986 = vmatpush.bf16.msrb.mxu2 %v3371_v61  ;;  %v3346_v35 = vld [vmem:[%s5919_s1 + $0x700] sm:$0xf]  ;;  %v3889_v36 = vld [vmem:[%s5919_s1 + $0x704] sm:$0xf0]  ;;  %v3935_v42 = vld [vmem:[%s5919_s1 + $0x874] sm:$0xf0]  ;;  %v3283_v54 = vor.u32 %v3873_v33, %v3282_v32 }
  0x77   :  { %1999 = vmatpush.bf16.msrb.mxu3 %v3435_v4  ;;  %v3410_v39 = vld [vmem:[%s5919_s1 + $0x780] sm:$0xf]  ;;  %v3905_v40 = vld [vmem:[%s5919_s1 + $0x784] sm:$0xf0]  ;;  %v3594_v44 = vld [vmem:[%s5919_s1 + $0x8f0] sm:$0xf]  ;;  %v3347_v55 = vor.u32 %v3889_v36, %v3346_v35  ;;  %v3531_v59 = vor.u32 %v3935_v42, %v3530_v41 }
  0x78   :  { %1961 = vmatpush.bf16.msrb.mxu0 %v3235_v10  ;;  %v3951_v45 = vld [vmem:[%s5919_s1 + $0x8f4] sm:$0xf0]  ;;  %v4851_v46 = vld [vmem:[#allocation1 + $0x24] sm:$0xff]  ;;  %v4855_v48 = vld [vmem:[#allocation1 + $0x2d] sm:$0xff]  ;;  %v3411_v58 = vor.u32 %v3905_v40, %v3410_v39  ;;  %s3998_s17 = smov [#allocation2]   ;;  %s2439_s21 = sshll.u32 %s5923_s5, 4  ;;  %s2440_s21 = int_to_ptr.hbm [resolvable:$true] %s2439_s21 }
  0x79   :  { %1974 = vmatpush.bf16.msrb.mxu1 %v3299_v13  ;;  %v4853_v47 = vld [vmem:[#allocation1 + $0x36] sm:$0xff]  ;;  %v4857_v49 = vld [vmem:[#allocation1 + $0x3f] sm:$0xff]  ;;  %v23_v50 = vld [vmem:[%s5918_s0 + $0x10] sm:$0x3]  ;;  %v3595_v61 = vor.u32 %v3951_v45, %v3594_v44  ;;  %s2437_s18 = sshll.u32 %s3998_s17, 4  ;;  %vm2430_vm0 = vcmask 9216   ;;  %s2438_s18 = int_to_ptr.vmem [resolvable:$true] %s2437_s18 }
  0x7a   :  { %1987 = vmatpush.bf16.msrb.mxu2 %v3363_v14  ;;  %v3678_v52 = vld [vmem:[%s5919_s1 + $0x74] sm:$0xf]  ;;  %v2508_v53 = vld [vmem:[%s5919_s1 + $0x78] sm:$0xf0]  ;;  %339 = vst [vmem:[#allocation1] ss:$9 sm:$0xff] %v23_v50 }
  0x7b   :  { %2000 = vmatpush.bf16.msrb.mxu3 %v3427_v21  ;;  %v3694_v56 = vld [vmem:[%s5919_s1 + $0xf4] sm:$0xf]  ;;  %v2572_v57 = vld [vmem:[%s5919_s1 + $0xf8] sm:$0xf0]  ;;  %v2511_v62 = vor.u32 %v3678_v52, %v2508_v53  ;;  %v3522_v63 = vld [vmem:[%s5919_s1 + $0x860] sm:$0xf] }
  0x7c   :  { %1962 = vmatpush.bf16.msrb.mxu0 %v3227_v31  ;;  %v3933_v3 = vld [vmem:[%s5919_s1 + $0x864] sm:$0xf0]  ;;  %v3586_v4 = vld [vmem:[%s5919_s1 + $0x8e0] sm:$0xf]  ;;  %v2575_v5 = vor.u32 %v3694_v56, %v2572_v57  ;;  %v3676_v7 = vld [vmem:[%s5919_s1 + $0x64] sm:$0xf] }
  0x7d   :  { %1975 = vmatpush.bf16.msrb.mxu1 %v3291_v37  ;;  %v3949_v6 = vld [vmem:[%s5919_s1 + $0x8e4] sm:$0xf0]  ;;  %v2500_v8 = vld [vmem:[%s5919_s1 + $0x68] sm:$0xf0]  ;;  %v3692_v9 = vld [vmem:[%s5919_s1 + $0xe4] sm:$0xf]  ;;  %v3523_v11 = vor.u32 %v3933_v3, %v3522_v63 }
  0x7e   :  { %1988 = vmatpush.bf16.msrb.mxu2 %v3355_v38  ;;  %v2564_v10 = vld [vmem:[%s5919_s1 + $0xe8] sm:$0xf0]  ;;  %v3587_v13 = vor.u32 %v3949_v6, %v3586_v4  ;;  %v2503_v14 = vor.u32 %v3676_v7, %v2500_v8  ;;  %v3514_v18 = vld [vmem:[%s5919_s1 + $0x850] sm:$0xf]  ;;  %v3931_v19 = vld [vmem:[%s5919_s1 + $0x854] sm:$0xf0] }
  0x7f   :  { %2001 = vmatpush.bf16.msrb.mxu3 %v3419_v43  ;;  %v3578_v20 = vld [vmem:[%s5919_s1 + $0x8d0] sm:$0xf]  ;;  %v2567_v21 = vor.u32 %v3692_v9, %v2564_v10  ;;  %v3947_v22 = vld [vmem:[%s5919_s1 + $0x8d4] sm:$0xf0]  ;;  %v3674_v23 = vld [vmem:[%s5919_s1 + $0x54] sm:$0xf]  ;;  %v3515_v30 = vor.u32 %v3931_v19, %v3514_v18 }
  0x80   :  { %1963 = vmatpush.bf16.msrb.mxu0 %v3219_v51  ;;  %v2492_v24 = vld [vmem:[%s5919_s1 + $0x58] sm:$0xf0]  ;;  %v3690_v25 = vld [vmem:[%s5919_s1 + $0xd4] sm:$0xf]  ;;  %v3579_v31 = vor.u32 %v3947_v22, %v3578_v20  ;;  %v3506_v33 = vld [vmem:[%s5919_s1 + $0x840] sm:$0xf] }
  0x81   :  { %1976 = vmatpush.bf16.msrb.mxu1 %v3283_v54  ;;  %v2556_v26 = vld [vmem:[%s5919_s1 + $0xd8] sm:$0xf0]  ;;  %v2495_v32 = vor.u32 %v3674_v23, %v2492_v24  ;;  %v3929_v35 = vld [vmem:[%s5919_s1 + $0x844] sm:$0xf0]  ;;  %v3570_v36 = vld [vmem:[%s5919_s1 + $0x8c0] sm:$0xf] }
  0x82   :  { %1989 = vmatpush.bf16.msrb.mxu2 %v3347_v55  ;;  %v2559_v37 = vor.u32 %v3690_v25, %v2556_v26  ;;  %v3945_v38 = vld [vmem:[%s5919_s1 + $0x8c4] sm:$0xf0]  ;;  %v3672_v39 = vld [vmem:[%s5919_s1 + $0x44] sm:$0xf]  ;;  %v2484_v40 = vld [vmem:[%s5919_s1 + $0x48] sm:$0xf0]  ;;  %v3507_v43 = vor.u32 %v3929_v35, %v3506_v33 }
  0x83   :  { %2002 = vmatpush.bf16.msrb.mxu3 %v3411_v58  ;;  %1964 = vmatmul.bf16.vlgmr.msrb.gmra.mxu0 %v4851_v46  ;;  %v3688_v41 = vld [vmem:[%s5919_s1 + $0xc4] sm:$0xf]  ;;  %v2548_v42 = vld [vmem:[%s5919_s1 + $0xc8] sm:$0xf0]  ;;  %v3571_v44 = vor.u32 %v3945_v38, %v3570_v36  ;;  %v2487_v45 = vor.u32 %v3672_v39, %v2484_v40  ;;  %v3498_v50 = vld [vmem:[%s5919_s1 + $0x830] sm:$0xf] }
  0x84   :  { %2008 = vmatpush.bf16.msra.mxu0 %v3531_v59  ;;  %1977 = vmatmul.bf16.vlgmr.msrb.gmra.mxu1 %v4855_v48  ;;  %v3927_v51 = vld [vmem:[%s5919_s1 + $0x834] sm:$0xf0]  ;;  %v3562_v52 = vld [vmem:[%s5919_s1 + $0x8b0] sm:$0xf]  ;;  %v2551_v53 = vor.u32 %v3688_v41, %v2548_v42  ;;  %v3670_v55 = vld [vmem:[%s5919_s1 + $0x34] sm:$0xf] }
  0x85   :  { %2021 = vmatpush.bf16.msra.mxu1 %v3595_v61  ;;  %1990 = vmatmul.bf16.vlgmr.msrb.gmra.mxu2 %v4853_v47  ;;  %v3943_v54 = vld [vmem:[%s5919_s1 + $0x8b4] sm:$0xf0]  ;;  %v2476_v56 = vld [vmem:[%s5919_s1 + $0x38] sm:$0xf0]  ;;  %v3686_v57 = vld [vmem:[%s5919_s1 + $0xb4] sm:$0xf]  ;;  %v3499_v59 = vor.u32 %v3927_v51, %v3498_v50 }
  0x86   :  { %2034 = vmatpush.bf16.msra.mxu2 %v2511_v62  ;;  %2003 = vmatmul.bf16.vlgmr.msrb.gmra.mxu3 %v4857_v49  ;;  %v2540_v58 = vld [vmem:[%s5919_s1 + $0xb8] sm:$0xf0]  ;;  %v3563_v61 = vor.u32 %v3943_v54, %v3562_v52  ;;  %v2479_v62 = vor.u32 %v3670_v55, %v2476_v56  ;;  %v3490_v63 = vld [vmem:[%s5919_s1 + $0x820] sm:$0xf]  ;;  %v3925_v3 = vld [vmem:[%s5919_s1 + $0x824] sm:$0xf0] }
  0x87   :  { %2047 = vmatpush.bf16.msra.mxu3 %v2575_v5  ;;  %v3554_v4 = vld [vmem:[%s5919_s1 + $0x8a0] sm:$0xf]  ;;  %v2543_v5 = vor.u32 %v3686_v57, %v2540_v58  ;;  %v3941_v6 = vld [vmem:[%s5919_s1 + $0x8a4] sm:$0xf0]  ;;  %v3668_v7 = vld [vmem:[%s5919_s1 + $0x24] sm:$0xf] }
  0x88   :  { %2009 = vmatpush.bf16.msra.mxu0 %v3523_v11  ;;  %v2468_v8 = vld [vmem:[%s5919_s1 + $0x28] sm:$0xf0]  ;;  %v3684_v9 = vld [vmem:[%s5919_s1 + $0xa4] sm:$0xf]  ;;  %v3491_v11 = vor.u32 %v3925_v3, %v3490_v63  ;;  %v3482_v18 = vld [vmem:[%s5919_s1 + $0x810] sm:$0xf] }
  0x89   :  { %2022 = vmatpush.bf16.msra.mxu1 %v3587_v13  ;;  %v2532_v10 = vld [vmem:[%s5919_s1 + $0xa8] sm:$0xf0]  ;;  %v3555_v13 = vor.u32 %v3941_v6, %v3554_v4  ;;  %v3923_v19 = vld [vmem:[%s5919_s1 + $0x814] sm:$0xf0]  ;;  %v3546_v20 = vld [vmem:[%s5919_s1 + $0x890] sm:$0xf] }
  0x8a   :  { %2035 = vmatpush.bf16.msra.mxu2 %v2503_v14  ;;  %v2471_v14 = vor.u32 %v3668_v7, %v2468_v8  ;;  %v3939_v22 = vld [vmem:[%s5919_s1 + $0x894] sm:$0xf0]  ;;  %v3666_v23 = vld [vmem:[%s5919_s1 + $0x14] sm:$0xf]  ;;  %v2460_v24 = vld [vmem:[%s5919_s1 + $0x18] sm:$0xf0] }
  0x8b   :  { %2048 = vmatpush.bf16.msra.mxu3 %v2567_v21  ;;  %v2535_v21 = vor.u32 %v3684_v9, %v2532_v10  ;;  %v3682_v25 = vld [vmem:[%s5919_s1 + $0x94] sm:$0xf]  ;;  %v2524_v26 = vld [vmem:[%s5919_s1 + $0x98] sm:$0xf0]  ;;  %v3547_v33 = vor.u32 %v3939_v22, %v3546_v20  ;;  %v2463_v35 = vor.u32 %v3666_v23, %v2460_v24  ;;  %v3538_v36 = vld [vmem:[%s5919_s1 + $0x880] sm:$0xf] }
  0x8c   :  { %2010 = vmatpush.bf16.msra.mxu0 %v3515_v30  ;;  %v3483_v30 = vor.u32 %v3923_v19, %v3482_v18  ;;  %v3664_v38 = vld [vmem:[%s5919_s1 + $0x4] sm:$0xf]  ;;  %v2527_v39 = vor.u32 %v3682_v25, %v2524_v26  ;;  %v2452_v40 = vld [vmem:[%s5919_s1 + $0x8] sm:$0xf0]  ;;  %v2700_v51 = vld [vmem:[%s5919_s1 + $0x1f8] sm:$0xf0] }
  0x8d   :  { %2023 = vmatpush.bf16.msra.mxu1 %v3579_v31  ;;  %v3474_v31 = vld [vmem:[%s5919_s1 + $0x800] sm:$0xf]  ;;  %v3680_v41 = vld [vmem:[%s5919_s1 + $0x84] sm:$0xf]  ;;  %v2516_v42 = vld [vmem:[%s5919_s1 + $0x88] sm:$0xf0]  ;;  %v2455_v55 = vor.u32 %v3664_v38, %v2452_v40 }
  0x8e   :  { %2036 = vmatpush.bf16.msra.mxu2 %v2495_v32  ;;  %v3921_v32 = vld [vmem:[%s5919_s1 + $0x804] sm:$0xf0]  ;;  %v3742_v52 = vld [vmem:[%s5919_s1 + $0x274] sm:$0xf]  ;;  %v2828_v57 = vld [vmem:[%s5919_s1 + $0x2f8] sm:$0xf0]  ;;  %v2519_v58 = vor.u32 %v3680_v41, %v2516_v42 }
  0x8f   :  { %2049 = vmatpush.bf16.msra.mxu3 %v2559_v37  ;;  %v3937_v37 = vld [vmem:[%s5919_s1 + $0x884] sm:$0xf0]  ;;  %v3475_v50 = vor.u32 %v3921_v32, %v3474_v31  ;;  %v3758_v56 = vld [vmem:[%s5919_s1 + $0x2f4] sm:$0xf]  ;;  %v3708_v63 = vld [vmem:[%s5919_s1 + $0x164] sm:$0xf] }
  0x90   :  { %2011 = vmatpush.bf16.msra.mxu0 %v3507_v43  ;;  %v3710_v43 = vld [vmem:[%s5919_s1 + $0x174] sm:$0xf]  ;;  %v3539_v54 = vor.u32 %v3937_v37, %v3538_v36  ;;  %v2628_v3 = vld [vmem:[%s5919_s1 + $0x168] sm:$0xf0]  ;;  %v3724_v4 = vld [vmem:[%s5919_s1 + $0x1e4] sm:$0xf] }
  0x91   :  { %2024 = vmatpush.bf16.msra.mxu1 %v3571_v44  ;;  %v2636_v44 = vld [vmem:[%s5919_s1 + $0x178] sm:$0xf0]  ;;  %v2692_v6 = vld [vmem:[%s5919_s1 + $0x1e8] sm:$0xf0]  ;;  %v3740_v7 = vld [vmem:[%s5919_s1 + $0x264] sm:$0xf] }
  0x92   :  { %2037 = vmatpush.bf16.msra.mxu2 %v2487_v45  ;;  %v3726_v45 = vld [vmem:[%s5919_s1 + $0x1f4] sm:$0xf]  ;;  %v2756_v8 = vld [vmem:[%s5919_s1 + $0x268] sm:$0xf0]  ;;  %v340_v9 = vld [vmem:[#allocation1] sm:$0xff]  ;;  %v2695_v18 = vor.u32 %v3724_v4, %v2692_v6 }
  0x93   :  { %2050 = vmatpush.bf16.msra.mxu3 %v2551_v53  ;;  %v2764_v53 = vld [vmem:[%s5919_s1 + $0x278] sm:$0xf0]  ;;  %v3756_v10 = vld [vmem:[%s5919_s1 + $0x2e4] sm:$0xf]  ;;  %v2759_v19 = vor.u32 %v3740_v7, %v2756_v8  ;;  %v3706_v20 = vld [vmem:[%s5919_s1 + $0x154] sm:$0xf] }
  0x94   :  { %2012 = vmatpush.bf16.msra.mxu0 %v3499_v59  ;;  %v2639_v59 = vor.u32 %v3710_v43, %v2636_v44  ;;  %v3722_v22 = vld [vmem:[%s5919_s1 + $0x1d4] sm:$0xf]  ;;  %v2684_v24 = vld [vmem:[%s5919_s1 + $0x1d8] sm:$0xf0]  ;;  %v3704_v36 = vld [vmem:[%s5919_s1 + $0x144] sm:$0xf] }
  0x95   :  { %2025 = vmatpush.bf16.msra.mxu1 %v3563_v61  ;;  %v2703_v61 = vor.u32 %v3726_v45, %v2700_v51  ;;  %v3738_v25 = vld [vmem:[%s5919_s1 + $0x254] sm:$0xf]  ;;  %v2748_v26 = vld [vmem:[%s5919_s1 + $0x258] sm:$0xf0]  ;;  %v2612_v37 = vld [vmem:[%s5919_s1 + $0x148] sm:$0xf0] }
  0x96   :  { %2038 = vmatpush.bf16.msra.mxu2 %v2479_v62  ;;  %v2767_v62 = vor.u32 %v3742_v52, %v2764_v53  ;;  %v2812_v31 = vld [vmem:[%s5919_s1 + $0x2d8] sm:$0xf0]  ;;  %v2740_v40 = vld [vmem:[%s5919_s1 + $0x248] sm:$0xf0]  ;;  %v3752_v41 = vld [vmem:[%s5919_s1 + $0x2c4] sm:$0xf]  ;;  %v2615_v43 = vor.u32 %v3704_v36, %v2612_v37 }
  0x97   :  { %2051 = vmatpush.bf16.msra.mxu3 %v2543_v5  ;;  %v2831_v5 = vor.u32 %v3758_v56, %v2828_v57  ;;  %v2804_v42 = vld [vmem:[%s5919_s1 + $0x2c8] sm:$0xf0]  ;;  %v2604_v51 = vld [vmem:[%s5919_s1 + $0x138] sm:$0xf0]  ;;  %v3718_v52 = vld [vmem:[%s5919_s1 + $0x1b4] sm:$0xf] }
  0x98   :  { %2013 = vmatpush.bf16.msra.mxu0 %v3491_v11  ;;  %v2820_v11 = vld [vmem:[%s5919_s1 + $0x2e8] sm:$0xf0]  ;;  %v2807_v53 = vor.u32 %v3752_v41, %v2804_v42  ;;  %v2732_v56 = vld [vmem:[%s5919_s1 + $0x238] sm:$0xf0]  ;;  %v3750_v57 = vld [vmem:[%s5919_s1 + $0x2b4] sm:$0xf] }
  0x99   :  { %2026 = vmatpush.bf16.msra.mxu1 %v3555_v13  ;;  %v341_v13 = vld [vmem:[#allocation1 + $0x9] sm:$0xff]  ;;  %v2823_v23 = vor.u32 %v3756_v10, %v2820_v11  ;;  %v3716_v4 = vld [vmem:[%s5919_s1 + $0x1a4] sm:$0xf] }
  0x9a   :  { %2039 = vmatpush.bf16.msra.mxu2 %v2471_v14  ;;  %v2631_v14 = vor.u32 %v3708_v63, %v2628_v3  ;;  %v2596_v3 = vld [vmem:[%s5919_s1 + $0x128] sm:$0xf0]  ;;  %v3732_v7 = vld [vmem:[%s5919_s1 + $0x224] sm:$0xf] }
  0x9b   :  { %2052 = vmatpush.bf16.msra.mxu3 %v2535_v21  ;;  %v2620_v21 = vld [vmem:[%s5919_s1 + $0x158] sm:$0xf0]  ;;  %v2724_v8 = vld [vmem:[%s5919_s1 + $0x228] sm:$0xf0]  ;;  %v3748_v10 = vld [vmem:[%s5919_s1 + $0x2a4] sm:$0xf] }
  0x9c   :  { %2014 = vmatpush.bf16.msra.mxu0 %v3483_v30  ;;  %v3754_v30 = vld [vmem:[%s5919_s1 + $0x2d4] sm:$0xf]  ;;  %v2623_v32 = vor.u32 %v3706_v20, %v2620_v21  ;;  %v2788_v11 = vld [vmem:[%s5919_s1 + $0x2a8] sm:$0xf0]  ;;  %v2588_v20 = vld [vmem:[%s5919_s1 + $0x118] sm:$0xf0] }
  0x9d   :  { %2027 = vmatpush.bf16.msra.mxu1 %v3547_v33  ;;  %v2687_v33 = vor.u32 %v3722_v22, %v2684_v24  ;;  %v2815_v38 = vor.u32 %v3754_v30, %v2812_v31  ;;  %v3714_v21 = vld [vmem:[%s5919_s1 + $0x194] sm:$0xf]  ;;  %v2652_v24 = vld [vmem:[%s5919_s1 + $0x198] sm:$0xf0] }
  0x9e   :  { %2040 = vmatpush.bf16.msra.mxu2 %v2463_v35  ;;  %v2751_v35 = vor.u32 %v3738_v25, %v2748_v26  ;;  %v3730_v25 = vld [vmem:[%s5919_s1 + $0x214] sm:$0xf]  ;;  %v2716_v26 = vld [vmem:[%s5919_s1 + $0x218] sm:$0xf0]  ;;  %v2655_v37 = vor.u32 %v3714_v21, %v2652_v24  ;;  %v3076_v24 = vld [vmem:[%s5919_s1 + $0x4e8] sm:$0xf0] }
  0x9f   :  { %2053 = vmatpush.bf16.msra.mxu3 %v2527_v39  ;;  %v3736_v39 = vld [vmem:[%s5919_s1 + $0x244] sm:$0xf]  ;;  %v3746_v30 = vld [vmem:[%s5919_s1 + $0x294] sm:$0xf]  ;;  %v2780_v31 = vld [vmem:[%s5919_s1 + $0x298] sm:$0xf0] }
  0xa0   :  { %2015 = vmatpush.bf16.msra.mxu0 %v3475_v50  ;;  %v2743_v45 = vor.u32 %v3736_v39, %v2740_v40  ;;  %v3702_v50 = vld [vmem:[%s5919_s1 + $0x134] sm:$0xf]  ;;  %v3728_v39 = vld [vmem:[%s5919_s1 + $0x204] sm:$0xf]  ;;  %v2783_v42 = vor.u32 %v3746_v30, %v2780_v31 }
  0xa1   :  { %2028 = vmatpush.bf16.msra.mxu1 %v3539_v54  ;;  %v2668_v54 = vld [vmem:[%s5919_s1 + $0x1b8] sm:$0xf0] }
  0xa2   :  { %2041 = vmatpush.bf16.msra.mxu2 %v2455_v55  ;;  %v3734_v55 = vld [vmem:[%s5919_s1 + $0x234] sm:$0xf] }
  0xa3   :  { %2054 = vmatpush.bf16.msra.mxu3 %v2519_v58  ;;  %2016 = vmatmul.bf16.vlgmr.msra.gmra.mxu0 %v340_v9  ;;  %v2796_v58 = vld [vmem:[%s5919_s1 + $0x2b8] sm:$0xf0]  ;;  %v2735_v63 = vor.u32 %v3734_v55, %v2732_v56  ;;  %v5189_v9 = vld [vmem:[%s5920_s2] sm:$0x3]  ;;  %v3806_v56 = vld [vmem:[%s5919_s1 + $0x474] sm:$0xf] }
  0xa4   :  { %2060 = vmatpush.bf16.msrb.mxu0 %v2639_v59  ;;  %2029 = vmatmul.bf16.vlgmr.msra.gmra.mxu1 %v341_v13  ;;  %v2607_v59 = vor.u32 %v3702_v50, %v2604_v51  ;;  %v2799_v6 = vor.u32 %v3750_v57, %v2796_v58  ;;  %v314_v22 = vperm.slane %v5189_v9, 0  ;;  %v3774_v50 = vld [vmem:[%s5919_s1 + $0x374] sm:$0xf]  ;;  %v2892_v51 = vld [vmem:[%s5919_s1 + $0x378] sm:$0xf0] }
  0xa5   :  { %2073 = vmatpush.bf16.msrb.mxu1 %v2703_v61  ;;  %2042 = vmatmul.bf16.vlgmr.msra.gmra.mxu2 %v4349_v28  ;;  %v3720_v28 = vld [vmem:[%s5919_s1 + $0x1c4] sm:$0xf]  ;;  %v2956_v55 = vld [vmem:[%s5919_s1 + $0x3f8] sm:$0xf0] }
  0xa6   :  { %2086 = vmatpush.bf16.msrb.mxu2 %v2767_v62  ;;  %2055 = vmatmul.bf16.vlgmr.msra.gmra.mxu3 %v4359_v34  ;;  %v2676_v34 = vld [vmem:[%s5919_s1 + $0x1c8] sm:$0xf0]  ;;  %v3700_v61 = vld [vmem:[%s5919_s1 + $0x124] sm:$0xf]  ;;  %v2671_v62 = vor.u32 %v3718_v52, %v2668_v54  ;;  %v1809_v36 = vpop.f32.mrf.mxu0  ;;  %v3790_v52 = vld [vmem:[%s5919_s1 + $0x3f4] sm:$0xf] }
  0xa7   :  { %2099 = vmatpush.bf16.msrb.mxu3 %v2831_v5  ;;  %v2679_v44 = vor.u32 %v3720_v28, %v2676_v34  ;;  %v2660_v5 = vld [vmem:[%s5919_s1 + $0x1a8] sm:$0xf0]  ;;  %v2599_v13 = vor.u32 %v3700_v61, %v2596_v3  ;;  %v2719_v28 = vor.u32 %v3730_v25, %v2716_v26  ;;  %v1810_v40 = vadd.f32 %v1809_v36, %v314_v22  ;;  %v1822_v41 = vpop.f32.mrf.mxu1  ;;  %v3020_v57 = vld [vmem:[%s5919_s1 + $0x478] sm:$0xf0]  ;;  %v3822_v61 = vld [vmem:[%s5919_s1 + $0x4f4] sm:$0xf] }
  0xa8   :  { %2061 = vmatpush.bf16.msrb.mxu0 %v2631_v14  ;;  %v3698_v14 = vld [vmem:[%s5919_s1 + $0x114] sm:$0xf]  ;;  %v2644_v34 = vld [vmem:[%s5919_s1 + $0x188] sm:$0xf0] }
  0xa9   :  { %2074 = vmatpush.bf16.msrb.mxu1 %v2695_v18  ;;  %v2663_v18 = vor.u32 %v3716_v4, %v2660_v5  ;;  %v2895_v4 = vor.u32 %v3774_v50, %v2892_v51  ;;  %v3800_v50 = vld [vmem:[%s5919_s1 + $0x444] sm:$0xf]  ;;  %v2996_v51 = vld [vmem:[%s5919_s1 + $0x448] sm:$0xf0] }
  0xaa   :  { %2087 = vmatpush.bf16.msrb.mxu2 %v2759_v19  ;;  %v2727_v19 = vor.u32 %v3732_v7, %v2724_v8  ;;  %v2959_v7 = vor.u32 %v3790_v52, %v2956_v55  ;;  %v3023_v8 = vor.u32 %v3806_v56, %v3020_v57  ;;  %v3816_v52 = vld [vmem:[%s5919_s1 + $0x4c4] sm:$0xf]  ;;  %v2999_v57 = vor.u32 %v3800_v50, %v2996_v51 }
  0xab   :  { %2100 = vmatpush.bf16.msrb.mxu3 %v2823_v23  ;;  %v2791_v23 = vor.u32 %v3748_v10, %v2788_v11  ;;  %v3772_v10 = vld [vmem:[%s5919_s1 + $0x364] sm:$0xf]  ;;  %v2884_v11 = vld [vmem:[%s5919_s1 + $0x368] sm:$0xf0] }
  0xac   :  { %2062 = vmatpush.bf16.msrb.mxu0 %v2623_v32  ;;  %v2591_v32 = vor.u32 %v3698_v14, %v2588_v20  ;;  %v3012_v20 = vld [vmem:[%s5919_s1 + $0x468] sm:$0xf0]  ;;  %v2887_v26 = vor.u32 %v3772_v10, %v2884_v11 }
  0xad   :  { %2075 = vmatpush.bf16.msrb.mxu1 %v2687_v33  ;;  %v3696_v33 = vld [vmem:[%s5919_s1 + $0x104] sm:$0xf] }
  0xae   :  { %2088 = vmatpush.bf16.msrb.mxu2 %v2751_v35  ;;  %v2580_v35 = vld [vmem:[%s5919_s1 + $0x108] sm:$0xf0]  ;;  %v1811_v22 = vpop.f32.mrf.mxu0 }
  0xaf   :  { %2101 = vmatpush.bf16.msrb.mxu3 %v2815_v38  ;;  %v3712_v38 = vld [vmem:[%s5919_s1 + $0x184] sm:$0xf]  ;;  %v2583_v54 = vor.u32 %v3696_v33, %v2580_v35  ;;  %v1824_v25 = vpop.f32.mrf.mxu1  ;;  %v2876_v33 = vld [vmem:[%s5919_s1 + $0x358] sm:$0xf0]  ;;  %v3786_v35 = vld [vmem:[%s5919_s1 + $0x3d4] sm:$0xf] }
  0xb0   :  { %2063 = vmatpush.bf16.msrb.mxu0 %v2615_v43  ;;  %v2708_v43 = vld [vmem:[%s5919_s1 + $0x208] sm:$0xf0]  ;;  %v2647_v58 = vor.u32 %v3712_v38, %v2644_v34  ;;  %v3004_v38 = vld [vmem:[%s5919_s1 + $0x458] sm:$0xf0]  ;;  %v3818_v34 = vld [vmem:[%s5919_s1 + $0x4d4] sm:$0xf] }
  0xb1   :  { %2076 = vmatpush.bf16.msrb.mxu1 %v2679_v44  ;;  %v3744_v44 = vld [vmem:[%s5919_s1 + $0x284] sm:$0xf]  ;;  %v2980_v25 = vld [vmem:[%s5919_s1 + $0x428] sm:$0xf0] }
  0xb2   :  { %2089 = vmatpush.bf16.msrb.mxu2 %v2743_v45  ;;  %v2772_v45 = vld [vmem:[%s5919_s1 + $0x288] sm:$0xf0] }
  0xb3   :  { %2102 = vmatpush.bf16.msrb.mxu3 %v2807_v53  ;;  %v1823_v53 = vadd.f32 %v1822_v41, %v1810_v40  ;;  %v2775_v3 = vor.u32 %v3744_v44, %v2772_v45  ;;  %v3768_v44 = vld [vmem:[%s5919_s1 + $0x344] sm:$0xf] }
  0xb4   :  { %2064 = vmatpush.bf16.msrb.mxu0 %v2607_v59  ;;  %v2711_v59 = vor.u32 %v3728_v39, %v2708_v43 }
  0xb5   :  { %2077 = vmatpush.bf16.msrb.mxu1 %v2671_v62  ;;  %v3084_v62 = vld [vmem:[%s5919_s1 + $0x4f8] sm:$0xf0] }
  0xb6   :  { %2090 = vmatpush.bf16.msrb.mxu2 %v2735_v63  ;;  %v1835_v63 = vpop.f32.mrf.mxu2  ;;  %v3087_v14 = vor.u32 %v3822_v61, %v3084_v62  ;;  %v3782_v61 = vld [vmem:[%s5919_s1 + $0x3b4] sm:$0xf] }
  0xb7   :  { %2103 = vmatpush.bf16.msrb.mxu3 %v2799_v6  ;;  %v1836_v5 = vadd.f32 %v1835_v63, %v1823_v53  ;;  %v1848_v6 = vpop.f32.mrf.mxu3  ;;  %v3060_v53 = vld [vmem:[%s5919_s1 + $0x4c8] sm:$0xf0] }
  0xb8   :  { %2065 = vmatpush.bf16.msrb.mxu0 %v2599_v13  ;;  %v3788_v13 = vld [vmem:[%s5919_s1 + $0x3e4] sm:$0xf] }
  0xb9   :  { %2078 = vmatpush.bf16.msrb.mxu1 %v2663_v18  ;;  %v2948_v18 = vld [vmem:[%s5919_s1 + $0x3e8] sm:$0xf0]  ;;  %v1849_v21 = vadd.f32 %v1848_v6, %v1836_v5  ;;  %v3798_v5 = vld [vmem:[%s5919_s1 + $0x434] sm:$0xf]  ;;  %v2988_v6 = vld [vmem:[%s5919_s1 + $0x438] sm:$0xf0] }
  0xba   :  { %2091 = vmatpush.bf16.msrb.mxu2 %v2727_v19  ;;  %v3804_v19 = vld [vmem:[%s5919_s1 + $0x464] sm:$0xf]  ;;  %v2951_v30 = vor.u32 %v3788_v13, %v2948_v18 }
  0xbb   :  { %2104 = vmatpush.bf16.msrb.mxu3 %v2791_v23  ;;  %v3820_v23 = vld [vmem:[%s5919_s1 + $0x4e4] sm:$0xf]  ;;  %v3015_v31 = vor.u32 %v3804_v19, %v3012_v20  ;;  %v2852_v19 = vld [vmem:[%s5919_s1 + $0x328] sm:$0xf0] }
  0xbc   :  { %2066 = vmatpush.bf16.msrb.mxu0 %v2591_v32  ;;  %v3770_v32 = vld [vmem:[%s5919_s1 + $0x354] sm:$0xf]  ;;  %v3079_v36 = vor.u32 %v3820_v23, %v3076_v24  ;;  %v3764_v18 = vld [vmem:[%s5919_s1 + $0x324] sm:$0xf]  ;;  %v2916_v23 = vld [vmem:[%s5919_s1 + $0x3a8] sm:$0xf0] }
  0xbd   :  { %2079 = vmatpush.bf16.msrb.mxu1 %v2655_v37  ;;  %v2940_v37 = vld [vmem:[%s5919_s1 + $0x3d8] sm:$0xf0]  ;;  %v2879_v40 = vor.u32 %v3770_v32, %v2876_v33  ;;  %v3780_v20 = vld [vmem:[%s5919_s1 + $0x3a4] sm:$0xf]  ;;  %v3044_v32 = vld [vmem:[%s5919_s1 + $0x4a8] sm:$0xf0]  ;;  %v2855_v33 = vor.u32 %v3764_v18, %v2852_v19 }
  0xbe   :  { %2092 = vmatpush.bf16.msrb.mxu2 %v2719_v28  ;;  %v3802_v28 = vld [vmem:[%s5919_s1 + $0x454] sm:$0xf]  ;;  %v1837_v39 = vpop.f32.mrf.mxu2  ;;  %v3796_v24 = vld [vmem:[%s5919_s1 + $0x424] sm:$0xf] }
  0xbf   :  { %2105 = vmatpush.bf16.msrb.mxu3 %v2783_v42  ;;  %v1850_v41 = vpop.f32.mrf.mxu3  ;;  %v2943_v42 = vor.u32 %v3786_v35, %v2940_v37  ;;  %v3007_v43 = vor.u32 %v3802_v28, %v3004_v38  ;;  %v2919_v37 = vor.u32 %v3780_v20, %v2916_v23  ;;  %v2983_v28 = vor.u32 %v3796_v24, %v2980_v25  ;;  %v3762_v38 = vld [vmem:[%s5919_s1 + $0x314] sm:$0xf]  ;;  %v3852_v23 = vld [vmem:[%s5919_s1 + $0x5e4] sm:$0xf]  ;;  %v3204_v25 = vld [vmem:[%s5919_s1 + $0x5e8] sm:$0xf0] }
  0xc0   :  { %2067 = vmatpush.bf16.msrb.mxu0 %v2583_v54  ;;  %v1861_v55 = vpop.f32.mrf.mxu0  ;;  %v2908_v41 = vld [vmem:[%s5919_s1 + $0x398] sm:$0xf0] }
  0xc1   :  { %2080 = vmatpush.bf16.msrb.mxu1 %v2647_v58  ;;  %v3766_v58 = vld [vmem:[%s5919_s1 + $0x334] sm:$0xf]  ;;  %v1862_v62 = vadd.f32 %v1861_v55, %v1849_v21  ;;  %v1874_v63 = vpop.f32.mrf.mxu1 }
  0xc2   :  { %2093 = vmatpush.bf16.msrb.mxu2 %v2711_v59  ;;  %v2860_v59 = vld [vmem:[%s5919_s1 + $0x338] sm:$0xf0] }
  0xc3   :  { %2106 = vmatpush.bf16.msrb.mxu3 %v2775_v3  ;;  %2068 = vmatmul.bf16.vlgmr.msrb.gmra.mxu0 %v4347_v27  ;;  %v2868_v27 = vld [vmem:[%s5919_s1 + $0x348] sm:$0xf0]  ;;  %v3063_v3 = vor.u32 %v3816_v52, %v3060_v53  ;;  %v1875_v10 = vadd.f32 %v1874_v63, %v1862_v62  ;;  %v2863_v11 = vor.u32 %v3766_v58, %v2860_v59  ;;  %v3776_v52 = vld [vmem:[%s5919_s1 + $0x384] sm:$0xf]  ;;  %v3838_v62 = vld [vmem:[%s5919_s1 + $0x574] sm:$0xf] }
  0xc4   :  { %2112 = vmatpush.bf16.msra.mxu0 %v2895_v4  ;;  %2081 = vmatmul.bf16.vlgmr.msrb.gmra.mxu1 %v4351_v29  ;;  %v2932_v29 = vld [vmem:[%s5919_s1 + $0x3c8] sm:$0xf0]  ;;  %v2871_v54 = vor.u32 %v3768_v44, %v2868_v27  ;;  %v2924_v4 = vld [vmem:[%s5919_s1 + $0x3b8] sm:$0xf0]  ;;  %v3810_v44 = vld [vmem:[%s5919_s1 + $0x494] sm:$0xf] }
  0xc5   :  { %2125 = vmatpush.bf16.msra.mxu1 %v2959_v7  ;;  %2094 = vmatmul.bf16.vlgmr.msrb.gmra.mxu2 %v4427_v0  ;;  %v3068_v0 = vld [vmem:[%s5919_s1 + $0x4d8] sm:$0xf0]  ;;  %v3814_v7 = vld [vmem:[%s5919_s1 + $0x4b4] sm:$0xf]  ;;  %v2927_v13 = vor.u32 %v3782_v61, %v2924_v4  ;;  %v2900_v53 = vld [vmem:[%s5919_s1 + $0x388] sm:$0xf0] }
  0xc6   :  { %2138 = vmatpush.bf16.msra.mxu2 %v3023_v8  ;;  %2107 = vmatmul.bf16.vlgmr.msrb.gmra.mxu3 %v4431_v2  ;;  %v3784_v2 = vld [vmem:[%s5919_s1 + $0x3c4] sm:$0xf]  ;;  %v3071_v45 = vor.u32 %v3818_v34, %v3068_v0  ;;  %v3052_v8 = vld [vmem:[%s5919_s1 + $0x4b8] sm:$0xf0]  ;;  %v3778_v0 = vld [vmem:[%s5919_s1 + $0x394] sm:$0xf] }
  0xc7   :  { %2151 = vmatpush.bf16.msra.mxu3 %v3087_v14  ;;  %v2935_v56 = vor.u32 %v3784_v2, %v2932_v29  ;;  %v2991_v14 = vor.u32 %v3798_v5, %v2988_v6  ;;  %v3055_v22 = vor.u32 %v3814_v7, %v3052_v8  ;;  %v2844_v34 = vld [vmem:[%s5919_s1 + $0x318] sm:$0xf0]  ;;  %v2836_v29 = vld [vmem:[%s5919_s1 + $0x308] sm:$0xf0]  ;;  %v2911_v50 = vor.u32 %v3778_v0, %v2908_v41  ;;  %v3808_v58 = vld [vmem:[%s5919_s1 + $0x484] sm:$0xf] }
  0xc8   :  { %2113 = vmatpush.bf16.msra.mxu0 %v2887_v26  ;;  %v1887_v21 = vpop.f32.mrf.mxu2  ;;  %v3036_v27 = vld [vmem:[%s5919_s1 + $0x498] sm:$0xf0]  ;;  %v2847_v2 = vor.u32 %v3762_v38, %v2844_v34  ;;  %v3028_v59 = vld [vmem:[%s5919_s1 + $0x488] sm:$0xf0]  ;;  %v3870_v6 = vld [vmem:[%s5919_s1 + $0x674] sm:$0xf]  ;;  %v2903_v8 = vor.u32 %v3776_v52, %v2900_v53 }
  0xc9   :  { %2126 = vmatpush.bf16.msra.mxu1 %v2951_v30  ;;  %v1888_v26 = vadd.f32 %v1887_v21, %v1875_v10  ;;  %v1900_v30 = vpop.f32.mrf.mxu3  ;;  %v1876_v39 = vpop.f32.mrf.mxu1  ;;  %v3148_v63 = vld [vmem:[%s5919_s1 + $0x578] sm:$0xf0]  ;;  %v3836_v21 = vld [vmem:[%s5919_s1 + $0x564] sm:$0xf]  ;;  %v3850_v34 = vld [vmem:[%s5919_s1 + $0x5d4] sm:$0xf] }
  0xca   :  { %2139 = vmatpush.bf16.msra.mxu2 %v3015_v31  ;;  %v3812_v31 = vld [vmem:[%s5919_s1 + $0x4a4] sm:$0xf]  ;;  %v3212_v5 = vld [vmem:[%s5919_s1 + $0x5f8] sm:$0xf0]  ;;  %v3151_v18 = vor.u32 %v3838_v62, %v3148_v63  ;;  %v3316_v53 = vld [vmem:[%s5919_s1 + $0x6c8] sm:$0xf0] }
  0xcb   :  { %2152 = vmatpush.bf16.msra.mxu3 %v3079_v36  ;;  %v5394_v35 = vadd.f32 %v1900_v30, %v1888_v26  ;;  %v1863_v36 = vpop.f32.mrf.mxu0  ;;  %v3276_v7 = vld [vmem:[%s5919_s1 + $0x678] sm:$0xf0]  ;;  %v3868_v26 = vld [vmem:[%s5919_s1 + $0x664] sm:$0xf]  ;;  %v3268_v30 = vld [vmem:[%s5919_s1 + $0x668] sm:$0xf0] }
  0xcc   :  { %2114 = vmatpush.bf16.msra.mxu0 %v2879_v40  ;;  %v3047_v40 = vor.u32 %v3812_v31, %v3044_v32  ;;  %v3279_v20 = vor.u32 %v3870_v6, %v3276_v7  ;;  %v3884_v31 = vld [vmem:[%s5919_s1 + $0x6e4] sm:$0xf]  ;;  %v3332_v32 = vld [vmem:[%s5919_s1 + $0x6e8] sm:$0xf0]  ;;  %v3207_v36 = vor.u32 %v3852_v23, %v3204_v25  ;;  %v3132_v38 = vld [vmem:[%s5919_s1 + $0x558] sm:$0xf0] }
  0xcd   :  { %2127 = vmatpush.bf16.msra.mxu1 %v2943_v42  ;;  %v3794_v42 = vld [vmem:[%s5919_s1 + $0x414] sm:$0xf]  ;;  %v3335_v0 = vor.u32 %v3884_v31, %v3332_v32  ;;  %v3196_v39 = vld [vmem:[%s5919_s1 + $0x5d8] sm:$0xf0]  ;;  %v3880_v52 = vld [vmem:[%s5919_s1 + $0x6c4] sm:$0xf] }
  0xce   :  { %2140 = vmatpush.bf16.msra.mxu2 %v3007_v43  ;;  %v2972_v43 = vld [vmem:[%s5919_s1 + $0x418] sm:$0xf0]  ;;  %v3319_v62 = vor.u32 %v3880_v52, %v3316_v53  ;;  %v3300_v25 = vld [vmem:[%s5919_s1 + $0x6a8] sm:$0xf0]  ;;  %v3902_v53 = vld [vmem:[%s5919_s1 + $0x774] sm:$0xf] }
  0xcf   :  { %2153 = vmatpush.bf16.msra.mxu3 %v3071_v45  ;;  %v3760_v45 = vld [vmem:[%s5919_s1 + $0x304] sm:$0xf]  ;;  %v2975_v51 = vor.u32 %v3794_v42, %v2972_v43  ;;  %v3260_v41 = vld [vmem:[%s5919_s1 + $0x658] sm:$0xf0] }
  0xd0   :  { %2115 = vmatpush.bf16.msra.mxu0 %v2871_v54  ;;  %v3792_v54 = vld [vmem:[%s5919_s1 + $0x404] sm:$0xf]  ;;  %v1889_v55 = vpop.f32.mrf.mxu2  ;;  %v2839_v4 = vor.u32 %v3760_v45, %v2836_v29  ;;  %v3324_v42 = vld [vmem:[%s5919_s1 + $0x6d8] sm:$0xf0]  ;;  %v3188_v45 = vld [vmem:[%s5919_s1 + $0x5c8] sm:$0xf0] }
  0xd1   :  { %2128 = vmatpush.bf16.msra.mxu1 %v2935_v56  ;;  %v3039_v56 = vor.u32 %v3810_v44, %v3036_v27  ;;  %v1902_v61 = vpop.f32.mrf.mxu3  ;;  %v3199_v44 = vor.u32 %v3850_v34, %v3196_v39  ;;  %v3864_v29 = vld [vmem:[%s5919_s1 + $0x644] sm:$0xf]  ;;  %v3180_v63 = vld [vmem:[%s5919_s1 + $0x5b8] sm:$0xf0] }
  0xd2   :  { %2141 = vmatpush.bf16.msra.mxu2 %v2999_v57  ;;  %v2964_v57 = vld [vmem:[%s5919_s1 + $0x408] sm:$0xf0]  ;;  %v3846_v61 = vld [vmem:[%s5919_s1 + $0x5b4] sm:$0xf]  ;;  %v3308_v6 = vld [vmem:[%s5919_s1 + $0x6b8] sm:$0xf0] }
  0xd3   :  { %2154 = vmatpush.bf16.msra.mxu3 %v3063_v3  ;;  %v3854_v3 = vld [vmem:[%s5919_s1 + $0x5f4] sm:$0xf]  ;;  %v2967_v10 = vor.u32 %v3792_v54, %v2964_v57  ;;  %v3164_v34 = vld [vmem:[%s5919_s1 + $0x598] sm:$0xf0] }
  0xd4   :  { %2116 = vmatpush.bf16.msra.mxu0 %v2863_v11  ;;  %v3886_v11 = vld [vmem:[%s5919_s1 + $0x6f4] sm:$0xf]  ;;  %v3215_v19 = vor.u32 %v3854_v3, %v3212_v5  ;;  %v3228_v39 = vld [vmem:[%s5919_s1 + $0x618] sm:$0xf0] }
  0xd5   :  { %2129 = vmatpush.bf16.msra.mxu1 %v2927_v13  ;;  %v3340_v13 = vld [vmem:[%s5919_s1 + $0x6f8] sm:$0xf0]  ;;  %v3862_v3 = vld [vmem:[%s5919_s1 + $0x634] sm:$0xf] }
  0xd6   :  { %2142 = vmatpush.bf16.msra.mxu2 %v2991_v14  ;;  %v3031_v14 = vor.u32 %v3808_v58, %v3028_v59  ;;  %v3343_v24 = vor.u32 %v3886_v11, %v3340_v13  ;;  %v3830_v58 = vld [vmem:[%s5919_s1 + $0x534] sm:$0xf]  ;;  %v3116_v59 = vld [vmem:[%s5919_s1 + $0x538] sm:$0xf0]  ;;  %v3828_v11 = vld [vmem:[%s5919_s1 + $0x524] sm:$0xf] }
  0xd7   :  { %2155 = vmatpush.bf16.msra.mxu3 %v3055_v22  ;;  %v3140_v22 = vld [vmem:[%s5919_s1 + $0x568] sm:$0xf0]  ;;  %v3878_v5 = vld [vmem:[%s5919_s1 + $0x6b4] sm:$0xf]  ;;  %v3119_v7 = vor.u32 %v3830_v58, %v3116_v59  ;;  %v3468_v59 = vld [vmem:[%s5919_s1 + $0x7f8] sm:$0xf0] }
  0xd8   :  { %2117 = vmatpush.bf16.msra.mxu0 %v2855_v33  ;;  %v3143_v33 = vor.u32 %v3836_v21, %v3140_v22  ;;  %v3108_v13 = vld [vmem:[%s5919_s1 + $0x528] sm:$0xf0]  ;;  %v3860_v21 = vld [vmem:[%s5919_s1 + $0x624] sm:$0xf] }
  0xd9   :  { %2130 = vmatpush.bf16.msra.mxu1 %v2919_v37  ;;  %v3271_v37 = vor.u32 %v3868_v26, %v3268_v30  ;;  %v3236_v22 = vld [vmem:[%s5919_s1 + $0x628] sm:$0xf0]  ;;  %v3111_v30 = vor.u32 %v3828_v11, %v3108_v13  ;;  %v3900_v11 = vld [vmem:[%s5919_s1 + $0x764] sm:$0xf] }
  0xda   :  { %2143 = vmatpush.bf16.msra.mxu2 %v2983_v28  ;;  %v3834_v28 = vld [vmem:[%s5919_s1 + $0x554] sm:$0xf]  ;;  %v3396_v13 = vld [vmem:[%s5919_s1 + $0x768] sm:$0xf0] }
  0xdb   :  { %2156 = vmatpush.bf16.msra.mxu3 %v3047_v40  ;;  %v3866_v40 = vld [vmem:[%s5919_s1 + $0x654] sm:$0xf]  ;;  %v3135_v43 = vor.u32 %v3834_v28, %v3132_v38 }
  0xdc   :  { %2118 = vmatpush.bf16.msra.mxu0 %v2847_v2  ;;  %v3263_v27 = vor.u32 %v3866_v40, %v3260_v41  ;;  %v3848_v2 = vld [vmem:[%s5919_s1 + $0x5c4] sm:$0xf]  ;;  %v3842_v28 = vld [vmem:[%s5919_s1 + $0x594] sm:$0xf]  ;;  %v3292_v41 = vld [vmem:[%s5919_s1 + $0x698] sm:$0xf0] }
  0xdd   :  { %2131 = vmatpush.bf16.msra.mxu1 %v2911_v50  ;;  %v3252_v50 = vld [vmem:[%s5919_s1 + $0x648] sm:$0xf0]  ;;  %v3874_v40 = vld [vmem:[%s5919_s1 + $0x694] sm:$0xf] }
  0xde   :  { %2144 = vmatpush.bf16.msra.mxu2 %v2975_v51  ;;  %v3255_v57 = vor.u32 %v3864_v29, %v3252_v50  ;;  %v3872_v29 = vld [vmem:[%s5919_s1 + $0x684] sm:$0xf]  ;;  %v3284_v50 = vld [vmem:[%s5919_s1 + $0x688] sm:$0xf0] }
  0xdf   :  { %2157 = vmatpush.bf16.msra.mxu3 %v3039_v56  ;;  %v3191_v56 = vor.u32 %v3848_v2, %v3188_v45  ;;  %v3856_v2 = vld [vmem:[%s5919_s1 + $0x604] sm:$0xf]  ;;  %v3220_v45 = vld [vmem:[%s5919_s1 + $0x608] sm:$0xf0] }
  0xe0   :  { %2119 = vmatpush.bf16.msra.mxu0 %v2839_v4  ;;  %v5538_v51 = vpop.f32.mrf.mxu0  ;;  %v3244_v4 = vld [vmem:[%s5919_s1 + $0x638] sm:$0xf0] }
  0xe1   :  { %2132 = vmatpush.bf16.msra.mxu1 %v2903_v8  ;;  %v5546_v55 = vpop.f32.mrf.mxu1  ;;  %v3183_v8 = vor.u32 %v3846_v61, %v3180_v63  ;;  %v3934_v61 = vld [vmem:[%s5919_s1 + $0x874] sm:$0xf] }
  0xe2   :  { %2145 = vmatpush.bf16.msra.mxu2 %v2967_v10  ;;  %v3247_v10 = vor.u32 %v3862_v3, %v3244_v4  ;;  %v3223_v3 = vor.u32 %v3856_v2, %v3220_v45  ;;  %v3950_v4 = vld [vmem:[%s5919_s1 + $0x8f4] sm:$0xf] }
  0xe3   :  { %2158 = vmatpush.bf16.msra.mxu3 %v3031_v14  ;;  %2120 = vmatmul.bf16.vlgmr.msra.gmra.mxu0 %v4422_v60  ;;  %v3882_v60 = vld [vmem:[%s5919_s1 + $0x6d4] sm:$0xf]  ;;  %v3844_v14 = vld [vmem:[%s5919_s1 + $0x5a4] sm:$0xf] }
  0xe4   :  { %2164 = vmatpush.bf16.msrb.mxu0 %v3151_v18  ;;  %2133 = vmatmul.bf16.vlgmr.msra.gmra.mxu1 %v4429_v1  ;;  %v3832_v1 = vld [vmem:[%s5919_s1 + $0x544] sm:$0xf]  ;;  %v3311_v18 = vor.u32 %v3878_v5, %v3308_v6  ;;  %v3596_v5 = vld [vmem:[%s5919_s1 + $0x8f8] sm:$0xf0]  ;;  %v3287_v6 = vor.u32 %v3872_v29, %v3284_v50  ;;  %v3894_v50 = vld [vmem:[%s5919_s1 + $0x734] sm:$0xf] }
  0xe5   :  { %2177 = vmatpush.bf16.msrb.mxu1 %v3215_v19  ;;  %2146 = vmatmul.bf16.vlgmr.msra.gmra.mxu2 %v4677_v12  ;;  %v3124_v12 = vld [vmem:[%s5919_s1 + $0x548] sm:$0xf0] }
  0xe6   :  { %2190 = vmatpush.bf16.msrb.mxu2 %v3279_v20  ;;  %2159 = vmatmul.bf16.vlgmr.msra.gmra.mxu3 %v4687_v16  ;;  %v3327_v16 = vor.u32 %v3882_v60, %v3324_v42  ;;  %v3127_v54 = vor.u32 %v3832_v1, %v3124_v12  ;;  %v3172_v20 = vld [vmem:[%s5919_s1 + $0x5a8] sm:$0xf0]  ;;  %v3824_v42 = vld [vmem:[%s5919_s1 + $0x504] sm:$0xf] }
  0xe7   :  { %2203 = vmatpush.bf16.msrb.mxu3 %v3343_v24  ;;  %v3876_v24 = vld [vmem:[%s5919_s1 + $0x6a4] sm:$0xf]  ;;  %v3175_v32 = vor.u32 %v3844_v14, %v3172_v20  ;;  %v3156_v12 = vld [vmem:[%s5919_s1 + $0x588] sm:$0xf0] }
  0xe8   :  { %2165 = vmatpush.bf16.msrb.mxu0 %v3143_v33  ;;  %v5581_v19 = vpop.f32.mrf.mxu2  ;;  %v1915_v26 = vpop.f32.mrf.mxu0  ;;  %v3239_v33 = vor.u32 %v3860_v21, %v3236_v22  ;;  %v3303_v38 = vor.u32 %v3876_v24, %v3300_v25  ;;  %v3840_v1 = vld [vmem:[%s5919_s1 + $0x584] sm:$0xf]  ;;  %v3460_v20 = vld [vmem:[%s5919_s1 + $0x7e8] sm:$0xf0] }
  0xe9   :  { %2178 = vmatpush.bf16.msrb.mxu1 %v3207_v36  ;;  %v5592_v23 = vpop.f32.mrf.mxu3  ;;  %v1928_v31 = vpop.f32.mrf.mxu1  ;;  %v3826_v36 = vld [vmem:[%s5919_s1 + $0x514] sm:$0xf]  ;;  %v3159_v63 = vor.u32 %v3840_v1, %v3156_v12  ;;  %v3916_v14 = vld [vmem:[%s5919_s1 + $0x7e4] sm:$0xf]  ;;  %v3524_v22 = vld [vmem:[%s5919_s1 + $0x868] sm:$0xf0]  ;;  %v3399_v26 = vor.u32 %v3900_v11, %v3396_v13 }
  0xea   :  { %2191 = vmatpush.bf16.msrb.mxu2 %v3271_v37  ;;  %v3100_v37 = vld [vmem:[%s5919_s1 + $0x518] sm:$0xf0]  ;;  %v3932_v21 = vld [vmem:[%s5919_s1 + $0x864] sm:$0xf]  ;;  %v3588_v25 = vld [vmem:[%s5919_s1 + $0x8e8] sm:$0xf0] }
  0xeb   :  { %2204 = vmatpush.bf16.msrb.mxu3 %v3335_v0  ;;  %v3858_v0 = vld [vmem:[%s5919_s1 + $0x614] sm:$0xf]  ;;  %v3103_v60 = vor.u32 %v3826_v36, %v3100_v37  ;;  %v3948_v24 = vld [vmem:[%s5919_s1 + $0x8e4] sm:$0xf]  ;;  %v3527_v31 = vor.u32 %v3932_v21, %v3524_v22  ;;  %v3572_v12 = vld [vmem:[%s5919_s1 + $0x8c8] sm:$0xf0] }
  0xec   :  { %2166 = vmatpush.bf16.msrb.mxu0 %v3135_v43  ;;  %v3092_v43 = vld [vmem:[%s5919_s1 + $0x508] sm:$0xf0]  ;;  %v3914_v36 = vld [vmem:[%s5919_s1 + $0x7d4] sm:$0xf]  ;;  %v3591_v37 = vor.u32 %v3948_v24, %v3588_v25  ;;  %v3944_v1 = vld [vmem:[%s5919_s1 + $0x8c4] sm:$0xf] }
  0xed   :  { %2179 = vmatpush.bf16.msrb.mxu1 %v3199_v44  ;;  %v3167_v44 = vor.u32 %v3842_v28, %v3164_v34  ;;  %v3095_v58 = vor.u32 %v3824_v42, %v3092_v43  ;;  %v3452_v28 = vld [vmem:[%s5919_s1 + $0x7d8] sm:$0xf0]  ;;  %v3444_v42 = vld [vmem:[%s5919_s1 + $0x7c8] sm:$0xf0]  ;;  %v3928_v43 = vld [vmem:[%s5919_s1 + $0x844] sm:$0xf] }
  0xee   :  { %2192 = vmatpush.bf16.msrb.mxu2 %v3263_v27  ;;  %v3231_v27 = vor.u32 %v3858_v0, %v3228_v39  ;;  %v3516_v34 = vld [vmem:[%s5919_s1 + $0x858] sm:$0xf0]  ;;  %v3924_v11 = vld [vmem:[%s5919_s1 + $0x824] sm:$0xf]  ;;  %v3492_v13 = vld [vmem:[%s5919_s1 + $0x828] sm:$0xf0] }
  0xef   :  { %2205 = vmatpush.bf16.msrb.mxu3 %v3327_v16  ;;  %v3295_v16 = vor.u32 %v3874_v40, %v3292_v41  ;;  %v3580_v0 = vld [vmem:[%s5919_s1 + $0x8d8] sm:$0xf0]  ;;  %v3455_v40 = vor.u32 %v3914_v36, %v3452_v28 }
  0xf0   :  { %2167 = vmatpush.bf16.msrb.mxu0 %v3127_v54  ;;  %v1941_v52 = vpop.f32.mrf.mxu2  ;;  %v3404_v54 = vld [vmem:[%s5919_s1 + $0x778] sm:$0xf0] }
  0xf1   :  { %2180 = vmatpush.bf16.msrb.mxu1 %v3191_v56  ;;  %v3918_v56 = vld [vmem:[%s5919_s1 + $0x7f4] sm:$0xf]  ;;  %v3372_v52 = vld [vmem:[%s5919_s1 + $0x738] sm:$0xf0] }
  0xf2   :  { %2193 = vmatpush.bf16.msrb.mxu2 %v3255_v57  ;;  %v1954_v57 = vpop.f32.mrf.mxu3  ;;  %v3420_v36 = vld [vmem:[%s5919_s1 + $0x798] sm:$0xf0] }
  0xf3   :  { %2206 = vmatpush.bf16.msrb.mxu3 %v3319_v62  ;;  %v3532_v62 = vld [vmem:[%s5919_s1 + $0x878] sm:$0xf0]  ;;  %v3926_v57 = vld [vmem:[%s5919_s1 + $0x834] sm:$0xf] }
  0xf4   :  { %2168 = vmatpush.bf16.msrb.mxu0 %v3119_v7  ;;  %v3407_v7 = vor.u32 %v3902_v53, %v3404_v54  ;;  %v3910_v53 = vld [vmem:[%s5919_s1 + $0x7b4] sm:$0xf]  ;;  %v3575_v54 = vor.u32 %v3944_v1, %v3572_v12  ;;  %v3484_v28 = vld [vmem:[%s5919_s1 + $0x818] sm:$0xf0]  ;;  %v3936_v1 = vld [vmem:[%s5919_s1 + $0x884] sm:$0xf] }
  0xf5   :  { %2181 = vmatpush.bf16.msrb.mxu1 %v3183_v8  ;;  %v3471_v8 = vor.u32 %v3918_v56, %v3468_v59  ;;  %v3436_v56 = vld [vmem:[%s5919_s1 + $0x7b8] sm:$0xf0]  ;;  %v3942_v59 = vld [vmem:[%s5919_s1 + $0x8b4] sm:$0xf]  ;;  %v3540_v12 = vld [vmem:[%s5919_s1 + $0x888] sm:$0xf0] }
  0xf6   :  { %2194 = vmatpush.bf16.msrb.mxu2 %v3247_v10  ;;  %v3535_v10 = vor.u32 %v3934_v61, %v3532_v62  ;;  %v3564_v61 = vld [vmem:[%s5919_s1 + $0x8b8] sm:$0xf0]  ;;  %v3375_v62 = vor.u32 %v3894_v50, %v3372_v52  ;;  %v3543_v52 = vor.u32 %v3936_v1, %v3540_v12  ;;  %v3962_v12 = vld [vmem:[%s5921_s3 + $0x50] sm:$0xff] }
  0xf7   :  { %2207 = vmatpush.bf16.msrb.mxu3 %v3311_v18  ;;  %v3599_v18 = vor.u32 %v3950_v4, %v3596_v5  ;;  %v3892_v4 = vld [vmem:[%s5919_s1 + $0x724] sm:$0xf]  ;;  %v3364_v5 = vld [vmem:[%s5919_s1 + $0x728] sm:$0xf0] }
  0xf8   :  { %2169 = vmatpush.bf16.msrb.mxu0 %v3111_v30  ;;  %v3463_v30 = vor.u32 %v3916_v14, %v3460_v20  ;;  %v3556_v20 = vld [vmem:[%s5919_s1 + $0x8a8] sm:$0xf0]  ;;  %v3367_v22 = vor.u32 %v3892_v4, %v3364_v5 }
  0xf9   :  { %2182 = vmatpush.bf16.msrb.mxu1 %v3175_v32  ;;  %v3898_v32 = vld [vmem:[%s5919_s1 + $0x754] sm:$0xf] }
  0xfa   :  { %2195 = vmatpush.bf16.msrb.mxu2 %v3239_v33  ;;  %v3388_v33 = vld [vmem:[%s5919_s1 + $0x758] sm:$0xf0] }
  0xfb   :  { %2208 = vmatpush.bf16.msrb.mxu3 %v3303_v38  ;;  %v3930_v38 = vld [vmem:[%s5919_s1 + $0x854] sm:$0xf]  ;;  %v3391_v39 = vor.u32 %v3898_v32, %v3388_v33 }
  0xfc   :  { %2170 = vmatpush.bf16.msrb.mxu0 %v3103_v60  ;;  %v3519_v41 = vor.u32 %v3930_v38, %v3516_v34  ;;  %v3912_v60 = vld [vmem:[%s5919_s1 + $0x7c4] sm:$0xf]  ;;  %v3906_v32 = vld [vmem:[%s5919_s1 + $0x794] sm:$0xf]  ;;  %v3548_v34 = vld [vmem:[%s5919_s1 + $0x898] sm:$0xf0] }
  0xfd   :  { %2183 = vmatpush.bf16.msrb.mxu1 %v3167_v44  ;;  %v3508_v44 = vld [vmem:[%s5919_s1 + $0x848] sm:$0xf0]  ;;  %v3447_v45 = vor.u32 %v3912_v60, %v3444_v42  ;;  %v3938_v38 = vld [vmem:[%s5919_s1 + $0x894] sm:$0xf] }
  0xfe   :  { %2196 = vmatpush.bf16.msrb.mxu2 %v3231_v27  ;;  %v3511_v29 = vor.u32 %v3928_v43, %v3508_v44  ;;  %v3412_v60 = vld [vmem:[%s5919_s1 + $0x788] sm:$0xf0]  ;;  %v1914_v44 = vadd.f32 %v5538_v51, %v5394_v35  ;;  %v3959_v35 = vld [vmem:[%s5921_s3 + $0x38] sm:$0xff] }
  0xff   :  { %2209 = vmatpush.bf16.msrb.mxu3 %v3295_v16  ;;  %v3476_v42 = vld [vmem:[%s5919_s1 + $0x808] sm:$0xf0] }
 0x100   :  { %2171 = vmatpush.bf16.msrb.mxu0 %v3095_v58  ;;  %v5742_v27 = vpop.f32.mrf.mxu0  ;;  %v3500_v58 = vld [vmem:[%s5919_s1 + $0x838] sm:$0xf0]  ;;  %v1927_v51 = vadd.f32 %v5546_v55, %v1914_v44  ;;  %v3971_v55 = vld [vmem:[#allocation1 + $0x9] sm:$0xff] }
 0x101   :  { %2184 = vmatpush.bf16.msrb.mxu1 %v3159_v63  ;;  %v5750_v16 = vpop.f32.mrf.mxu1  ;;  %v3439_v63 = vor.u32 %v3910_v53, %v3436_v56  ;;  %v3970_v56 = vld [vmem:[#allocation1] sm:$0xff]  ;;  %v3963_v44 = vld [vmem:[%s5921_s3 + $0x58] sm:$0xff] }
 0x102   :  { %2197 = vmatpush.bf16.msrb.mxu2 %v3223_v3  ;;  %v3503_v3 = vor.u32 %v3926_v57, %v3500_v58  ;;  %v1940_v53 = vadd.f32 %v5581_v19, %v1927_v51  ;;  %v3957_v19 = vld [vmem:[%s5921_s3 + $0x28] sm:$0xff] }
 0x103   :  { %2210 = vmatpush.bf16.msrb.mxu3 %v3287_v6  ;;  %2172 = vmatmul.bf16.vlgmr.msrb.gmra.mxu0 %v4685_v15  ;;  %v3946_v15 = vld [vmem:[%s5919_s1 + $0x8d4] sm:$0xf]  ;;  %v3908_v6 = vld [vmem:[%s5919_s1 + $0x7a4] sm:$0xf] }
 0x104   :  { %2216 = vmatpush.bf16.msra.mxu0 %v3407_v7  ;;  %2185 = vmatmul.bf16.vlgmr.msrb.gmra.mxu1 %v4689_v17  ;;  %v3896_v17 = vld [vmem:[%s5919_s1 + $0x744] sm:$0xf]  ;;  %v3567_v7 = vor.u32 %v3942_v59, %v3564_v61  ;;  %v1953_v57 = vadd.f32 %v5592_v23, %v1940_v53 }
 0x105   :  { %2229 = vmatpush.bf16.msra.mxu1 %v3471_v8  ;;  %2198 = vmatmul.bf16.vlgmr.msrb.gmra.mxu2 %v4851_v46  ;;  %v3380_v46 = vld [vmem:[%s5919_s1 + $0x748] sm:$0xf0]  ;;  %v3960_v53 = vld [vmem:[%s5921_s3 + $0x40] sm:$0xff] }
 0x106   :  { %2242 = vmatpush.bf16.msra.mxu2 %v3535_v10  ;;  %2211 = vmatmul.bf16.vlgmr.msrb.gmra.mxu3 %v4855_v48  ;;  %v3583_v48 = vor.u32 %v3946_v15, %v3580_v0  ;;  %v3383_v2 = vor.u32 %v3896_v17, %v3380_v46  ;;  %v3428_v10 = vld [vmem:[%s5919_s1 + $0x7a8] sm:$0xf0]  ;;  %v3423_v0 = vor.u32 %v3906_v32, %v3420_v36  ;;  %v3904_v17 = vld [vmem:[%s5919_s1 + $0x784] sm:$0xf] }
 0x107   :  { %2255 = vmatpush.bf16.msra.mxu3 %v3599_v18  ;;  %v3940_v18 = vld [vmem:[%s5919_s1 + $0x8a4] sm:$0xf]  ;;  %v3431_v25 = vor.u32 %v3908_v6, %v3428_v10  ;;  %v3551_v46 = vor.u32 %v3938_v38, %v3548_v34  ;;  %v1966_v58 = vadd.f32 %v5742_v27, %v1953_v57 }
 0x108   :  { %2217 = vmatpush.bf16.msra.mxu0 %v3399_v26  ;;  %v5785_v8 = vpop.f32.mrf.mxu2  ;;  %v1967_v21 = vpop.f32.mrf.mxu0  ;;  %v3495_v26 = vor.u32 %v3924_v11, %v3492_v13  ;;  %v3559_v33 = vor.u32 %v3940_v18, %v3556_v20 }
 0x109   :  { %2230 = vmatpush.bf16.msra.mxu1 %v3463_v30  ;;  %v5796_v14 = vpop.f32.mrf.mxu3  ;;  %v1980_v24 = vpop.f32.mrf.mxu1  ;;  %v3890_v30 = vld [vmem:[%s5919_s1 + $0x714] sm:$0xf]  ;;  %v1979_v61 = vadd.f32 %v5750_v16, %v1966_v58 }
 0x10a   :  { %2243 = vmatpush.bf16.msra.mxu2 %v3527_v31  ;;  %v3356_v31 = vld [vmem:[%s5919_s1 + $0x718] sm:$0xf0]  ;;  %v3954_v16 = vld [vmem:[%s5921_s3 + $0x10] sm:$0xff] }
 0x10b   :  { %2256 = vmatpush.bf16.msra.mxu3 %v3591_v37  ;;  %v3922_v37 = vld [vmem:[%s5919_s1 + $0x814] sm:$0xf]  ;;  %v3359_v15 = vor.u32 %v3890_v30, %v3356_v31  ;;  %v1992_v23 = vadd.f32 %v5785_v8, %v1979_v61 }
 0x10c   :  { %2218 = vmatpush.bf16.msra.mxu0 %v3391_v39  ;;  %v3487_v39 = vor.u32 %v3922_v37, %v3484_v28 }
 0x10d   :  { %2231 = vmatpush.bf16.msra.mxu1 %v3455_v40  ;;  %v3888_v40 = vld [vmem:[%s5919_s1 + $0x704] sm:$0xf]  ;;  %v2005_v27 = vadd.f32 %v5796_v14, %v1992_v23 }
 0x10e   :  { %2244 = vmatpush.bf16.msra.mxu2 %v3519_v41  ;;  %v3348_v41 = vld [vmem:[%s5919_s1 + $0x708] sm:$0xf0]  ;;  %v3952_v14 = vld [vmem:[%s5921_s3] sm:$0xff] }
 0x10f   :  { %2257 = vmatpush.bf16.msra.mxu3 %v3583_v48  ;;  %v3920_v48 = vld [vmem:[%s5919_s1 + $0x804] sm:$0xf] }
 0x110   :  { %2219 = vmatpush.bf16.msra.mxu0 %v3383_v2  ;;  %v1993_v43 = vpop.f32.mrf.mxu2  ;;  %v3479_v50 = vor.u32 %v3920_v48, %v3476_v42 }
 0x111   :  { %2232 = vmatpush.bf16.msra.mxu1 %v3447_v45  ;;  %v2006_v2 = vpop.f32.mrf.mxu3  ;;  %v3351_v45 = vor.u32 %v3888_v40, %v3348_v41  ;;  %v3967_v41 = vld [vmem:[%s5921_s3 + $0x78] sm:$0xff]  ;;  %v3964_v43 = vld [vmem:[%s5921_s3 + $0x60] sm:$0xff] }
 0x112   :  { %2245 = vmatpush.bf16.msra.mxu2 %v3511_v29  ;;  %v3415_v29 = vor.u32 %v3904_v17, %v3412_v60  ;;  %v3965_v60 = vld [vmem:[%s5921_s3 + $0x68] sm:$0xff] }
 0x113   :  { %2258 = vmatpush.bf16.msra.mxu3 %v3575_v54  ;;  %v3958_v54 = vld [vmem:[%s5921_s3 + $0x30] sm:$0xff] }
 0x114   :  { %2220 = vmatpush.bf16.msra.mxu0 %v3375_v62  ;;  %v315_v62 = vperm.slane %v5189_v9, 1  ;;  %v3953_v9 = vld [vmem:[%s5921_s3 + $0x8] sm:$0xff] }
 0x115   :  { %2233 = vmatpush.bf16.msra.mxu1 %v3439_v63  ;;  %v3955_v63 = vld [vmem:[%s5921_s3 + $0x18] sm:$0xff] }
 0x116   :  { %2246 = vmatpush.bf16.msra.mxu2 %v3503_v3 }
 0x117   :  { %2259 = vmatpush.bf16.msra.mxu3 %v3567_v7 }
 0x118   :  { %2221 = vmatpush.bf16.msra.mxu0 %v3367_v22 }
 0x119   :  { %2234 = vmatpush.bf16.msra.mxu1 %v3431_v25 }
 0x11a   :  { %2247 = vmatpush.bf16.msra.mxu2 %v3495_v26 }
 0x11b   :  { %2260 = vmatpush.bf16.msra.mxu3 %v3559_v33 }
 0x11c   :  { %2222 = vmatpush.bf16.msra.mxu0 %v3359_v15 }
 0x11d   :  { %2235 = vmatpush.bf16.msra.mxu1 %v3423_v0 }
 0x11e   :  { %2248 = vmatpush.bf16.msra.mxu2 %v3487_v39 }
 0x11f   :  { %2261 = vmatpush.bf16.msra.mxu3 %v3551_v46  ;;  %v3966_v46 = vld [vmem:[%s5921_s3 + $0x70] sm:$0xff] }
 0x120   :  { %2223 = vmatpush.bf16.msra.mxu0 %v3351_v45  ;;  %v2017_v59 = vpop.f32.mrf.mxu0  ;;  %v3961_v45 = vld [vmem:[%s5921_s3 + $0x48] sm:$0xff] }
 0x121   :  { %2236 = vmatpush.bf16.msra.mxu1 %v3415_v29  ;;  %v2018_v8 = vadd.f32 %v2017_v59, %v2005_v27 }
 0x122   :  { %2249 = vmatpush.bf16.msra.mxu2 %v3479_v50 }
 0x123   :  { %2262 = vmatpush.bf16.msra.mxu3 %v3543_v52  ;;  %2224 = vmatmul.bf16.vlgmr.msra.gmra.mxu0 %v4853_v47  ;;  %v3956_v47 = vld [vmem:[%s5921_s3 + $0x20] sm:$0xff] }
 0x124   :  { %2404 = vmatpush.bf16.msrb.mxu0 %v3959_v35  ;;  %2237 = vmatmul.bf16.vlgmr.msra.gmra.mxu1 %v4857_v49  ;;  %v2030_v49 = vpop.f32.mrf.mxu1 }
 0x125   :  { %2250 = vmatmul.bf16.vlgmr.msra.gmra.mxu2 %v3970_v56  ;;  %v2031_v11 = vadd.f32 %v2030_v49, %v2018_v8  ;;  %2417 = vmatpush.bf16.msrb.mxu1 %v3967_v41 }
 0x126   :  { %2263 = vmatmul.bf16.vlgmr.msra.gmra.mxu3 %v3971_v55 }
 0x127   :  { %v2268_v20 = vmax.f32 %v2031_v11, 0.0 }
 0x128   :  { %2405 = vmatpush.bf16.msrb.mxu0 %v3958_v54  ;;  %v2043_v3 = vpop.f32.mrf.mxu2  ;;  %v2019_v6 = vpop.f32.mrf.mxu0 }
 0x129   :  { %v2044_v4 = vadd.f32 %v2043_v3, %v315_v62  ;;  %v2056_v5 = vpop.f32.mrf.mxu3  ;;  %v2270_v21 = vpack.c.bf16 %v2268_v20, %v2268_v20  ;;  %2418 = vmatpush.bf16.msrb.mxu1 %v3966_v46 }
 0x12b   :  { %v2057_v10 = vadd.f32 %v2056_v5, %v2044_v4 }
 0x12c   :  { %2406 = vmatpush.bf16.msrb.mxu0 %v3957_v19  ;;  %v2032_v7 = vpop.f32.mrf.mxu1 }
 0x12d   :  { %2419 = vmatpush.bf16.msrb.mxu1 %v3965_v60 }
 0x130   :  { %2407 = vmatpush.bf16.msrb.mxu0 %v3956_v47  ;;  %v2045_v13 = vpop.f32.mrf.mxu2 }
 0x131   :  { %v2058_v18 = vpop.f32.mrf.mxu3  ;;  %2420 = vmatpush.bf16.msrb.mxu1 %v3964_v43 }
 0x132   :  { %v3969_v18 = vld [vmem:[%s5922_s4] ss:$0 sm:$0xff] }
 0x134   :  { %2408 = vmatpush.bf16.msrb.mxu0 %v3955_v63 }
 0x135   :  { %2421 = vmatpush.bf16.msrb.mxu1 %v3963_v44 }
 0x138   :  { %2409 = vmatpush.bf16.msrb.mxu0 %v3954_v16 }
 0x139   :  { %2422 = vmatpush.bf16.msrb.mxu1 %v3962_v12 }
 0x13c   :  { %2410 = vmatpush.bf16.msrb.mxu0 %v3953_v9 }
 0x13d   :  { %2423 = vmatpush.bf16.msrb.mxu1 %v3961_v45 }
 0x140   :  { %2411 = vmatpush.bf16.msrb.mxu0 %v3952_v14  ;;  %v2069_v22 = vpop.f32.mrf.mxu0 }
 0x141   :  { %v2070_v24 = vadd.f32 %v2069_v22, %v2057_v10  ;;  %v2082_v25 = vpop.f32.mrf.mxu1  ;;  %2424 = vmatpush.bf16.msrb.mxu1 %v3960_v53 }
 0x143   :  { %2412 = vmatmul.bf16.vlgmr.msrb.gmra.mxu0 %v2270_v21  ;;  %v2083_v26 = vadd.f32 %v2082_v25, %v2070_v24 }
 0x148   :  { %v2095_v30 = vpop.f32.mrf.mxu2  ;;  %v2071_v36 = vpop.f32.mrf.mxu0 }
 0x149   :  { %v2096_v31 = vadd.f32 %v2095_v30, %v2083_v26  ;;  %v2108_v32 = vpop.f32.mrf.mxu3  ;;  %v2084_v37 = vpop.f32.mrf.mxu1 }
 0x14b   :  { %v2109_v33 = vadd.f32 %v2108_v32, %v2096_v31 }
 0x150   :  { %v2097_v28 = vpop.f32.mrf.mxu2 }
 0x151   :  { %v2110_v38 = vpop.f32.mrf.mxu3 }
 0x160   :  { %v2121_v34 = vpop.f32.mrf.mxu0 }
 0x161   :  { %v2134_v15 = vpop.f32.mrf.mxu1  ;;  %v2122_v29 = vadd.f32 %v2121_v34, %v2109_v33 }
 0x163   :  { %v2135_v54 = vadd.f32 %v2134_v15, %v2122_v29 }
 0x168   :  { %v2147_v0 = vpop.f32.mrf.mxu2  ;;  %v2123_v40 = vpop.f32.mrf.mxu0 }
 0x169   :  { %v2160_v39 = vpop.f32.mrf.mxu3  ;;  %v2136_v17 = vpop.f32.mrf.mxu1  ;;  %v2148_v56 = vadd.f32 %v2147_v0, %v2135_v54 }
 0x16b   :  { %v2161_v19 = vadd.f32 %v2160_v39, %v2148_v56 }
 0x170   :  { %v2149_v48 = vpop.f32.mrf.mxu2 }
 0x171   :  { %v2162_v42 = vpop.f32.mrf.mxu3 }
 0x180   :  { %v2173_v1 = vpop.f32.mrf.mxu0 }
 0x181   :  { %v2186_v2 = vpop.f32.mrf.mxu1  ;;  %v2174_v58 = vadd.f32 %v2173_v1, %v2161_v19 }
 0x183   :  { %v2187_v59 = vadd.f32 %v2186_v2, %v2174_v58 }
 0x188   :  { %v2199_v50 = vpop.f32.mrf.mxu2  ;;  %v2175_v35 = vpop.f32.mrf.mxu0 }
 0x189   :  { %v2212_v52 = vpop.f32.mrf.mxu3  ;;  %v2188_v51 = vpop.f32.mrf.mxu1  ;;  %v2200_v47 = vadd.f32 %v2199_v50, %v2187_v59 }
 0x18b   :  { %v2213_v49 = vadd.f32 %v2212_v52, %v2200_v47 }
 0x190   :  { %v2201_v57 = vpop.f32.mrf.mxu2 }
 0x191   :  { %v2214_v55 = vpop.f32.mrf.mxu3 }
 0x1a0   :  { %v2225_v61 = vpop.f32.mrf.mxu0 }
 0x1a1   :  { %v2238_v23 = vpop.f32.mrf.mxu1  ;;  %v2226_v62 = vadd.f32 %v2225_v61, %v2213_v49 }
 0x1a3   :  { %v2239_v63 = vadd.f32 %v2238_v23, %v2226_v62 }
 0x1a8   :  { %v2251_v3 = vpop.f32.mrf.mxu2  ;;  %v2227_v5 = vpop.f32.mrf.mxu0 }
 0x1a9   :  { %v2252_v27 = vadd.f32 %v2251_v3, %v2239_v63  ;;  %v2264_v4 = vpop.f32.mrf.mxu3  ;;  %v2240_v6 = vpop.f32.mrf.mxu1 }
 0x1ab   :  { %v2265_v16 = vadd.f32 %v2264_v4, %v2252_v27 }
 0x1ad   :  { %v2269_v7 = vmax.f32 %v2265_v16, 0.0 }
 0x1af   :  { %v2271_v8 = vpack.c.bf16 %v2269_v7, %v2269_v7 }
 0x1b0   :  { %v2253_v10 = vpop.f32.mrf.mxu2 }
 0x1b1   :  { %v2266_v9 = vpop.f32.mrf.mxu3  ;;  %2425 = vmatmul.bf16.vlgmr.msrb.gmra.mxu1 %v2271_v8 }
 0x1c0   :  { %v2413_v11 = vpop.f32.mrf.mxu0 }
 0x1c1   :  { %v2414_v14 = vadd.f32 %v3969_v18, %v2413_v11 }
 0x1c8   :  { %v2415_v13 = vpop.f32.mrf.mxu0 }
 0x22e   :  { %v2426_v20 = vpop.f32.mrf.mxu1 }
 0x22f   :  { %v2427_v21 = vadd.f32 %v2426_v20, %v2414_v14 }
 0x231   :  { %2431 = vst.msk [vmem:[#allocation2] sm:$0x3] %vm2430_vm0, %v2427_v21 }
 0x232   :  { %2442 = dma.vmem_to_hbm [thread:$0]  %s2438_s18, 32, %s2440_s21, [#allocation3]  }
 0x236   :  { %v2428_v22 = vpop.f32.mrf.mxu1 }
 0x237   :  { %3996 = dma.done.wait [#allocation3], 32  }
 0x238   :  { %3997 = vsyncadd [#allocation3], 4294967264 }
 0x239   :  { %2447 = vsyncpa [#allocation3], 1 }

</bundles_post_ra>
